<compile_context>
chip_gen: v5e
topology: v5e:2x2
jax: 0.10.0
libtpu: 0.0.40
codegen_flags: <defaults>
</compile_context>

<pallas_src>
import jax
import jax.numpy as jnp
from jax.experimental import pallas as pl
from jax.experimental.pallas import tpu as pltpu


def sae_forward(act, w_enc, b_enc, w_dec, dec_bias, sparsity, *,
                tb=None, tl=None, f_dtype=jnp.bfloat16):
    """act: [B, D]; w_enc: [L, D]; b_enc: [L]; w_dec: [D, L]; dec_bias: [D]."""
    B, D = act.shape
    L = w_enc.shape[0]
    assert w_enc.shape == (L, D) and w_dec.shape == (D, L)
    assert b_enc.shape == (L,) and dec_bias.shape == (D,)

    # Defaults: large batch tile (amortizes weight re-streaming); tl == L for
    # small problems collapses the latent reduction axis entirely.
    if tb is None:
        tb = min(B, 256)
    if tl is None:
        tl = min(L, 512)
    assert B % tb == 0 and L % tl == 0, "B/L must be divisible by tile sizes"
    assert tb == B or tb % 16 == 0, "tb must be a multiple of 16 (bf16 sublane tile)"
    assert tl == L or tl % 128 == 0, "tl must be lane-dense (multiple of 128)"
    nb, nl = B // tb, L // tl

    # One-time layout/dtype conversion of the PyTorch-native weights:
    #   encoder [L, D] -> [D, L] bf16, decoder [D, L] -> [L, D] bf16
    # so both matmuls are natural [M,K]x[K,N] with contiguous row DMA and no
    # per-tile XLU relayout.  (In training you would store them this way.)
    w_enc_t = w_enc.T.astype(jnp.bfloat16)
    w_dec_t = w_dec.T.astype(jnp.bfloat16)
    b_enc2 = b_enc.reshape(1, L).astype(jnp.float32)
    bdec2 = dec_bias.reshape(1, D).astype(jnp.float32)
    act = act.astype(jnp.float32)

    def kernel(act_ref, wenc_ref, benc_ref, wdec_ref, bdec_ref,
               rec_ref, f_ref, mse_ref, l1_ref,
               actc_ref, l1_acc_ref):
        k = pl.program_id(1)
        nk = pl.num_programs(1)

        @pl.when(k == 0)
        def _init():
            # Hoisted per-batch-tile work: bias-subtract once and stash the
            # MXU-ready bf16 encoder LHS; zero the resident accumulators.
            actc_ref[...] = (act_ref[...] - bdec_ref[...]).astype(jnp.bfloat16)
            rec_ref[...] = jnp.zeros_like(rec_ref)
            l1_acc_ref[...] = jnp.zeros_like(l1_acc_ref)

        # ---- encoder tile: f = relu(act_c @ W_enc^T[:, k-tile] + b_enc) ----
        pre = jnp.dot(actc_ref[...], wenc_ref[...],
                      preferred_element_type=jnp.float32)          # [tb, tl] f32
        f = jnp.maximum(pre + benc_ref[...], 0.0)
        f_ref[...] = f.astype(f_ref.dtype)

        # ---- L1 partial sum: pure-VPU lane-chunk fold into (tb, 128) ----
        abs_f = jnp.abs(f)
        if tl % 128 == 0:
            folded = abs_f[:, 0:128]
            for c in range(1, tl // 128):
                folded = folded + abs_f[:, c * 128:(c + 1) * 128]
            l1_acc_ref[...] += folded
        else:  # tl == L < 128 fallback (tiny latent dim)
            l1_acc_ref[:, 0:1] += jnp.sum(abs_f, axis=1, keepdims=True)

        # ---- decoder reduction over latent tiles, directly into rec block ----
        rec_ref[...] += jnp.dot(f.astype(jnp.bfloat16), wdec_ref[...],
                                preferred_element_type=jnp.float32)

        @pl.when(k == nk - 1)
        def _finalize():
            act_c = act_ref[...] - bdec_ref[...]                   # f32, once/tile
            rec = rec_ref[...] + bdec_ref[...]
            rec_ref[...] = rec
            diff = rec - act_c
            mse_ref[...] = jnp.broadcast_to(
                jnp.sum(diff * diff).reshape(1, 1, 1), mse_ref.shape)
            l1_ref[...] = jnp.broadcast_to(
                jnp.sum(l1_acc_ref[...]).reshape(1, 1, 1), l1_ref.shape)

    grid_spec = pltpu.PrefetchScalarGridSpec(
        num_scalar_prefetch=0,
        grid=(nb, nl),
        in_specs=[
            pl.BlockSpec((tb, D), lambda i, k: (i, 0)),   # act        [B, D] f32
            pl.BlockSpec((D, tl), lambda i, k: (0, k)),   # W_enc^T    [D, L] bf16
            pl.BlockSpec((1, tl), lambda i, k: (0, k)),   # b_enc      [1, L] f32
            pl.BlockSpec((tl, D), lambda i, k: (k, 0)),   # W_dec^T    [L, D] bf16
            pl.BlockSpec((1, D), lambda i, k: (0, 0)),    # dec_bias   [1, D] f32
        ],
        out_specs=(
            pl.BlockSpec((tb, D), lambda i, k: (i, 0)),         # rec (f32 accum)
            pl.BlockSpec((tb, tl), lambda i, k: (i, k)),        # f
            pl.BlockSpec((1, 8, 128), lambda i, k: (i, 0, 0)),  # mse partial sums
            pl.BlockSpec((1, 8, 128), lambda i, k: (i, 0, 0)),  # l1 partial sums
        ),
        scratch_shapes=[
            pltpu.VMEM((tb, D), jnp.bfloat16),    # hoisted bf16 act_c (encoder LHS)
            pltpu.VMEM((tb, 128), jnp.float32),   # L1 lane-fold accumulator
        ],
    )

    # Raise the scoped VMEM limit only when the pipelined working set needs it
    # (on v7x keep tiles small enough that this stays under ~56 MiB).
    fb = jnp.dtype(f_dtype).itemsize
    est = (2 * tb * D * 4 + 2 * D * tl * 2 + 2 * tl * 4 + 2 * tl * D * 2
           + 2 * D * 4 + 2 * tb * D * 4 + 2 * tb * tl * fb
           + 4 * 8 * 128 * 4 + tb * D * 2 + tb * 128 * 4)
    vmem_limit = None
    if est > (12 << 20):
        vmem_limit = min(int(est * 5 // 4) + (2 << 20), 96 << 20)

    rec, f, mse_p, l1_p = pl.pallas_call(
        kernel,
        out_shape=(
            jax.ShapeDtypeStruct((B, D), jnp.float32),
            jax.ShapeDtypeStruct((B, L), f_dtype),
            jax.ShapeDtypeStruct((nb, 8, 128), jnp.float32),
            jax.ShapeDtypeStruct((nb, 8, 128), jnp.float32),
        ),
        grid_spec=grid_spec,
        compiler_params=pltpu.CompilerParams(
            dimension_semantics=("parallel", "arbitrary"),
            vmem_limit_bytes=vmem_limit),
    )(act, w_enc_t, b_enc2, w_dec_t, bdec2)

    # Finalize scalar losses from per-batch-tile partial sums.
    rec_error = jnp.sum(mse_p[:, 0, 0]) / (B * D)
    sparsity_error = sparsity * jnp.sum(l1_p[:, 0, 0])
    total = rec_error + sparsity_error
    return total, rec_error, sparsity_error, rec, f


# ----- deterministic parameter init (mirrors the module's __init__ semantics) -----
# project_grads / normalize_decoder_cols are training-time weight maintenance,
# handled here in plain JAX at init time (not part of the forward pass).

def kaiming_uniform(key, shape):
    fan_in = shape[1]
    bound = (2.0 ** 0.5) * (3.0 / fan_in) ** 0.5
    return jax.random.uniform(key, shape, jnp.float32, -bound, bound)


def init_params(key, activation_dim, latent_dim):
    k_enc, k_encb, k_dec = jax.random.split(key, 3)
    w_enc = kaiming_uniform(k_enc, (latent_dim, activation_dim))
    bb = 1.0 / (activation_dim ** 0.5)
    b_enc = jax.random.uniform(k_encb, (latent_dim,), jnp.float32, -bb, bb)
    w_dec = kaiming_uniform(k_dec, (activation_dim, latent_dim))
    norm = jnp.maximum(jnp.linalg.norm(w_dec, axis=-1, keepdims=True), 1e-8)
    w_dec = w_dec / norm
    dec_bias = jnp.zeros((activation_dim,), jnp.float32)
    return w_enc, b_enc, w_dec, dec_bias


def _bf16_roundtrip(x):
    # Make inputs exactly bf16-representable so the kernel's bf16 operand casts
    # are lossless; the only intentional rounding left is f -> bf16 on the
    # decoder input, which the reference mirrors.
    return x.astype(jnp.bfloat16).astype(jnp.float32)


def sae_reference(act, w_enc, b_enc, w_dec, dec_bias, sparsity):
    # Pure-JAX reference mirroring the kernel numerics (bf16 MXU operands,
    # f32 accumulation).
    act_c = act - dec_bias[None, :]
    pre = jnp.dot(act_c.astype(jnp.bfloat16), w_enc.T.astype(jnp.bfloat16),
                  preferred_element_type=jnp.float32) + b_enc[None, :]
    f = jnp.maximum(pre, 0.0)
    rec = jnp.dot(f.astype(jnp.bfloat16), w_dec.T.astype(jnp.bfloat16),
                  preferred_element_type=jnp.float32) + dec_bias[None, :]
    rec_error = jnp.mean((rec - act_c) ** 2)
    sparsity_error = sparsity * jnp.sum(jnp.abs(f))
    return rec_error + sparsity_error, rec_error, sparsity_error, rec, f


if __name__ == "__main__":
    B, activation_dim, latent_dim = 128, 256, 512
    sparsity = 0.01

    key = jax.random.PRNGKey(0)
    k_params, k_act, k_bias = jax.random.split(key, 3)
    w_enc, b_enc, w_dec, dec_bias = init_params(k_params, activation_dim, latent_dim)
    # Use a nonzero dec_bias so the bias-subtract / add-back path is exercised.
    dec_bias = 0.1 * jax.random.normal(k_bias, (activation_dim,), jnp.float32)
    act = jax.random.normal(k_act, (B, activation_dim), jnp.float32)

    act, w_enc, b_enc, w_dec, dec_bias = map(
        _bf16_roundtrip, (act, w_enc, b_enc, w_dec, dec_bias))

    t_ref, re_ref, se_ref, rec_ref_v, f_ref_v = sae_reference(
        act, w_enc, b_enc, w_dec, dec_bias, sparsity)

    # (a) production-style tiling (tl == L collapses the latent reduction axis)
    # (b) small tiles purely to exercise the multi-tile accumulation path.
    for cfg in ({}, dict(tb=64, tl=128)):
        total, rec_error, sp_error, rec, f = sae_forward(
            act, w_enc, b_enc, w_dec, dec_bias, sparsity, **cfg)
        jax.block_until_ready((total, rec_error, sp_error, rec, f))

        assert jnp.allclose(f.astype(jnp.float32), f_ref_v,
                            rtol=2e-2, atol=2e-2), f"f mismatch {cfg}"
        assert jnp.allclose(rec, rec_ref_v, rtol=5e-3, atol=5e-3), f"rec mismatch {cfg}"
        assert jnp.allclose(rec_error, re_ref, rtol=5e-3, atol=1e-4), f"rec_error mismatch {cfg}"
        assert jnp.allclose(sp_error, se_ref, rtol=5e-3, atol=1e-3), f"sparsity_error mismatch {cfg}"
        assert jnp.allclose(total, t_ref, rtol=5e-3, atol=1e-3), f"total mismatch {cfg}"

    print("KERNEL_OK")
</pallas_src>

<mosaic_0001>
module attributes {stable_mosaic.version = 11 : i64} {
  func.func @kernel(%arg0: i32, %arg1: i32, %arg2: memref<128x256xf32, #tpu.memory_space<vmem>>, %arg3: memref<256x512xbf16, #tpu.memory_space<vmem>>, %arg4: memref<1x512xf32, #tpu.memory_space<vmem>>, %arg5: memref<512x256xbf16, #tpu.memory_space<vmem>>, %arg6: memref<1x256xf32, #tpu.memory_space<vmem>>, %arg7: memref<128x256xf32, #tpu.memory_space<vmem>>, %arg8: memref<128x512xbf16, #tpu.memory_space<vmem>>, %arg9: memref<1x8x128xf32, #tpu.memory_space<vmem>>, %arg10: memref<1x8x128xf32, #tpu.memory_space<vmem>>, %arg11: memref<128x256xbf16, #tpu.memory_space<vmem>>, %arg12: memref<128x128xf32, #tpu.memory_space<vmem>>) attributes {dimension_semantics = [#tpu.dimension_semantics<parallel>, #tpu.dimension_semantics<arbitrary>], iteration_bounds = array<i64: 1, 1>, scalar_prefetch = 0 : i64, scratch_operands = 2 : i64, tpu.core_type = #tpu.core_type<tc>, window_params = [{transform_indices = @transform_0, window_bounds = array<i64: 128, 256>}, {transform_indices = @transform_1, window_bounds = array<i64: 256, 512>}, {transform_indices = @transform_2, window_bounds = array<i64: 1, 512>}, {transform_indices = @transform_3, window_bounds = array<i64: 512, 256>}, {pipeline_mode = #tpu.pipeline_mode<synchronous>, transform_indices = @transform_4, window_bounds = array<i64: 1, 256>}, {transform_indices = @transform_5, window_bounds = array<i64: 128, 256>}, {transform_indices = @transform_6, window_bounds = array<i64: 128, 512>}, {transform_indices = @transform_7, window_bounds = array<i64: 1, 8, 128>}, {transform_indices = @transform_8, window_bounds = array<i64: 1, 8, 128>}]} {
    %c0_i32 = arith.constant 0 : i32
    %0 = arith.cmpi eq, %arg1, %c0_i32 : i32
    %1 = arith.extui %0 : i1 to i32
    %c0_i32_0 = arith.constant 0 : i32
    %2 = arith.cmpi ne, %1, %c0_i32_0 : i32
    scf.if %2 {
      %c0_22 = arith.constant 0 : index
      %c0_23 = arith.constant 0 : index
      %33 = vector.load %arg2[%c0_22, %c0_23] : memref<128x256xf32, #tpu.memory_space<vmem>>, vector<128x256xf32>
      %c0_24 = arith.constant 0 : index
      %c0_25 = arith.constant 0 : index
      %34 = vector.load %arg6[%c0_24, %c0_25] : memref<1x256xf32, #tpu.memory_space<vmem>>, vector<1x256xf32>
      %35 = vector.broadcast %34 : vector<1x256xf32> to vector<128x256xf32>
      %36 = arith.subf %33, %35 : vector<128x256xf32>
      %37 = arith.truncf %36 : vector<128x256xf32> to vector<128x256xbf16>
      %c0_26 = arith.constant 0 : index
      %c0_27 = arith.constant 0 : index
      %38 = vector.load %arg11[%c0_26, %c0_27] : memref<128x256xbf16, #tpu.memory_space<vmem>>, vector<128x256xbf16>
      tpu.vector_store %arg11[%c0_26, %c0_27], %37 {strides = array<i32>} : memref<128x256xbf16, #tpu.memory_space<vmem>>, vector<128x256xbf16>,
      %cst_28 = arith.constant 0.000000e+00 : f32
      %39 = vector.broadcast %cst_28 : f32 to vector<128x256xf32>
      %c0_29 = arith.constant 0 : index
      %c0_30 = arith.constant 0 : index
      %40 = vector.load %arg7[%c0_29, %c0_30] : memref<128x256xf32, #tpu.memory_space<vmem>>, vector<128x256xf32>
      tpu.vector_store %arg7[%c0_29, %c0_30], %39 {strides = array<i32>} : memref<128x256xf32, #tpu.memory_space<vmem>>, vector<128x256xf32>,
      %cst_31 = arith.constant 0.000000e+00 : f32
      %41 = vector.broadcast %cst_31 : f32 to vector<128x128xf32>
      %c0_32 = arith.constant 0 : index
      %c0_33 = arith.constant 0 : index
      %42 = vector.load %arg12[%c0_32, %c0_33] : memref<128x128xf32, #tpu.memory_space<vmem>>, vector<128x128xf32>
      tpu.vector_store %arg12[%c0_32, %c0_33], %41 {strides = array<i32>} : memref<128x128xf32, #tpu.memory_space<vmem>>, vector<128x128xf32>,
    } else {
    }
    %c0 = arith.constant 0 : index
    %c0_1 = arith.constant 0 : index
    %3 = vector.load %arg11[%c0, %c0_1] : memref<128x256xbf16, #tpu.memory_space<vmem>>, vector<128x256xbf16>
    %c0_2 = arith.constant 0 : index
    %c0_3 = arith.constant 0 : index
    %4 = vector.load %arg3[%c0_2, %c0_3] : memref<256x512xbf16, #tpu.memory_space<vmem>>, vector<256x512xbf16>
    %cst = arith.constant dense<0.000000e+00> : vector<128x512xf32>
    %5 = tpu.matmul %3, %4, %cst {dimension_numbers = #tpu.dot_dimension_numbers<[1], [0], [0], [1], [0, 0, 1, 1], [], []>} : vector<128x256xbf16>, vector<256x512xbf16>, vector<128x512xf32> -> vector<128x512xf32>
    %c0_4 = arith.constant 0 : index
    %c0_5 = arith.constant 0 : index
    %6 = vector.load %arg4[%c0_4, %c0_5] : memref<1x512xf32, #tpu.memory_space<vmem>>, vector<1x512xf32>
    %7 = vector.broadcast %6 : vector<1x512xf32> to vector<128x512xf32>
    %8 = arith.addf %5, %7 : vector<128x512xf32>
    %cst_6 = arith.constant 0.000000e+00 : f32
    %9 = vector.broadcast %cst_6 : f32 to vector<128x512xf32>
    %10 = arith.maximumf %8, %9 : vector<128x512xf32>
    %11 = arith.truncf %10 : vector<128x512xf32> to vector<128x512xbf16>
    %c0_7 = arith.constant 0 : index
    %c0_8 = arith.constant 0 : index
    %12 = vector.load %arg8[%c0_7, %c0_8] : memref<128x512xbf16, #tpu.memory_space<vmem>>, vector<128x512xbf16>
    tpu.vector_store %arg8[%c0_7, %c0_8], %11 {strides = array<i32>} : memref<128x512xbf16, #tpu.memory_space<vmem>>, vector<128x512xbf16>,
    %13 = math.absf %10 : vector<128x512xf32>
    %14 = vector.extract_strided_slice %13 {offsets = [0, 0], sizes = [128, 128], strides = [1, 1]} : vector<128x512xf32> to vector<128x128xf32>
    %15 = vector.extract_strided_slice %13 {offsets = [0, 128], sizes = [128, 128], strides = [1, 1]} : vector<128x512xf32> to vector<128x128xf32>
    %16 = arith.addf %14, %15 : vector<128x128xf32>
    %17 = vector.extract_strided_slice %13 {offsets = [0, 256], sizes = [128, 128], strides = [1, 1]} : vector<128x512xf32> to vector<128x128xf32>
    %18 = arith.addf %16, %17 : vector<128x128xf32>
    %19 = vector.extract_strided_slice %13 {offsets = [0, 384], sizes = [128, 128], strides = [1, 1]} : vector<128x512xf32> to vector<128x128xf32>
    %20 = arith.addf %18, %19 : vector<128x128xf32>
    %c0_9 = arith.constant 0 : index
    %c0_10 = arith.constant 0 : index
    %21 = vector.load %arg12[%c0_9, %c0_10] : memref<128x128xf32, #tpu.memory_space<vmem>>, vector<128x128xf32>
    %22 = arith.addf %21, %20 : vector<128x128xf32>
    %c0_11 = arith.constant 0 : index
    %c0_12 = arith.constant 0 : index
    %23 = vector.load %arg12[%c0_11, %c0_12] : memref<128x128xf32, #tpu.memory_space<vmem>>, vector<128x128xf32>
    tpu.vector_store %arg12[%c0_11, %c0_12], %22 {strides = array<i32>} : memref<128x128xf32, #tpu.memory_space<vmem>>, vector<128x128xf32>,
    %c0_13 = arith.constant 0 : index
    %c0_14 = arith.constant 0 : index
    %24 = vector.load %arg7[%c0_13, %c0_14] : memref<128x256xf32, #tpu.memory_space<vmem>>, vector<128x256xf32>
    %25 = arith.truncf %10 : vector<128x512xf32> to vector<128x512xbf16>
    %c0_15 = arith.constant 0 : index
    %c0_16 = arith.constant 0 : index
    %26 = vector.load %arg5[%c0_15, %c0_16] : memref<512x256xbf16, #tpu.memory_space<vmem>>, vector<512x256xbf16>
    %cst_17 = arith.constant dense<0.000000e+00> : vector<128x256xf32>
    %27 = tpu.matmul %25, %26, %cst_17 {dimension_numbers = #tpu.dot_dimension_numbers<[1], [0], [0], [1], [0, 0, 1, 1], [], []>} : vector<128x512xbf16>, vector<512x256xbf16>, vector<128x256xf32> -> vector<128x256xf32>
    %28 = arith.addf %24, %27 : vector<128x256xf32>
    %c0_18 = arith.constant 0 : index
    %c0_19 = arith.constant 0 : index
    %29 = vector.load %arg7[%c0_18, %c0_19] : memref<128x256xf32, #tpu.memory_space<vmem>>, vector<128x256xf32>
    tpu.vector_store %arg7[%c0_18, %c0_19], %28 {strides = array<i32>} : memref<128x256xf32, #tpu.memory_space<vmem>>, vector<128x256xf32>,
    %c0_i32_20 = arith.constant 0 : i32
    %30 = arith.cmpi eq, %arg1, %c0_i32_20 : i32
    %31 = arith.extui %30 : i1 to i32
    %c0_i32_21 = arith.constant 0 : i32
    %32 = arith.cmpi ne, %31, %c0_i32_21 : i32
    scf.if %32 {
      %c0_22 = arith.constant 0 : index
      %c0_23 = arith.constant 0 : index
      %33 = vector.load %arg2[%c0_22, %c0_23] : memref<128x256xf32, #tpu.memory_space<vmem>>, vector<128x256xf32>
      %c0_24 = arith.constant 0 : index
      %c0_25 = arith.constant 0 : index
      %34 = vector.load %arg6[%c0_24, %c0_25] : memref<1x256xf32, #tpu.memory_space<vmem>>, vector<1x256xf32>
      %35 = vector.broadcast %34 : vector<1x256xf32> to vector<128x256xf32>
      %36 = arith.subf %33, %35 : vector<128x256xf32>
      %c0_26 = arith.constant 0 : index
      %c0_27 = arith.constant 0 : index
      %37 = vector.load %arg7[%c0_26, %c0_27] : memref<128x256xf32, #tpu.memory_space<vmem>>, vector<128x256xf32>
      %c0_28 = arith.constant 0 : index
      %c0_29 = arith.constant 0 : index
      %38 = vector.load %arg6[%c0_28, %c0_29] : memref<1x256xf32, #tpu.memory_space<vmem>>, vector<1x256xf32>
      %39 = vector.broadcast %38 : vector<1x256xf32> to vector<128x256xf32>
      %40 = arith.addf %37, %39 : vector<128x256xf32>
      %c0_30 = arith.constant 0 : index
      %c0_31 = arith.constant 0 : index
      %41 = vector.load %arg7[%c0_30, %c0_31] : memref<128x256xf32, #tpu.memory_space<vmem>>, vector<128x256xf32>
      tpu.vector_store %arg7[%c0_30, %c0_31], %40 {strides = array<i32>} : memref<128x256xf32, #tpu.memory_space<vmem>>, vector<128x256xf32>,
      %42 = arith.subf %40, %36 : vector<128x256xf32>
      %43 = arith.mulf %42, %42 : vector<128x256xf32>
      %44 = vector.shape_cast %43 : vector<128x256xf32> to vector<1x128x256xf32>
      %cst_32 = arith.constant dense<0.000000e+00> : vector<1xf32>
      %45 = vector.multi_reduction <add>, %44, %cst_32 [1, 2] : vector<1x128x256xf32> to vector<1xf32>
      %46 = vector.shape_cast %45 : vector<1xf32> to vector<1x1x1xf32>
      %47 = vector.extract %46[0, 0, 0] : f32 from vector<1x1x1xf32>
      %48 = vector.broadcast %47 : f32 to vector<1x1x1xf32>
      %49 = vector.shape_cast %48 : vector<1x1x1xf32> to vector<1x1x1xf32>
      %50 = vector.broadcast %49 : vector<1x1x1xf32> to vector<1x8x128xf32>
      %c0_33 = arith.constant 0 : index
      %c0_34 = arith.constant 0 : index
      %c0_35 = arith.constant 0 : index
      %51 = vector.load %arg9[%c0_33, %c0_34, %c0_35] : memref<1x8x128xf32, #tpu.memory_space<vmem>>, vector<1x8x128xf32>
      tpu.vector_store %arg9[%c0_33, %c0_34, %c0_35], %50 {strides = array<i32>} : memref<1x8x128xf32, #tpu.memory_space<vmem>>, vector<1x8x128xf32>,
      %c0_36 = arith.constant 0 : index
      %c0_37 = arith.constant 0 : index
      %52 = vector.load %arg12[%c0_36, %c0_37] : memref<128x128xf32, #tpu.memory_space<vmem>>, vector<128x128xf32>
      %53 = vector.shape_cast %52 : vector<128x128xf32> to vector<1x128x128xf32>
      %cst_38 = arith.constant dense<0.000000e+00> : vector<1xf32>
      %54 = vector.multi_reduction <add>, %53, %cst_38 [1, 2] : vector<1x128x128xf32> to vector<1xf32>
      %55 = vector.shape_cast %54 : vector<1xf32> to vector<1x1x1xf32>
      %56 = vector.extract %55[0, 0, 0] : f32 from vector<1x1x1xf32>
      %57 = vector.broadcast %56 : f32 to vector<1x1x1xf32>
      %58 = vector.shape_cast %57 : vector<1x1x1xf32> to vector<1x1x1xf32>
      %59 = vector.broadcast %58 : vector<1x1x1xf32> to vector<1x8x128xf32>
      %c0_39 = arith.constant 0 : index
      %c0_40 = arith.constant 0 : index
      %c0_41 = arith.constant 0 : index
      %60 = vector.load %arg10[%c0_39, %c0_40, %c0_41] : memref<1x8x128xf32, #tpu.memory_space<vmem>>, vector<1x8x128xf32>
      tpu.vector_store %arg10[%c0_39, %c0_40, %c0_41], %59 {strides = array<i32>} : memref<1x8x128xf32, #tpu.memory_space<vmem>>, vector<1x8x128xf32>,
    } else {
    }
    return
  }
  func.func @transform_0(%arg0: i32, %arg1: i32) -> (i32, i32) {
    %c0_i32 = arith.constant 0 : i32
    %c0_i32_0 = arith.constant 0 : i32
    return %arg0, %c0_i32 : i32, i32
  }
  func.func @transform_1(%arg0: i32, %arg1: i32) -> (i32, i32) {
    %c0_i32 = arith.constant 0 : i32
    %c0_i32_0 = arith.constant 0 : i32
    return %c0_i32, %arg1 : i32, i32
  }
  func.func @transform_2(%arg0: i32, %arg1: i32) -> (i32, i32) {
    %c0_i32 = arith.constant 0 : i32
    %c0_i32_0 = arith.constant 0 : i32
    return %c0_i32, %arg1 : i32, i32
  }
  func.func @transform_3(%arg0: i32, %arg1: i32) -> (i32, i32) {
    %c0_i32 = arith.constant 0 : i32
    %c0_i32_0 = arith.constant 0 : i32
    return %arg1, %c0_i32 : i32, i32
  }
  func.func @transform_4(%arg0: i32, %arg1: i32) -> (i32, i32) {
    %c0_i32 = arith.constant 0 : i32
    %c0_i32_0 = arith.constant 0 : i32
    %c0_i32_1 = arith.constant 0 : i32
    return %c0_i32, %c0_i32_0 : i32, i32
  }
  func.func @transform_5(%arg0: i32, %arg1: i32) -> (i32, i32) {
    %c0_i32 = arith.constant 0 : i32
    %c0_i32_0 = arith.constant 0 : i32
    return %arg0, %c0_i32 : i32, i32
  }
  func.func @transform_6(%arg0: i32, %arg1: i32) -> (i32, i32) {
    %c0_i32 = arith.constant 0 : i32
    return %arg0, %arg1 : i32, i32
  }
  func.func @transform_7(%arg0: i32, %arg1: i32) -> (i32, i32, i32) {
    %c0_i32 = arith.constant 0 : i32
    %c0_i32_0 = arith.constant 0 : i32
    %c0_i32_1 = arith.constant 0 : i32
    return %arg0, %c0_i32, %c0_i32_0 : i32, i32, i32
  }
  func.func @transform_8(%arg0: i32, %arg1: i32) -> (i32, i32, i32) {
    %c0_i32 = arith.constant 0 : i32
    %c0_i32_0 = arith.constant 0 : i32
    %c0_i32_1 = arith.constant 0 : i32
    return %arg0, %c0_i32, %c0_i32_0 : i32, i32, i32
  }
}

</mosaic_0001>

<bundles_post_ra>
// kernel: tpu_custom_call.1
= control target key start
LH: loop header
LB: loop body
LE: loop exit
PB: predicated region body
PF: predicated region fallthrough
CT: control target
= control target key end

     0   :  { %14 = vsyncpa [#allocation5], 0  ;;  %s4414_s0 = inlined_call_operand.hbm [shape: f32[128,256], index: 0, kind: input, shape index: {}]   ;;  %s4415_s1 = inlined_call_operand.hbm [shape: bf16[256,512], index: 1, kind: input, shape index: {}]   ;;  %s4416_s2 = inlined_call_operand.hbm [shape: f32[1,512], index: 2, kind: input, shape index: {}]   ;;  %s4417_s3 = inlined_call_operand.hbm [shape: bf16[512,256], index: 3, kind: input, shape index: {}]   ;;  %s4418_s4 = inlined_call_operand.vmem [shape: f32[1,256], index: 4, kind: input, shape index: {}]   ;;  %s4419_s5 = inlined_call_operand.hbm [shape: f32[128,256], index: 5, kind: output, shape index: {0}]   ;;  %s4420_s6 = inlined_call_operand.hbm [shape: bf16[128,512], index: 6, kind: output, shape index: {1}]   ;;  %s4421_s7 = inlined_call_operand.hbm [shape: f32[1,8,128], index: 7, kind: output, shape index: {2}]   ;;  %s4422_s8 = inlined_call_operand.hbm [shape: f32[1,8,128], index: 8, kind: output, shape index: {3}]  }
   0x1   :  { %15 = vsyncpa [#allocation8], 0 }
   0x2   :  { %16 = vsyncpa [#allocation11], 0 }
   0x3   :  { %17 = vsyncpa [#allocation6], 0 }
   0x4   :  { %18 = vsyncpa [#allocation14], 0 }
   0x5   :  { %19 = vsyncpa [#allocation17], 0  ;;  %s37_s29 = sshll.u32 %s4415_s1, 4  ;;  %s3772_s30 = smov [#allocation7]   ;;  %s38_s29 = int_to_ptr.hbm [resolvable:$true] %s37_s29 }
   0x6   :  { %s39_s9 = sshll.u32 %s3772_s30, 4  ;;  %s24_s12 = sshll.u32 %s4414_s0, 4  ;;  %s40_s9 = int_to_ptr.vmem [resolvable:$true] %s39_s9  ;;  %s25_s12 = int_to_ptr.hbm [resolvable:$true] %s24_s12 }
   0x7   :  { %s3773_s13 = smov 256   ;;  %s3774_s14 = smov 16  }
   0x8   :  { %45 = dma.hbm_to_vmem [thread:$0]  %s38_s29, 8192, %s40_s9, [#allocation8], %s3773_s13, %s3773_s13, %s3774_s14  }
   0x9   :  { %s3775_s15 = smov [#allocation4]   ;;  %s51_s1 = sshll.u32 %s4416_s2, 4  ;;  %s52_s1 = int_to_ptr.hbm [resolvable:$true] %s51_s1 }
   0xa   :  { %s26_s16 = sshll.u32 %s3775_s15, 4  ;;  %s61_s20 = sshll.u32 %s4417_s3, 4  ;;  %s27_s16 = int_to_ptr.vmem [resolvable:$true] %s26_s16  ;;  %s62_s20 = int_to_ptr.hbm [resolvable:$true] %s61_s20 }
   0xb   :  { %32 = dma.hbm_to_vmem [thread:$0]  %s25_s12, 4096, %s27_s16, [#allocation5], %s3773_s13, %s3773_s13, %s3774_s14  }
   0xc   :  { %s3776_s21 = smov [#allocation9]   ;;  %s3777_s23 = smov [#allocation10]  }
   0xd   :  { %s53_s22 = sshll.u32 %s3776_s21, 4  ;;  %s63_s24 = sshll.u32 %s3777_s23, 4  ;;  %s54_s22 = int_to_ptr.vmem [resolvable:$true] %s53_s22  ;;  %s64_s24 = int_to_ptr.vmem [resolvable:$true] %s63_s24 }
   0xe   :  { %56 = dma.hbm_to_vmem [thread:$0]  %s52_s1, 64, %s54_s22, [#allocation8]  }
   0xf   :  { %s3778_s25 = smov 128   ;;  %s3779_s2 = smov 8  }
  0x10   :  { %69 = dma.hbm_to_vmem [thread:$0]  %s62_s20, 8192, %s64_s24, [#allocation11], %s3778_s25, %s3778_s25, %s3779_s2  }
  0x11   :  { %3760 = dma.done.wait [#allocation5], 4096  }
  0x12   :  { %3761 = vsyncadd [#allocation5], 4294963200 }
  0x13   :  { %3762 = dma.done.wait [#allocation8], 8256  }
  0x14   :  { %3763 = vsyncadd [#allocation8], 4294959040 }
  0x15   :  { %3764 = dma.done.wait [#allocation11], 8192  }
  0x16   :  { %3765 = vsyncadd [#allocation11], 4294959104  ;;  %v3009_v0 = vld [vmem:[#allocation7 + $0xe0] sm:$0xf]  ;;  %v3453_v1 = vld [vmem:[#allocation7 + $0xec] sm:$0xf0] }
  0x17   :  { %v3137_v2 = vld [vmem:[#allocation7 + $0x1e0] sm:$0xf]  ;;  %v3010_v3 = vor.u32 %v3453_v1, %v3009_v0  ;;  %v3485_v4 = vld [vmem:[#allocation7 + $0x1ec] sm:$0xf0]  ;;  %v3451_v5 = vld [vmem:[#allocation7 + $0xe4] sm:$0xf] }
  0x18   :  { %v3011_v6 = vld [vmem:[#allocation7 + $0xf0] sm:$0xf0]  ;;  %v3138_v7 = vor.u32 %v3485_v4, %v3137_v2  ;;  %v3483_v9 = vld [vmem:[#allocation7 + $0x1e4] sm:$0xf]  ;;  %v2993_v11 = vld [vmem:[#allocation7 + $0xc0] sm:$0xf] }
  0x19   :  { %v3014_v8 = vor.u32 %v3451_v5, %v3011_v6  ;;  %v3139_v10 = vld [vmem:[#allocation7 + $0x1f0] sm:$0xf0]  ;;  %732 = vmatpush.bf16.msra.mxu0 %v3010_v3  ;;  %v3449_v13 = vld [vmem:[#allocation7 + $0xcc] sm:$0xf0]  ;;  %v3121_v14 = vld [vmem:[#allocation7 + $0x1c0] sm:$0xf] }
  0x1a   :  { %v3142_v12 = vor.u32 %v3483_v9, %v3139_v10  ;;  %v3481_v15 = vld [vmem:[#allocation7 + $0x1cc] sm:$0xf0]  ;;  %781 = vmatpush.bf16.msra.mxu1 %v3138_v7  ;;  %v2994_v16 = vor.u32 %v3449_v13, %v2993_v11  ;;  %v3447_v18 = vld [vmem:[#allocation7 + $0xc4] sm:$0xf]  ;;  %v2995_v19 = vld [vmem:[#allocation7 + $0xd0] sm:$0xf0] }
  0x1b   :  { %830 = vmatpush.bf16.msra.mxu2 %v3014_v8  ;;  %v3122_v17 = vor.u32 %v3481_v15, %v3121_v14  ;;  %v3479_v20 = vld [vmem:[#allocation7 + $0x1c4] sm:$0xf]  ;;  %v2998_v21 = vor.u32 %v3447_v18, %v2995_v19  ;;  %v3123_v22 = vld [vmem:[#allocation7 + $0x1d0] sm:$0xf0]  ;;  %v2977_v23 = vld [vmem:[#allocation7 + $0xa0] sm:$0xf] }
  0x1c   :  { %879 = vmatpush.bf16.msra.mxu3 %v3142_v12  ;;  %v3445_v24 = vld [vmem:[#allocation7 + $0xac] sm:$0xf0]  ;;  %v3126_v25 = vor.u32 %v3479_v20, %v3123_v22  ;;  %v3105_v26 = vld [vmem:[#allocation7 + $0x1a0] sm:$0xf]  ;;  %v3443_v28 = vld [vmem:[#allocation7 + $0xa4] sm:$0xf] }
  0x1d   :  { %v3477_v27 = vld [vmem:[#allocation7 + $0x1ac] sm:$0xf0]  ;;  %733 = vmatpush.bf16.msra.mxu0 %v2994_v16  ;;  %v2978_v29 = vor.u32 %v3445_v24, %v2977_v23  ;;  %v2979_v30 = vld [vmem:[#allocation7 + $0xb0] sm:$0xf0]  ;;  %v3475_v31 = vld [vmem:[#allocation7 + $0x1a4] sm:$0xf] }
  0x1e   :  { %v3107_v32 = vld [vmem:[#allocation7 + $0x1b0] sm:$0xf0]  ;;  %782 = vmatpush.bf16.msra.mxu1 %v3122_v17  ;;  %v3106_v33 = vor.u32 %v3477_v27, %v3105_v26  ;;  %v2982_v34 = vor.u32 %v3443_v28, %v2979_v30  ;;  %v2961_v35 = vld [vmem:[#allocation7 + $0x80] sm:$0xf]  ;;  %v3441_v36 = vld [vmem:[#allocation7 + $0x8c] sm:$0xf0] }
  0x1f   :  { %831 = vmatpush.bf16.msra.mxu2 %v2998_v21  ;;  %v3089_v37 = vld [vmem:[#allocation7 + $0x180] sm:$0xf]  ;;  %v3110_v38 = vor.u32 %v3475_v31, %v3107_v32  ;;  %v3473_v39 = vld [vmem:[#allocation7 + $0x18c] sm:$0xf0]  ;;  %v3439_v40 = vld [vmem:[#allocation7 + $0x84] sm:$0xf]  ;;  %v2962_v44 = vor.u32 %v3441_v36, %v2961_v35 }
  0x20   :  { %880 = vmatpush.bf16.msra.mxu3 %v3126_v25  ;;  %v2963_v41 = vld [vmem:[#allocation7 + $0x90] sm:$0xf0]  ;;  %v3471_v42 = vld [vmem:[#allocation7 + $0x184] sm:$0xf]  ;;  %v3090_v45 = vor.u32 %v3473_v39, %v3089_v37  ;;  %v2945_v47 = vld [vmem:[#allocation7 + $0x60] sm:$0xf] }
  0x21   :  { %v3091_v43 = vld [vmem:[#allocation7 + $0x190] sm:$0xf0]  ;;  %734 = vmatpush.bf16.msra.mxu0 %v2978_v29  ;;  %v2966_v46 = vor.u32 %v3439_v40, %v2963_v41  ;;  %v3437_v48 = vld [vmem:[#allocation7 + $0x6c] sm:$0xf0]  ;;  %v3073_v49 = vld [vmem:[#allocation7 + $0x160] sm:$0xf] }
  0x22   :  { %783 = vmatpush.bf16.msra.mxu1 %v3106_v33  ;;  %v3094_v50 = vor.u32 %v3471_v42, %v3091_v43  ;;  %v3469_v51 = vld [vmem:[#allocation7 + $0x16c] sm:$0xf0]  ;;  %v3435_v52 = vld [vmem:[#allocation7 + $0x64] sm:$0xf]  ;;  %v2947_v53 = vld [vmem:[#allocation7 + $0x70] sm:$0xf0]  ;;  %v2946_v56 = vor.u32 %v3437_v48, %v2945_v47 }
  0x23   :  { %832 = vmatpush.bf16.msra.mxu2 %v2982_v34  ;;  %v3467_v54 = vld [vmem:[#allocation7 + $0x164] sm:$0xf]  ;;  %v3075_v55 = vld [vmem:[#allocation7 + $0x170] sm:$0xf0]  ;;  %v2929_v57 = vld [vmem:[#allocation7 + $0x40] sm:$0xf]  ;;  %v3074_v58 = vor.u32 %v3469_v51, %v3073_v49  ;;  %v2950_v59 = vor.u32 %v3435_v52, %v2947_v53 }
  0x24   :  { %881 = vmatpush.bf16.msra.mxu3 %v3110_v38  ;;  %v3433_v60 = vld [vmem:[#allocation7 + $0x4c] sm:$0xf0]  ;;  %v3057_v61 = vld [vmem:[#allocation7 + $0x140] sm:$0xf]  ;;  %v3078_v63 = vor.u32 %v3467_v54, %v3075_v55  ;;  %v3431_v0 = vld [vmem:[#allocation7 + $0x44] sm:$0xf] }
  0x25   :  { %735 = vmatpush.bf16.msra.mxu0 %v2962_v44  ;;  %v3465_v62 = vld [vmem:[#allocation7 + $0x14c] sm:$0xf0]  ;;  %v2931_v1 = vld [vmem:[#allocation7 + $0x50] sm:$0xf0]  ;;  %v3463_v2 = vld [vmem:[#allocation7 + $0x144] sm:$0xf]  ;;  %v2930_v6 = vor.u32 %v3433_v60, %v2929_v57 }
  0x26   :  { %784 = vmatpush.bf16.msra.mxu1 %v3090_v45  ;;  %v3059_v3 = vld [vmem:[#allocation7 + $0x150] sm:$0xf0]  ;;  %v2913_v4 = vld [vmem:[#allocation7 + $0x20] sm:$0xf]  ;;  %v3429_v5 = vld [vmem:[#allocation7 + $0x2c] sm:$0xf0]  ;;  %v3058_v10 = vor.u32 %v3465_v62, %v3057_v61  ;;  %v2934_v11 = vor.u32 %v3431_v0, %v2931_v1 }
  0x27   :  { %833 = vmatpush.bf16.msra.mxu2 %v2966_v46  ;;  %v3041_v7 = vld [vmem:[#allocation7 + $0x120] sm:$0xf]  ;;  %v3461_v8 = vld [vmem:[#allocation7 + $0x12c] sm:$0xf0]  ;;  %v3427_v9 = vld [vmem:[#allocation7 + $0x24] sm:$0xf]  ;;  %v3062_v15 = vor.u32 %v3463_v2, %v3059_v3  ;;  %v2914_v25 = vor.u32 %v3429_v5, %v2913_v4 }
  0x28   :  { %882 = vmatpush.bf16.msra.mxu3 %v3094_v50  ;;  %v2915_v12 = vld [vmem:[#allocation7 + $0x30] sm:$0xf0]  ;;  %v3459_v13 = vld [vmem:[#allocation7 + $0x124] sm:$0xf]  ;;  %v3847_v16 = vld [vmem:[#allocation7] sm:$0xf]  ;;  %v3042_v30 = vor.u32 %v3461_v8, %v3041_v7 }
  0x29   :  { %736 = vmatpush.bf16.msra.mxu0 %v2946_v56  ;;  %v3043_v14 = vld [vmem:[#allocation7 + $0x130] sm:$0xf0]  ;;  %v3849_v17 = vld [vmem:[#allocation7 + $0xc] sm:$0xf0]  ;;  %v3851_v18 = vld [vmem:[#allocation7 + $0x100] sm:$0xf]  ;;  %v2918_v31 = vor.u32 %v3427_v9, %v2915_v12 }
  0x2a   :  { %785 = vmatpush.bf16.msra.mxu1 %v3074_v58  ;;  %v3853_v19 = vld [vmem:[#allocation7 + $0x10c] sm:$0xf0]  ;;  %v92_v20 = vld [vmem:[#allocation4] sm:$0xff]  ;;  %v93_v21 = vld [vmem:[#allocation4 + $0x8] sm:$0xff]  ;;  %v3046_v32 = vor.u32 %v3459_v13, %v3043_v14  ;;  %v2898_v43 = vor.u32 %v3849_v17, %v3847_v16  ;;  %s2780_s10 = sshll.u32 %s4420_s6, 4  ;;  %s2767_s15 = sshll.u32 %s4419_s5, 4  ;;  %s2781_s10 = int_to_ptr.hbm [resolvable:$true] %s2780_s10  ;;  %s2768_s15 = int_to_ptr.hbm [resolvable:$true] %s2767_s15 }
  0x2b   :  { %834 = vmatpush.bf16.msra.mxu2 %v2950_v59  ;;  %v94_v22 = vld [vmem:[#allocation4 + $0x10] sm:$0xff]  ;;  %v95_v23 = vld [vmem:[#allocation4 + $0x18] sm:$0xff]  ;;  %v124_v24 = vld [vmem:[%s4418_s4] sm:$0x3]  ;;  %v3026_v44 = vor.u32 %v3853_v19, %v3851_v18  ;;  %s3781_s16 = smov [#allocation12]   ;;  %s3782_s5 = smov [#allocation15]  }
  0x2c   :  { %883 = vmatpush.bf16.msra.mxu3 %v3078_v63  ;;  %v3858_v26 = vld [vmem:[#allocation7 + $0x4] sm:$0xf]  ;;  %v3860_v27 = vld [vmem:[#allocation7 + $0x10] sm:$0xf0]  ;;  %v3862_v28 = vperm.slane %v124_v24, 0  ;;  %v3864_v29 = vperm.slane %v124_v24, 1 }
  0x2d   :  { %737 = vmatpush.bf16.msra.mxu0 %v2930_v6  ;;  %v3455_v33 = vld [vmem:[#allocation7 + $0x104] sm:$0xf]  ;;  %v3027_v34 = vld [vmem:[#allocation7 + $0x110] sm:$0xf0]  ;;  %v3452_v35 = vld [vmem:[#allocation7 + $0xec] sm:$0xf]  ;;  %v2902_v55 = vor.u32 %v3858_v26, %v3860_v27 }
  0x2e   :  { %786 = vmatpush.bf16.msra.mxu1 %v3058_v10  ;;  %v130_v36 = vsub.f32 %v92_v20, %v3862_v28  ;;  %v131_v37 = vsub.f32 %v93_v21, %v3864_v29  ;;  %v132_v38 = vsub.f32 %v94_v22, %v3862_v28  ;;  %v133_v39 = vsub.f32 %v95_v23, %v3864_v29  ;;  %v3019_v40 = vld [vmem:[#allocation7 + $0xf8] sm:$0xf0]  ;;  %v3484_v41 = vld [vmem:[#allocation7 + $0x1ec] sm:$0xf]  ;;  %v96_v45 = vld [vmem:[#allocation4 + $0x20] sm:$0xff]  ;;  %s2765_s17 = sshll.u32 %s3781_s16, 4  ;;  %s2766_s17 = int_to_ptr.vmem [resolvable:$true] %s2765_s17 }
  0x2f   :  { %835 = vmatpush.bf16.msra.mxu2 %v2934_v11  ;;  %v3147_v42 = vld [vmem:[#allocation7 + $0x1f8] sm:$0xf0]  ;;  %v97_v46 = vld [vmem:[#allocation4 + $0x28] sm:$0xff]  ;;  %v98_v47 = vld [vmem:[#allocation4 + $0x30] sm:$0xff]  ;;  %v134_v53 = vsub.f32 %v96_v45, %v3862_v28  ;;  %v3030_v61 = vor.u32 %v3455_v33, %v3027_v34  ;;  %v3022_v62 = vor.u32 %v3452_v35, %v3019_v40  ;;  %s2792_s6 = sshll.u32 %s3782_s5, 4  ;;  %s2805_s20 = sshll.u32 %s4422_s8, 4  ;;  %s2793_s6 = int_to_ptr.vmem [resolvable:$true] %s2792_s6  ;;  %s2806_s20 = int_to_ptr.hbm [resolvable:$true] %s2805_s20 }
  0x30   :  { %884 = vmatpush.bf16.msra.mxu3 %v3062_v15  ;;  %v162_v48 = vpack.c.bf16 %v131_v37, %v130_v36  ;;  %v163_v49 = vpack.c.bf16 %v133_v39, %v132_v38  ;;  %v3017_v50 = vld [vmem:[#allocation7 + $0xe8] sm:$0xf]  ;;  %v3454_v51 = vld [vmem:[#allocation7 + $0xf4] sm:$0xf0]  ;;  %v135_v54 = vsub.f32 %v97_v46, %v3864_v29  ;;  %v136_v58 = vsub.f32 %v98_v47, %v3862_v28  ;;  %v3448_v60 = vld [vmem:[#allocation7 + $0xcc] sm:$0xf] }
  0x31   :  { %738 = vmatpush.bf16.msra.mxu0 %v2914_v25  ;;  %v99_v52 = vld [vmem:[#allocation4 + $0x38] sm:$0xff]  ;;  %v3145_v56 = vld [vmem:[#allocation7 + $0x1e8] sm:$0xf]  ;;  %v3480_v1 = vld [vmem:[#allocation7 + $0x1cc] sm:$0xf]  ;;  %v3150_v3 = vor.u32 %v3484_v41, %v3147_v42  ;;  %v3018_v4 = vor.u32 %v3454_v51, %v3017_v50  ;;  %s3783_s21 = smov [#allocation16]  }
  0x32   :  { %787 = vmatpush.bf16.msra.mxu1 %v3042_v30  ;;  %v3486_v57 = vld [vmem:[#allocation7 + $0x1f4] sm:$0xf0]  ;;  %v137_v59 = vsub.f32 %v99_v52, %v3864_v29  ;;  %178 = vst [vmem:[#allocation2] sm:$0xff] %v162_v48  ;;  %v164_v63 = vpack.c.bf16 %v135_v54, %v134_v53  ;;  %v3003_v0 = vld [vmem:[#allocation7 + $0xd8] sm:$0xf0]  ;;  %v100_v2 = vld [vmem:[#allocation4 + $0x40] sm:$0xff] }
  0x33   :  { %836 = vmatpush.bf16.msra.mxu2 %v2918_v31  ;;  %179 = vst [vmem:[#allocation2 + $0x8] sm:$0xff] %v163_v49  ;;  %v3131_v6 = vld [vmem:[#allocation7 + $0x1d8] sm:$0xf0]  ;;  %v101_v7 = vld [vmem:[#allocation4 + $0x48] sm:$0xff]  ;;  %v102_v8 = vld [vmem:[#allocation4 + $0x50] sm:$0xff]  ;;  %v138_v9 = vsub.f32 %v100_v2, %v3862_v28  ;;  %v3146_v10 = vor.u32 %v3486_v57, %v3145_v56  ;;  %v3006_v19 = vor.u32 %v3448_v60, %v3003_v0  ;;  %s2803_s22 = sshll.u32 %s3783_s21, 4  ;;  %s2804_s22 = int_to_ptr.vmem [resolvable:$true] %s2803_s22 }
  0x34   :  { %885 = vmatpush.bf16.msra.mxu3 %v3046_v32  ;;  %v165_v5 = vpack.c.bf16 %v137_v59, %v136_v58  ;;  %180 = vst [vmem:[#allocation2 + $0x10] sm:$0xff] %v164_v63  ;;  %v3001_v11 = vld [vmem:[#allocation7 + $0xc8] sm:$0xf]  ;;  %v3450_v12 = vld [vmem:[#allocation7 + $0xd4] sm:$0xf0]  ;;  %v139_v14 = vsub.f32 %v101_v7, %v3864_v29  ;;  %v140_v15 = vsub.f32 %v102_v8, %v3862_v28  ;;  %v104_v45 = vld [vmem:[#allocation4 + $0x60] sm:$0xff] }
  0x35   :  { %739 = vmatpush.bf16.msra.mxu0 %v2898_v43  ;;  %v103_v13 = vld [vmem:[#allocation4 + $0x58] sm:$0xff]  ;;  %v3129_v16 = vld [vmem:[#allocation7 + $0x1c8] sm:$0xf]  ;;  %v3134_v21 = vor.u32 %v3480_v1, %v3131_v6  ;;  %v3002_v22 = vor.u32 %v3450_v12, %v3001_v11  ;;  %v3444_v33 = vld [vmem:[#allocation7 + $0xac] sm:$0xf]  ;;  %v142_v49 = vsub.f32 %v104_v45, %v3862_v28 }
  0x36   :  { %788 = vmatpush.bf16.msra.mxu1 %v3026_v44  ;;  %181 = vst [vmem:[#allocation2 + $0x18] sm:$0xff] %v165_v5  ;;  %v3482_v17 = vld [vmem:[#allocation7 + $0x1d4] sm:$0xf0]  ;;  %v141_v18 = vsub.f32 %v103_v13, %v3864_v29  ;;  %v166_v20 = vpack.c.bf16 %v139_v14, %v138_v9  ;;  %v2987_v34 = vld [vmem:[#allocation7 + $0xb8] sm:$0xf0]  ;;  %v105_v46 = vld [vmem:[#allocation4 + $0x68] sm:$0xff] }
  0x37   :  { %837 = vmatpush.bf16.msra.mxu2 %v2902_v55  ;;  %v3130_v24 = vor.u32 %v3482_v17, %v3129_v16  ;;  %v3476_v35 = vld [vmem:[#allocation7 + $0x1ac] sm:$0xf]  ;;  %v2990_v36 = vor.u32 %v3444_v33, %v2987_v34  ;;  %v3115_v37 = vld [vmem:[#allocation7 + $0x1b8] sm:$0xf0]  ;;  %v2985_v39 = vld [vmem:[#allocation7 + $0xa8] sm:$0xf]  ;;  %v143_v50 = vsub.f32 %v105_v46, %v3864_v29 }
  0x38   :  { %886 = vmatpush.bf16.msra.mxu3 %v3030_v61  ;;  %v167_v23 = vpack.c.bf16 %v141_v18, %v140_v15  ;;  %182 = vst [vmem:[#allocation2 + $0x20] sm:$0xff] %v166_v20  ;;  %v3118_v38 = vor.u32 %v3476_v35, %v3115_v37  ;;  %v3446_v40 = vld [vmem:[#allocation7 + $0xb4] sm:$0xf0]  ;;  %v3113_v41 = vld [vmem:[#allocation7 + $0x1a8] sm:$0xf]  ;;  %v106_v47 = vld [vmem:[#allocation4 + $0x70] sm:$0xff] }
  0x39   :  { %928 = vmatpush.bf16.msrb.mxu0 %v3018_v4  ;;  %v2833_v25 = vld [vmem:[#allocation2] sm:$0xf]  ;;  %v3407_v26 = vld [vmem:[#allocation2 + $0x4] sm:$0xf]  ;;  %v3478_v42 = vld [vmem:[#allocation7 + $0x1b4] sm:$0xf0]  ;;  %v2986_v43 = vor.u32 %v3446_v40, %v2985_v39  ;;  %v144_v51 = vsub.f32 %v106_v47, %v3862_v28  ;;  %v168_v54 = vpack.c.bf16 %v143_v50, %v142_v49 }
  0x3a   :  { %977 = vmatpush.bf16.msrb.mxu1 %v3146_v10  ;;  %183 = vst [vmem:[#allocation2 + $0x28] sm:$0xff] %v167_v23  ;;  %v3408_v27 = vld [vmem:[#allocation2 + $0x4] sm:$0xf0]  ;;  %v2835_v30 = vld [vmem:[#allocation2 + $0x8] sm:$0xf0]  ;;  %v3114_v44 = vor.u32 %v3478_v42, %v3113_v41  ;;  %v107_v48 = vld [vmem:[#allocation4 + $0x78] sm:$0xff] }
  0x3b   :  { %1026 = vmatpush.bf16.msrb.mxu2 %v3022_v62  ;;  %v3884_v31 = vor.u32 %v3408_v27, %v2833_v25  ;;  %v3886_v32 = vor.u32 %v3407_v26, %v2835_v30  ;;  %v145_v52 = vsub.f32 %v107_v48, %v3864_v29  ;;  %v2841_v53 = vld [vmem:[#allocation2 + $0x10] sm:$0xf]  ;;  %v3409_v56 = vld [vmem:[#allocation2 + $0x14] sm:$0xf]  ;;  %184 = vst [vmem:[#allocation2 + $0x30] sm:$0xff] %v168_v54  ;;  %v108_v9 = vld [vmem:[#allocation4 + $0x80] sm:$0xff] }
  0x3c   :  { %1075 = vmatpush.bf16.msrb.mxu3 %v3150_v3  ;;  %v3440_v61 = vld [vmem:[#allocation7 + $0x8c] sm:$0xf]  ;;  %v2971_v62 = vld [vmem:[#allocation7 + $0x98] sm:$0xf0]  ;;  %v2969_v2 = vld [vmem:[#allocation7 + $0x88] sm:$0xf]  ;;  %v146_v13 = vsub.f32 %v108_v9, %v3862_v28 }
  0x3d   :  { %929 = vmatpush.bf16.msrb.mxu0 %v3002_v22  ;;  %789 = vmatmul.bf16.vlgmr.msra.gmra.mxu1 %v3886_v32  ;;  %v3410_v55 = vld [vmem:[#allocation2 + $0x14] sm:$0xf0]  ;;  %v2843_v57 = vld [vmem:[#allocation2 + $0x18] sm:$0xf0]  ;;  %v169_v58 = vpack.c.bf16 %v145_v52, %v144_v51  ;;  %v2974_v63 = vor.u32 %v3440_v61, %v2971_v62  ;;  %v3472_v0 = vld [vmem:[#allocation7 + $0x18c] sm:$0xf] }
  0x3e   :  { %978 = vmatpush.bf16.msrb.mxu1 %v3130_v24  ;;  %740 = vmatmul.bf16.vlgmr.msra.gmra.mxu0 %v3884_v31  ;;  %v3896_v59 = vor.u32 %v3410_v55, %v2841_v53  ;;  %v3898_v60 = vor.u32 %v3409_v56, %v2843_v57  ;;  %v3099_v1 = vld [vmem:[#allocation7 + $0x198] sm:$0xf0]  ;;  %v3442_v4 = vld [vmem:[#allocation7 + $0x94] sm:$0xf0]  ;;  %v3097_v5 = vld [vmem:[#allocation7 + $0x188] sm:$0xf] }
  0x3f   :  { %1027 = vmatpush.bf16.msrb.mxu2 %v3006_v19  ;;  %887 = vmatmul.bf16.vlgmr.msra.gmra.mxu3 %v3886_v32  ;;  %185 = vst [vmem:[#allocation2 + $0x38] sm:$0xff] %v169_v58  ;;  %v3102_v3 = vor.u32 %v3472_v0, %v3099_v1  ;;  %v3474_v6 = vld [vmem:[#allocation7 + $0x194] sm:$0xf0]  ;;  %v2970_v7 = vor.u32 %v3442_v4, %v2969_v2  ;;  %v109_v10 = vld [vmem:[#allocation4 + $0x88] sm:$0xff]  ;;  %v110_v11 = vld [vmem:[#allocation4 + $0x90] sm:$0xff] }
  0x40   :  { %1076 = vmatpush.bf16.msrb.mxu3 %v3134_v21  ;;  %838 = vmatmul.bf16.vlgmr.msra.gmra.mxu2 %v3884_v31  ;;  %v3098_v8 = vor.u32 %v3474_v6, %v3097_v5  ;;  %v111_v12 = vld [vmem:[#allocation4 + $0x98] sm:$0xff]  ;;  %v147_v14 = vsub.f32 %v109_v10, %v3864_v29  ;;  %v148_v15 = vsub.f32 %v110_v11, %v3862_v28  ;;  %v2849_v17 = vld [vmem:[#allocation2 + $0x20] sm:$0xf]  ;;  %v3411_v20 = vld [vmem:[#allocation2 + $0x24] sm:$0xf] }
  0x41   :  { %930 = vmatpush.bf16.msrb.mxu0 %v2986_v43  ;;  %v149_v16 = vsub.f32 %v111_v12, %v3864_v29  ;;  %v3412_v19 = vld [vmem:[#allocation2 + $0x24] sm:$0xf0]  ;;  %v2851_v21 = vld [vmem:[#allocation2 + $0x28] sm:$0xf0]  ;;  %v2955_v26 = vld [vmem:[#allocation7 + $0x78] sm:$0xf0] }
  0x42   :  { %979 = vmatpush.bf16.msrb.mxu1 %v3114_v44  ;;  %v170_v18 = vpack.c.bf16 %v147_v14, %v146_v13  ;;  %v3908_v23 = vor.u32 %v3412_v19, %v2849_v17  ;;  %v3910_v24 = vor.u32 %v3411_v20, %v2851_v21  ;;  %v3436_v25 = vld [vmem:[#allocation7 + $0x6c] sm:$0xf]  ;;  %v3083_v33 = vld [vmem:[#allocation7 + $0x178] sm:$0xf0]  ;;  %v2953_v34 = vld [vmem:[#allocation7 + $0x68] sm:$0xf] }
  0x43   :  { %1028 = vmatpush.bf16.msrb.mxu2 %v2990_v36  ;;  %v171_v22 = vpack.c.bf16 %v149_v16, %v148_v15  ;;  %v2958_v27 = vor.u32 %v3436_v25, %v2955_v26  ;;  %v3468_v30 = vld [vmem:[#allocation7 + $0x16c] sm:$0xf]  ;;  %v3438_v36 = vld [vmem:[#allocation7 + $0x74] sm:$0xf0]  ;;  %v3081_v37 = vld [vmem:[#allocation7 + $0x168] sm:$0xf] }
  0x44   :  { %1077 = vmatpush.bf16.msrb.mxu3 %v3118_v38  ;;  %186 = vst [vmem:[#allocation2 + $0x40] sm:$0xff] %v170_v18  ;;  %v3086_v35 = vor.u32 %v3468_v30, %v3083_v33  ;;  %v3470_v38 = vld [vmem:[#allocation7 + $0x174] sm:$0xf0]  ;;  %v2954_v39 = vor.u32 %v3438_v36, %v2953_v34  ;;  %v112_v41 = vld [vmem:[#allocation4 + $0xa0] sm:$0xff]  ;;  %v113_v42 = vld [vmem:[#allocation4 + $0xa8] sm:$0xff] }
  0x45   :  { %931 = vmatpush.bf16.msrb.mxu0 %v2970_v7  ;;  %187 = vst [vmem:[#allocation2 + $0x48] sm:$0xff] %v171_v22  ;;  %v3082_v40 = vor.u32 %v3470_v38, %v3081_v37  ;;  %v114_v43 = vld [vmem:[#allocation4 + $0xb0] sm:$0xff]  ;;  %v115_v44 = vld [vmem:[#allocation4 + $0xb8] sm:$0xff]  ;;  %v150_v45 = vsub.f32 %v112_v41, %v3862_v28  ;;  %v151_v46 = vsub.f32 %v113_v42, %v3864_v29  ;;  %v3432_v57 = vld [vmem:[#allocation7 + $0x4c] sm:$0xf] }
  0x46   :  { %980 = vmatpush.bf16.msrb.mxu1 %v3098_v8  ;;  %v152_v47 = vsub.f32 %v114_v43, %v3862_v28  ;;  %v153_v48 = vsub.f32 %v115_v44, %v3864_v29  ;;  %v2857_v49 = vld [vmem:[#allocation2 + $0x30] sm:$0xf]  ;;  %v3414_v51 = vld [vmem:[#allocation2 + $0x34] sm:$0xf0]  ;;  %v3413_v52 = vld [vmem:[#allocation2 + $0x34] sm:$0xf] }
  0x47   :  { %1029 = vmatpush.bf16.msrb.mxu2 %v2974_v63  ;;  %v172_v50 = vpack.c.bf16 %v151_v46, %v150_v45  ;;  %v2859_v53 = vld [vmem:[#allocation2 + $0x38] sm:$0xf0]  ;;  %v3920_v55 = vor.u32 %v3414_v51, %v2857_v49  ;;  %v3464_v62 = vld [vmem:[#allocation7 + $0x14c] sm:$0xf]  ;;  %v2937_v0 = vld [vmem:[#allocation7 + $0x48] sm:$0xf] }
  0x48   :  { %1078 = vmatpush.bf16.msrb.mxu3 %v3102_v3  ;;  %v173_v54 = vpack.c.bf16 %v153_v48, %v152_v47  ;;  %v3922_v56 = vor.u32 %v3413_v52, %v2859_v53  ;;  %v2939_v58 = vld [vmem:[#allocation7 + $0x58] sm:$0xf0]  ;;  %v3434_v2 = vld [vmem:[#allocation7 + $0x54] sm:$0xf0]  ;;  %v3065_v3 = vld [vmem:[#allocation7 + $0x148] sm:$0xf] }
  0x49   :  { %932 = vmatpush.bf16.msrb.mxu0 %v2954_v39  ;;  %188 = vst [vmem:[#allocation2 + $0x50] sm:$0xff] %v172_v50  ;;  %v2942_v61 = vor.u32 %v3432_v57, %v2939_v58  ;;  %v3067_v63 = vld [vmem:[#allocation7 + $0x158] sm:$0xf0]  ;;  %v3466_v4 = vld [vmem:[#allocation7 + $0x154] sm:$0xf0]  ;;  %v2938_v5 = vor.u32 %v3434_v2, %v2937_v0  ;;  %v116_v7 = vld [vmem:[#allocation4 + $0xc0] sm:$0xff] }
  0x4a   :  { %981 = vmatpush.bf16.msrb.mxu1 %v3082_v40  ;;  %189 = vst [vmem:[#allocation2 + $0x58] sm:$0xff] %v173_v54  ;;  %v3070_v1 = vor.u32 %v3464_v62, %v3067_v63  ;;  %v3066_v6 = vor.u32 %v3466_v4, %v3065_v3  ;;  %v117_v8 = vld [vmem:[#allocation4 + $0xc8] sm:$0xff]  ;;  %v118_v9 = vld [vmem:[#allocation4 + $0xd0] sm:$0xff]  ;;  %v119_v10 = vld [vmem:[#allocation4 + $0xd8] sm:$0xff]  ;;  %v154_v11 = vsub.f32 %v116_v7, %v3862_v28 }
  0x4b   :  { %1030 = vmatpush.bf16.msrb.mxu2 %v2958_v27  ;;  %v155_v12 = vsub.f32 %v117_v8, %v3864_v29  ;;  %v156_v13 = vsub.f32 %v118_v9, %v3862_v28  ;;  %v157_v14 = vsub.f32 %v119_v10, %v3864_v29  ;;  %v2865_v15 = vld [vmem:[#allocation2 + $0x40] sm:$0xf]  ;;  %v3415_v18 = vld [vmem:[#allocation2 + $0x44] sm:$0xf]  ;;  %v3428_v25 = vld [vmem:[#allocation7 + $0x2c] sm:$0xf] }
  0x4c   :  { %1079 = vmatpush.bf16.msrb.mxu3 %v3086_v35  ;;  %v3416_v17 = vld [vmem:[#allocation2 + $0x44] sm:$0xf0]  ;;  %v2867_v19 = vld [vmem:[#allocation2 + $0x48] sm:$0xf0]  ;;  %v2923_v26 = vld [vmem:[#allocation7 + $0x38] sm:$0xf0] }
  0x4d   :  { %794 = vmatmul.bf16.gmra.mxu1 %v3898_v60  ;;  %933 = vmatpush.bf16.msrb.mxu0 %v2938_v5  ;;  %v174_v16 = vpack.c.bf16 %v155_v12, %v154_v11  ;;  %v175_v20 = vpack.c.bf16 %v157_v14, %v156_v13  ;;  %v3932_v21 = vor.u32 %v3416_v17, %v2865_v15  ;;  %v3460_v30 = vld [vmem:[#allocation7 + $0x12c] sm:$0xf]  ;;  %v3051_v33 = vld [vmem:[#allocation7 + $0x138] sm:$0xf0]  ;;  %v2921_v34 = vld [vmem:[#allocation7 + $0x28] sm:$0xf] }
  0x4e   :  { %745 = vmatmul.bf16.gmra.mxu0 %v3896_v59  ;;  %982 = vmatpush.bf16.msrb.mxu1 %v3066_v6  ;;  %v3934_v22 = vor.u32 %v3415_v18, %v2867_v19  ;;  %v2926_v27 = vor.u32 %v3428_v25, %v2923_v26  ;;  %v3054_v35 = vor.u32 %v3460_v30, %v3051_v33  ;;  %v3430_v36 = vld [vmem:[#allocation7 + $0x34] sm:$0xf0]  ;;  %v3049_v37 = vld [vmem:[#allocation7 + $0x128] sm:$0xf]  ;;  %v120_v41 = vld [vmem:[#allocation4 + $0xe0] sm:$0xff] }
  0x4f   :  { %892 = vmatmul.bf16.gmra.mxu3 %v3898_v60  ;;  %1031 = vmatpush.bf16.msrb.mxu2 %v2942_v61  ;;  %190 = vst [vmem:[#allocation2 + $0x60] sm:$0xff] %v174_v16  ;;  %v3462_v38 = vld [vmem:[#allocation7 + $0x134] sm:$0xf0]  ;;  %v2922_v39 = vor.u32 %v3430_v36, %v2921_v34  ;;  %v121_v42 = vld [vmem:[#allocation4 + $0xe8] sm:$0xff]  ;;  %v122_v43 = vld [vmem:[#allocation4 + $0xf0] sm:$0xff]  ;;  %v158_v45 = vsub.f32 %v120_v41, %v3862_v28 }
  0x50   :  { %843 = vmatmul.bf16.gmra.mxu2 %v3896_v59  ;;  %1080 = vmatpush.bf16.msrb.mxu3 %v3070_v1  ;;  %191 = vst [vmem:[#allocation2 + $0x68] sm:$0xff] %v175_v20  ;;  %v3050_v40 = vor.u32 %v3462_v38, %v3049_v37  ;;  %v123_v44 = vld [vmem:[#allocation4 + $0xf8] sm:$0xff]  ;;  %v159_v46 = vsub.f32 %v121_v42, %v3864_v29  ;;  %v2873_v49 = vld [vmem:[#allocation2 + $0x50] sm:$0xf]  ;;  %v3417_v52 = vld [vmem:[#allocation2 + $0x54] sm:$0xf] }
  0x51   :  { %v160_v47 = vsub.f32 %v122_v43, %v3862_v28  ;;  %934 = vmatpush.bf16.msrb.mxu0 %v2922_v39  ;;  %v161_v48 = vsub.f32 %v123_v44, %v3864_v29  ;;  %v3418_v51 = vld [vmem:[#allocation2 + $0x54] sm:$0xf0]  ;;  %v2875_v53 = vld [vmem:[#allocation2 + $0x58] sm:$0xf0]  ;;  %v3424_v28 = vld [vmem:[#allocation7 + $0xc] sm:$0xf] }
  0x52   :  { %983 = vmatpush.bf16.msrb.mxu1 %v3050_v40  ;;  %v176_v50 = vpack.c.bf16 %v159_v46, %v158_v45  ;;  %v3944_v57 = vor.u32 %v3418_v51, %v2873_v49  ;;  %v3946_v58 = vor.u32 %v3417_v52, %v2875_v53  ;;  %v2907_v29 = vld [vmem:[#allocation7 + $0x18] sm:$0xf0]  ;;  %v3456_v62 = vld [vmem:[#allocation7 + $0x10c] sm:$0xf]  ;;  %v2905_v0 = vld [vmem:[#allocation7 + $0x8] sm:$0xf] }
  0x53   :  { %1032 = vmatpush.bf16.msrb.mxu2 %v2926_v27  ;;  %v177_v54 = vpack.c.bf16 %v161_v48, %v160_v47  ;;  %v2910_v61 = vor.u32 %v3424_v28, %v2907_v29  ;;  %v3035_v63 = vld [vmem:[#allocation7 + $0x118] sm:$0xf0]  ;;  %v3426_v2 = vld [vmem:[#allocation7 + $0x14] sm:$0xf0]  ;;  %v3033_v3 = vld [vmem:[#allocation7 + $0x108] sm:$0xf] }
  0x54   :  { %1081 = vmatpush.bf16.msrb.mxu3 %v3054_v35  ;;  %192 = vst [vmem:[#allocation2 + $0x70] sm:$0xff] %v176_v50  ;;  %v3038_v1 = vor.u32 %v3456_v62, %v3035_v63  ;;  %v3458_v4 = vld [vmem:[#allocation7 + $0x114] sm:$0xf0]  ;;  %v2906_v5 = vor.u32 %v3426_v2, %v2905_v0  ;;  %v3968_v19 = vld [vmem:[#allocation9] sm:$0xf] }
  0x55   :  { %193 = vst [vmem:[#allocation2 + $0x78] sm:$0xff] %v177_v54  ;;  %v3034_v6 = vor.u32 %v3458_v4, %v3033_v3  ;;  %v3971_v20 = vperm.slane %v3968_v19, 0  ;;  %v3337_v27 = vld [vmem:[#allocation10 + $0x170] sm:$0xf]  ;;  %v3534_v30 = vld [vmem:[#allocation10 + $0x174] sm:$0xf0] }
  0x56   :  { %935 = vmatpush.bf16.msrb.mxu0 %v2906_v5  ;;  %v2881_v7 = vld [vmem:[#allocation2 + $0x60] sm:$0xf]  ;;  %v3419_v9 = vld [vmem:[#allocation2 + $0x64] sm:$0xf]  ;;  %v3401_v33 = vld [vmem:[#allocation10 + $0x1f0] sm:$0xf]  ;;  %v3338_v35 = vor.u32 %v3534_v30, %v3337_v27 }
  0x57   :  { %1033 = vmatpush.bf16.msrb.mxu2 %v2910_v61  ;;  %984 = vmatpush.bf16.msrb.mxu1 %v3034_v6  ;;  %v3420_v8 = vld [vmem:[#allocation2 + $0x64] sm:$0xf0]  ;;  %v2883_v10 = vld [vmem:[#allocation2 + $0x68] sm:$0xf0]  ;;  %v3550_v36 = vld [vmem:[#allocation10 + $0x1f4] sm:$0xf0] }
  0x58   :  { %1082 = vmatpush.bf16.msrb.mxu3 %v3038_v1  ;;  %v3952_v11 = vor.u32 %v3420_v8, %v2881_v7  ;;  %v3954_v12 = vor.u32 %v3419_v9, %v2883_v10  ;;  %v3402_v37 = vor.u32 %v3550_v36, %v3401_v33  ;;  %v3979_v39 = vperm.slane %v3968_v19, 1  ;;  %v3209_v46 = vld [vmem:[#allocation10 + $0x70] sm:$0xf]  ;;  %v3502_v47 = vld [vmem:[#allocation10 + $0x74] sm:$0xf0] }
  0x59   :  { %v3273_v48 = vld [vmem:[#allocation10 + $0xf0] sm:$0xf]  ;;  %v3210_v49 = vor.u32 %v3502_v47, %v3209_v46  ;;  %v3518_v50 = vld [vmem:[#allocation10 + $0xf4] sm:$0xf0]  ;;  %v3329_v3 = vld [vmem:[#allocation10 + $0x160] sm:$0xf] }
  0x5a   :  { %v3274_v51 = vor.u32 %v3518_v50, %v3273_v48  ;;  %v3532_v4 = vld [vmem:[#allocation10 + $0x164] sm:$0xf0]  ;;  %v3393_v7 = vld [vmem:[#allocation10 + $0x1e0] sm:$0xf] }
  0x5b   :  { %v2889_v13 = vld [vmem:[#allocation2 + $0x70] sm:$0xf]  ;;  %v3421_v15 = vld [vmem:[#allocation2 + $0x74] sm:$0xf]  ;;  %2086 = vmatpush.bf16.msra.mxu2 %v3338_v35  ;;  %1988 = vmatpush.bf16.msra.mxu0 %v3210_v49  ;;  %v3330_v6 = vor.u32 %v3532_v4, %v3329_v3  ;;  %v3548_v8 = vld [vmem:[#allocation10 + $0x1e4] sm:$0xf0] }
  0x5c   :  { %v3422_v14 = vld [vmem:[#allocation2 + $0x74] sm:$0xf0]  ;;  %v2891_v16 = vld [vmem:[#allocation2 + $0x78] sm:$0xf0]  ;;  %2135 = vmatpush.bf16.msra.mxu3 %v3402_v37  ;;  %2037 = vmatpush.bf16.msra.mxu1 %v3274_v51  ;;  %v3516_v46 = vld [vmem:[#allocation10 + $0xe4] sm:$0xf0] }
  0x5d   :  { %799 = vmatmul.bf16.gmra.mxu1 %v3910_v24  ;;  %v3960_v17 = vor.u32 %v3422_v14, %v2889_v13  ;;  %v3962_v18 = vor.u32 %v3421_v15, %v2891_v16  ;;  %v3394_v13 = vor.u32 %v3548_v8, %v3393_v7 }
  0x5e   :  { %750 = vmatmul.bf16.gmra.mxu0 %v3908_v23 }
  0x5f   :  { %897 = vmatmul.bf16.gmra.mxu3 %v3910_v24  ;;  %2087 = vmatpush.bf16.msra.mxu2 %v3330_v6  ;;  %v3546_v6 = vld [vmem:[#allocation10 + $0x1d4] sm:$0xf0] }
  0x60   :  { %848 = vmatmul.bf16.gmra.mxu2 %v3908_v23  ;;  %2136 = vmatpush.bf16.msra.mxu3 %v3394_v13 }
  0x6d   :  { %804 = vmatmul.bf16.gmra.mxu1 %v3922_v56 }
  0x6e   :  { %755 = vmatmul.bf16.gmra.mxu0 %v3920_v55 }
  0x6f   :  { %902 = vmatmul.bf16.gmra.mxu3 %v3922_v56 }
  0x70   :  { %853 = vmatmul.bf16.gmra.mxu2 %v3920_v55 }
  0x7d   :  { %809 = vmatmul.bf16.gmra.mxu1 %v3934_v22 }
  0x7e   :  { %760 = vmatmul.bf16.gmra.mxu0 %v3932_v21 }
  0x7f   :  { %907 = vmatmul.bf16.gmra.mxu3 %v3934_v22 }
  0x80   :  { %858 = vmatmul.bf16.gmra.mxu2 %v3932_v21 }
  0x8d   :  { %814 = vmatmul.bf16.gmra.mxu1 %v3946_v58 }
  0x8e   :  { %765 = vmatmul.bf16.gmra.mxu0 %v3944_v57 }
  0x8f   :  { %912 = vmatmul.bf16.gmra.mxu3 %v3946_v58 }
  0x90   :  { %863 = vmatmul.bf16.gmra.mxu2 %v3944_v57 }
  0x9d   :  { %819 = vmatmul.bf16.gmra.mxu1 %v3954_v12 }
  0x9e   :  { %770 = vmatmul.bf16.gmra.mxu0 %v3952_v11 }
  0x9f   :  { %917 = vmatmul.bf16.gmra.mxu3 %v3954_v12 }
  0xa0   :  { %868 = vmatmul.bf16.gmra.mxu2 %v3952_v11 }
  0xad   :  { %824 = vmatmul.bf16.gmra.mxu1 %v3962_v18 }
  0xae   :  { %775 = vmatmul.bf16.gmra.mxu0 %v3960_v17 }
  0xaf   :  { %922 = vmatmul.bf16.gmra.mxu3 %v3962_v18 }
  0xb0   :  { %873 = vmatmul.bf16.gmra.mxu2 %v3960_v17 }
  0xba   :  { %v790_v26 = vpop.f32.mrf.mxu1 }
  0xbb   :  { %v741_v25 = vpop.f32.mrf.mxu0 }
  0xbc   :  { %v742_v34 = vadd.f32 %v741_v25, %v3971_v20 }
  0xbd   :  { %985 = vmatmul.bf16.vlgmr.msrb.gmra.mxu1 %v3886_v32 }
  0xbe   :  { %v791_v38 = vadd.f32 %v790_v26, %v742_v34  ;;  %936 = vmatmul.bf16.vlgmr.msrb.gmra.mxu0 %v3884_v31 }
  0xbf   :  { %1083 = vmatmul.bf16.vlgmr.msrb.gmra.mxu3 %v3886_v32 }
  0xc0   :  { %1034 = vmatmul.bf16.vlgmr.msrb.gmra.mxu2 %v3884_v31  ;;  %v1124_v40 = vmax.f32 %v791_v38, 0.0 }
  0xc2   :  { %v888_v42 = vpop.f32.mrf.mxu3  ;;  %v792_v45 = vpop.f32.mrf.mxu1  ;;  %v1252_v52 = vand.u32 2147483647, %v1124_v40 }
  0xc3   :  { %v839_v41 = vpop.f32.mrf.mxu2  ;;  %v743_v44 = vpop.f32.mrf.mxu0 }
  0xc4   :  { %v840_v43 = vadd.f32 %v839_v41, %v3979_v39  ;;  %v744_v32 = vadd.f32 %v743_v44, %v3971_v20 }
  0xc6   :  { %v889_v31 = vadd.f32 %v888_v42, %v840_v43  ;;  %v793_v29 = vadd.f32 %v792_v45, %v744_v32  ;;  %v3500_v42 = vld [vmem:[#allocation10 + $0x64] sm:$0xf0]  ;;  %v3265_v45 = vld [vmem:[#allocation10 + $0xe0] sm:$0xf] }
  0xc7   :  { %v3266_v50 = vor.u32 %v3516_v46, %v3265_v45 }
  0xc8   :  { %v1125_v53 = vmax.f32 %v889_v31, 0.0  ;;  %v1128_v9 = vmax.f32 %v793_v29, 0.0 }
  0xc9   :  { %2038 = vmatpush.bf16.msra.mxu1 %v3266_v50 }
  0xca   :  { %v1188_v54 = vpack.c.bf16 %v1125_v53, %v1124_v40  ;;  %v1253_v28 = vand.u32 2147483647, %v1125_v53  ;;  %v890_v62 = vpop.f32.mrf.mxu3  ;;  %v795_v2 = vpop.f32.mrf.mxu1  ;;  %v1256_v16 = vand.u32 2147483647, %v1128_v9 }
  0xcb   :  { %v841_v61 = vpop.f32.mrf.mxu2  ;;  %v746_v1 = vpop.f32.mrf.mxu0 }
  0xcc   :  { %1220 = vst [vmem:[#allocation13] sm:$0xff] %v1188_v54  ;;  %v3983_v63 = vadd.f32 %v1253_v28, %v1252_v52  ;;  %v842_v0 = vadd.f32 %v841_v61, %v3979_v39  ;;  %v747_v5 = vadd.f32 %v746_v1, %v3971_v20  ;;  %v1540_v27 = vunpack.c.l.b16 %v1188_v54  ;;  %v3321_v1 = vld [vmem:[#allocation10 + $0x150] sm:$0xf] }
  0xcd   :  { %990 = vmatmul.bf16.gmra.mxu1 %v3898_v60  ;;  %v1541_v30 = vunpack.c.h.b16 %v1188_v54 }
  0xce   :  { %v891_v10 = vadd.f32 %v890_v62, %v842_v0  ;;  %v796_v14 = vadd.f32 %v795_v2, %v747_v5  ;;  %941 = vmatmul.bf16.gmra.mxu0 %v3896_v59  ;;  %v3530_v2 = vld [vmem:[#allocation10 + $0x154] sm:$0xf0]  ;;  %v3385_v5 = vld [vmem:[#allocation10 + $0x1d0] sm:$0xf] }
  0xcf   :  { %1088 = vmatmul.bf16.gmra.mxu3 %v3898_v60  ;;  %v3201_v60 = vld [vmem:[#allocation10 + $0x60] sm:$0xf]  ;;  %v3322_v4 = vor.u32 %v3530_v2, %v3321_v1  ;;  %v3528_v2 = vld [vmem:[#allocation10 + $0x144] sm:$0xf0] }
  0xd0   :  { %v1129_v15 = vmax.f32 %v891_v10, 0.0  ;;  %1039 = vmatmul.bf16.gmra.mxu2 %v3896_v59  ;;  %v1132_v33 = vmax.f32 %v796_v14, 0.0  ;;  %v3202_v44 = vor.u32 %v3500_v42, %v3201_v60  ;;  %v3257_v42 = vld [vmem:[#allocation10 + $0xd0] sm:$0xf]  ;;  %v3313_v1 = vld [vmem:[#allocation10 + $0x140] sm:$0xf] }
  0xd1   :  { %2088 = vmatpush.bf16.msra.mxu2 %v3322_v4  ;;  %v3314_v4 = vor.u32 %v3528_v2, %v3313_v1 }
  0xd2   :  { %v1190_v25 = vpack.c.bf16 %v1129_v15, %v1128_v9  ;;  %v1257_v26 = vand.u32 2147483647, %v1129_v15  ;;  %v893_v35 = vpop.f32.mrf.mxu3  ;;  %v797_v41 = vpop.f32.mrf.mxu1  ;;  %1989 = vmatpush.bf16.msra.mxu0 %v3202_v44  ;;  %v1260_v31 = vand.u32 2147483647, %v1132_v33  ;;  %v3386_v9 = vor.u32 %v3546_v6, %v3385_v5  ;;  %v3377_v5 = vld [vmem:[#allocation10 + $0x1c0] sm:$0xf] }
  0xd3   :  { %v844_v34 = vpop.f32.mrf.mxu2  ;;  %v748_v59 = vpop.f32.mrf.mxu0  ;;  %v3544_v6 = vld [vmem:[#allocation10 + $0x1c4] sm:$0xf0] }
  0xd4   :  { %1222 = vst [vmem:[#allocation13 + $0x10] sm:$0xff] %v1190_v25  ;;  %v3991_v36 = vadd.f32 %v1257_v26, %v1256_v16  ;;  %v1544_v37 = vunpack.c.l.b16 %v1190_v25  ;;  %v1545_v38 = vunpack.c.h.b16 %v1190_v25  ;;  %v845_v40 = vadd.f32 %v844_v34, %v3979_v39  ;;  %2137 = vmatpush.bf16.msra.mxu3 %v3386_v9 }
  0xd5   :  { %v749_v43 = vadd.f32 %v748_v59, %v3971_v20  ;;  %v3378_v9 = vor.u32 %v3544_v6, %v3377_v5  ;;  %2089 = vmatpush.bf16.msra.mxu2 %v3314_v4  ;;  %v3526_v4 = vld [vmem:[#allocation10 + $0x134] sm:$0xf0] }
  0xd6   :  { %v3995_v47 = vpack.c.b16 %v1544_v37, %v1540_v27  ;;  %v3997_v48 = vpack.c.b16 %v1545_v38, %v1541_v30  ;;  %v894_v49 = vadd.f32 %v893_v35, %v845_v40  ;;  %v3498_v40 = vld [vmem:[#allocation10 + $0x54] sm:$0xf0] }
  0xd7   :  { %v798_v53 = vadd.f32 %v797_v41, %v749_v43  ;;  %v3514_v43 = vld [vmem:[#allocation10 + $0xd4] sm:$0xf0] }
  0xd8   :  { %v1133_v32 = vmax.f32 %v894_v49, 0.0  ;;  %v3258_v45 = vor.u32 %v3514_v43, %v3257_v42  ;;  %2138 = vmatpush.bf16.msra.mxu3 %v3378_v9  ;;  %v3512_v42 = vld [vmem:[#allocation10 + $0xc4] sm:$0xf0] }
  0xd9   :  { %v1136_v7 = vmax.f32 %v798_v53, 0.0 }
  0xda   :  { %v1192_v51 = vpack.c.bf16 %v1133_v32, %v1132_v33  ;;  %v1261_v52 = vand.u32 2147483647, %v1133_v32  ;;  %v895_v28 = vpop.f32.mrf.mxu3  ;;  %v800_v0 = vpop.f32.mrf.mxu1  ;;  %2039 = vmatpush.bf16.msra.mxu1 %v3258_v45 }
  0xdb   :  { %v846_v54 = vpop.f32.mrf.mxu2  ;;  %v751_v62 = vpop.f32.mrf.mxu0  ;;  %v1264_v14 = vand.u32 2147483647, %v1136_v7 }
  0xdc   :  { %1224 = vst [vmem:[#allocation13 + $0x20] sm:$0xff] %v1192_v51  ;;  %v3999_v29 = vadd.f32 %v1261_v52, %v1260_v31  ;;  %v847_v61 = vadd.f32 %v846_v54, %v3979_v39  ;;  %v752_v3 = vadd.f32 %v751_v62, %v3971_v20  ;;  %v1548_v30 = vunpack.c.l.b16 %v1192_v51 }
  0xdd   :  { %995 = vmatmul.bf16.gmra.mxu1 %v3910_v24  ;;  %v1549_v33 = vunpack.c.h.b16 %v1192_v51 }
  0xde   :  { %v896_v8 = vadd.f32 %v895_v28, %v847_v61  ;;  %v801_v10 = vadd.f32 %v800_v0, %v752_v3  ;;  %946 = vmatmul.bf16.gmra.mxu0 %v3908_v23 }
  0xdf   :  { %1093 = vmatmul.bf16.gmra.mxu3 %v3910_v24 }
  0xe0   :  { %v1137_v13 = vmax.f32 %v896_v8, 0.0  ;;  %1044 = vmatmul.bf16.gmra.mxu2 %v3908_v23  ;;  %v1140_v25 = vmax.f32 %v801_v10, 0.0  ;;  %v3193_v23 = vld [vmem:[#allocation10 + $0x50] sm:$0xf] }
  0xe1   :  { %v3194_v60 = vor.u32 %v3498_v40, %v3193_v23  ;;  %v3496_v40 = vld [vmem:[#allocation10 + $0x44] sm:$0xf0] }
  0xe2   :  { %v1194_v15 = vpack.c.bf16 %v1137_v13, %v1136_v7  ;;  %v1265_v16 = vand.u32 2147483647, %v1137_v13  ;;  %v898_v27 = vpop.f32.mrf.mxu3  ;;  %v802_v38 = vpop.f32.mrf.mxu1  ;;  %v1268_v50 = vand.u32 2147483647, %v1140_v25 }
  0xe3   :  { %v849_v26 = vpop.f32.mrf.mxu2  ;;  %v753_v37 = vpop.f32.mrf.mxu0  ;;  %1990 = vmatpush.bf16.msra.mxu0 %v3194_v60  ;;  %v3249_v60 = vld [vmem:[#allocation10 + $0xc0] sm:$0xf] }
  0xe4   :  { %1226 = vst [vmem:[#allocation13 + $0x30] sm:$0xff] %v1194_v15  ;;  %v4007_v34 = vadd.f32 %v1265_v16, %v1264_v14  ;;  %v850_v35 = vadd.f32 %v849_v26, %v3979_v39  ;;  %v1552_v24 = vunpack.c.l.b16 %v1194_v15  ;;  %v1553_v59 = vunpack.c.h.b16 %v1194_v15 }
  0xe5   :  { %v754_v41 = vadd.f32 %v753_v37, %v3971_v20 }
  0xe6   :  { %v899_v44 = vadd.f32 %v898_v27, %v850_v35  ;;  %v4011_v46 = vpack.c.b16 %v1552_v24, %v1548_v30  ;;  %v4013_v49 = vpack.c.b16 %v1553_v59, %v1549_v33 }
  0xe7   :  { %v803_v52 = vadd.f32 %v802_v38, %v754_v41 }
  0xe8   :  { %v1141_v31 = vmax.f32 %v899_v44, 0.0  ;;  %v3250_v44 = vor.u32 %v3512_v42, %v3249_v60  ;;  %v3241_v42 = vld [vmem:[#allocation10 + $0xb0] sm:$0xf] }
  0xe9   :  { %v1144_v7 = vmax.f32 %v803_v52, 0.0 }
  0xea   :  { %v1196_v32 = vpack.c.bf16 %v1141_v31, %v1140_v25  ;;  %v1269_v51 = vand.u32 2147483647, %v1141_v31  ;;  %v900_v54 = vpop.f32.mrf.mxu3  ;;  %v805_v0 = vpop.f32.mrf.mxu1  ;;  %2040 = vmatpush.bf16.msra.mxu1 %v3250_v44 }
  0xeb   :  { %v851_v53 = vpop.f32.mrf.mxu2  ;;  %v756_v62 = vpop.f32.mrf.mxu0  ;;  %v1272_v14 = vand.u32 2147483647, %v1144_v7 }
  0xec   :  { %1228 = vst [vmem:[#allocation13 + $0x40] sm:$0xff] %v1196_v32  ;;  %v4015_v28 = vadd.f32 %v1269_v51, %v1268_v50  ;;  %v852_v61 = vadd.f32 %v851_v53, %v3979_v39  ;;  %v757_v3 = vadd.f32 %v756_v62, %v3971_v20  ;;  %v1556_v30 = vunpack.c.l.b16 %v1196_v32 }
  0xed   :  { %1000 = vmatmul.bf16.gmra.mxu1 %v3922_v56  ;;  %v1557_v33 = vunpack.c.h.b16 %v1196_v32 }
  0xee   :  { %v901_v8 = vadd.f32 %v900_v54, %v852_v61  ;;  %v806_v10 = vadd.f32 %v805_v0, %v757_v3  ;;  %951 = vmatmul.bf16.gmra.mxu0 %v3920_v55  ;;  %v3305_v3 = vld [vmem:[#allocation10 + $0x130] sm:$0xf] }
  0xef   :  { %1098 = vmatmul.bf16.gmra.mxu3 %v3922_v56  ;;  %v3306_v6 = vor.u32 %v3526_v4, %v3305_v3 }
  0xf0   :  { %v1145_v13 = vmax.f32 %v901_v8, 0.0  ;;  %1049 = vmatmul.bf16.gmra.mxu2 %v3920_v55  ;;  %v1148_v25 = vmax.f32 %v806_v10, 0.0  ;;  %v3185_v55 = vld [vmem:[#allocation10 + $0x40] sm:$0xf]  ;;  %v3542_v8 = vld [vmem:[#allocation10 + $0x1b4] sm:$0xf0] }
  0xf1   :  { %v3186_v41 = vor.u32 %v3496_v40, %v3185_v55  ;;  %2090 = vmatpush.bf16.msra.mxu2 %v3306_v6 }
  0xf2   :  { %v1198_v15 = vpack.c.bf16 %v1145_v13, %v1144_v7  ;;  %v1273_v16 = vand.u32 2147483647, %v1145_v13  ;;  %v903_v27 = vpop.f32.mrf.mxu3  ;;  %v807_v23 = vpop.f32.mrf.mxu1  ;;  %v1276_v31 = vand.u32 2147483647, %v1148_v25  ;;  %v3369_v7 = vld [vmem:[#allocation10 + $0x1b0] sm:$0xf] }
  0xf3   :  { %v854_v26 = vpop.f32.mrf.mxu2  ;;  %v758_v38 = vpop.f32.mrf.mxu0  ;;  %1991 = vmatpush.bf16.msra.mxu0 %v3186_v41  ;;  %v3370_v13 = vor.u32 %v3542_v8, %v3369_v7  ;;  %v3297_v7 = vld [vmem:[#allocation10 + $0x120] sm:$0xf]  ;;  %v3524_v8 = vld [vmem:[#allocation10 + $0x124] sm:$0xf0] }
  0xf4   :  { %1230 = vst [vmem:[#allocation13 + $0x50] sm:$0xff] %v1198_v15  ;;  %v4023_v35 = vadd.f32 %v1273_v16, %v1272_v14  ;;  %v855_v37 = vadd.f32 %v854_v26, %v3979_v39  ;;  %v1560_v56 = vunpack.c.l.b16 %v1198_v15  ;;  %v1561_v24 = vunpack.c.h.b16 %v1198_v15 }
  0xf5   :  { %v759_v59 = vadd.f32 %v758_v38, %v3971_v20  ;;  %2139 = vmatpush.bf16.msra.mxu3 %v3370_v13  ;;  %v3298_v13 = vor.u32 %v3524_v8, %v3297_v7 }
  0xf6   :  { %v904_v43 = vadd.f32 %v903_v27, %v855_v37  ;;  %v4027_v45 = vpack.c.b16 %v1560_v56, %v1556_v30  ;;  %v4029_v50 = vpack.c.b16 %v1561_v24, %v1557_v33  ;;  %v3494_v24 = vld [vmem:[#allocation10 + $0x34] sm:$0xf0] }
  0xf7   :  { %v808_v53 = vadd.f32 %v807_v23, %v759_v59  ;;  %2091 = vmatpush.bf16.msra.mxu2 %v3298_v13 }
  0xf8   :  { %v1149_v32 = vmax.f32 %v904_v43, 0.0  ;;  %v3510_v43 = vld [vmem:[#allocation10 + $0xb4] sm:$0xf0] }
  0xf9   :  { %v1152_v9 = vmax.f32 %v808_v53, 0.0 }
  0xfa   :  { %v1200_v51 = vpack.c.bf16 %v1149_v32, %v1148_v25  ;;  %v1277_v52 = vand.u32 2147483647, %v1149_v32  ;;  %v905_v61 = vpop.f32.mrf.mxu3  ;;  %v810_v2 = vpop.f32.mrf.mxu1 }
  0xfb   :  { %v856_v54 = vpop.f32.mrf.mxu2  ;;  %v761_v1 = vpop.f32.mrf.mxu0  ;;  %v1280_v16 = vand.u32 2147483647, %v1152_v9 }
  0xfc   :  { %1232 = vst [vmem:[#allocation13 + $0x60] sm:$0xff] %v1200_v51  ;;  %v4031_v62 = vadd.f32 %v1277_v52, %v1276_v31  ;;  %v857_v0 = vadd.f32 %v856_v54, %v3979_v39  ;;  %v762_v5 = vadd.f32 %v761_v1, %v3971_v20  ;;  %v1564_v37 = vunpack.c.l.b16 %v1200_v51 }
  0xfd   :  { %1005 = vmatmul.bf16.gmra.mxu1 %v3934_v22  ;;  %v1565_v38 = vunpack.c.h.b16 %v1200_v51  ;;  %v3242_v31 = vor.u32 %v3510_v43, %v3241_v42 }
  0xfe   :  { %v906_v10 = vadd.f32 %v905_v61, %v857_v0  ;;  %v811_v14 = vadd.f32 %v810_v2, %v762_v5  ;;  %956 = vmatmul.bf16.gmra.mxu0 %v3932_v21 }
  0xff   :  { %1103 = vmatmul.bf16.gmra.mxu3 %v3934_v22  ;;  %2041 = vmatpush.bf16.msra.mxu1 %v3242_v31 }
 0x100   :  { %v1153_v15 = vmax.f32 %v906_v10, 0.0  ;;  %1054 = vmatmul.bf16.gmra.mxu2 %v3932_v21  ;;  %v1156_v27 = vmax.f32 %v811_v14, 0.0  ;;  %v3177_v21 = vld [vmem:[#allocation10 + $0x30] sm:$0xf]  ;;  %v3361_v14 = vld [vmem:[#allocation10 + $0x1a0] sm:$0xf] }
 0x101   :  { %v3178_v60 = vor.u32 %v3494_v24, %v3177_v21 }
 0x102   :  { %v1202_v25 = vpack.c.bf16 %v1153_v15, %v1152_v9  ;;  %v1281_v26 = vand.u32 2147483647, %v1153_v15  ;;  %v908_v33 = vpop.f32.mrf.mxu3  ;;  %v812_v56 = vpop.f32.mrf.mxu1  ;;  %v1284_v52 = vand.u32 2147483647, %v1156_v27  ;;  %v3540_v15 = vld [vmem:[#allocation10 + $0x1a4] sm:$0xf0] }
 0x103   :  { %v859_v30 = vpop.f32.mrf.mxu2  ;;  %v763_v40 = vpop.f32.mrf.mxu0  ;;  %1992 = vmatpush.bf16.msra.mxu0 %v3178_v60 }
 0x104   :  { %1234 = vst [vmem:[#allocation13 + $0x70] sm:$0xff] %v1202_v25  ;;  %v4039_v23 = vadd.f32 %v1281_v26, %v1280_v16  ;;  %v860_v55 = vadd.f32 %v859_v30, %v3979_v39  ;;  %v1568_v22 = vunpack.c.l.b16 %v1202_v25  ;;  %v1569_v59 = vunpack.c.h.b16 %v1202_v25 }
 0x105   :  { %v764_v41 = vadd.f32 %v763_v40, %v3971_v20  ;;  %v3362_v25 = vor.u32 %v3540_v15, %v3361_v14  ;;  %v3153_v15 = vld [vmem:[#allocation10] sm:$0xf] }
 0x106   :  { %v909_v44 = vadd.f32 %v908_v33, %v860_v55  ;;  %v4043_v32 = vpack.c.b16 %v1568_v22, %v1564_v37  ;;  %v4045_v51 = vpack.c.b16 %v1569_v59, %v1565_v38  ;;  %v3169_v38 = vld [vmem:[#allocation10 + $0x20] sm:$0xf]  ;;  %v3492_v55 = vld [vmem:[#allocation10 + $0x24] sm:$0xf0] }
 0x107   :  { %v813_v54 = vadd.f32 %v812_v56, %v764_v41  ;;  %2140 = vmatpush.bf16.msra.mxu3 %v3362_v25  ;;  %v3170_v24 = vor.u32 %v3492_v55, %v3169_v38  ;;  %v3233_v22 = vld [vmem:[#allocation10 + $0xa0] sm:$0xf]  ;;  %v3508_v59 = vld [vmem:[#allocation10 + $0xa4] sm:$0xf0] }
 0x108   :  { %v1157_v53 = vmax.f32 %v909_v44, 0.0  ;;  %v3234_v43 = vor.u32 %v3508_v59, %v3233_v22 }
 0x109   :  { %v1160_v9 = vmax.f32 %v813_v54, 0.0  ;;  %1993 = vmatpush.bf16.msra.mxu0 %v3170_v24  ;;  %v3522_v24 = vld [vmem:[#allocation10 + $0x114] sm:$0xf0] }
 0x10a   :  { %v1204_v61 = vpack.c.bf16 %v1157_v53, %v1156_v27  ;;  %v1285_v0 = vand.u32 2147483647, %v1157_v53  ;;  %v910_v2 = vpop.f32.mrf.mxu3  ;;  %v815_v6 = vpop.f32.mrf.mxu1  ;;  %2042 = vmatpush.bf16.msra.mxu1 %v3234_v43 }
 0x10b   :  { %v861_v1 = vpop.f32.mrf.mxu2  ;;  %v766_v5 = vpop.f32.mrf.mxu0  ;;  %v1288_v30 = vand.u32 2147483647, %v1160_v9 }
 0x10c   :  { %1236 = vst [vmem:[#allocation13 + $0x80] sm:$0xff] %v1204_v61  ;;  %v4047_v3 = vadd.f32 %v1285_v0, %v1284_v52  ;;  %v862_v4 = vadd.f32 %v861_v1, %v3979_v39  ;;  %v767_v10 = vadd.f32 %v766_v5, %v3971_v20  ;;  %v1572_v41 = vunpack.c.l.b16 %v1204_v61  ;;  %v3161_v0 = vld [vmem:[#allocation10 + $0x10] sm:$0xf]  ;;  %v3490_v1 = vld [vmem:[#allocation10 + $0x14] sm:$0xf0] }
 0x10d   :  { %1010 = vmatmul.bf16.gmra.mxu1 %v3946_v58  ;;  %v1573_v31 = vunpack.c.h.b16 %v1204_v61  ;;  %v3162_v5 = vor.u32 %v3490_v1, %v3161_v0 }
 0x10e   :  { %v911_v16 = vadd.f32 %v910_v2, %v862_v4  ;;  %v816_v26 = vadd.f32 %v815_v6, %v767_v10  ;;  %961 = vmatmul.bf16.gmra.mxu0 %v3944_v57  ;;  %v3225_v2 = vld [vmem:[#allocation10 + $0x90] sm:$0xf]  ;;  %v3506_v6 = vld [vmem:[#allocation10 + $0x94] sm:$0xf0] }
 0x10f   :  { %1108 = vmatmul.bf16.gmra.mxu3 %v3946_v58  ;;  %v3226_v10 = vor.u32 %v3506_v6, %v3225_v2  ;;  %1994 = vmatpush.bf16.msra.mxu0 %v3162_v5 }
 0x110   :  { %v1161_v27 = vmax.f32 %v911_v16, 0.0  ;;  %1059 = vmatmul.bf16.gmra.mxu2 %v3944_v57  ;;  %v1164_v40 = vmax.f32 %v816_v26, 0.0  ;;  %v3488_v16 = vld [vmem:[#allocation10 + $0x4] sm:$0xf0] }
 0x111   :  { %2043 = vmatpush.bf16.msra.mxu1 %v3226_v10 }
 0x112   :  { %v1206_v33 = vpack.c.bf16 %v1161_v27, %v1160_v9  ;;  %v1289_v37 = vand.u32 2147483647, %v1161_v27  ;;  %v913_v21 = vpop.f32.mrf.mxu3  ;;  %v817_v42 = vpop.f32.mrf.mxu1  ;;  %v1292_v8 = vand.u32 2147483647, %v1164_v40  ;;  %v3154_v27 = vor.u32 %v3488_v16, %v3153_v15 }
 0x113   :  { %v864_v56 = vpop.f32.mrf.mxu2  ;;  %v768_v58 = vpop.f32.mrf.mxu0 }
 0x114   :  { %1238 = vst [vmem:[#allocation13 + $0x90] sm:$0xff] %v1206_v33  ;;  %v4055_v60 = vadd.f32 %v1289_v37, %v1288_v30  ;;  %v865_v57 = vadd.f32 %v864_v56, %v3979_v39  ;;  %v1576_v44 = vunpack.c.l.b16 %v1206_v33  ;;  %v1577_v52 = vunpack.c.h.b16 %v1206_v33  ;;  %v3217_v30 = vld [vmem:[#allocation10 + $0x80] sm:$0xf]  ;;  %v3504_v33 = vld [vmem:[#allocation10 + $0x84] sm:$0xf0]  ;;  %1995 = vmatpush.bf16.msra.mxu0 %v3154_v27 }
 0x115   :  { %v769_v54 = vadd.f32 %v768_v58, %v3971_v20 }
 0x116   :  { %v914_v53 = vadd.f32 %v913_v21, %v865_v57  ;;  %v4059_v4 = vpack.c.b16 %v1576_v44, %v1572_v41  ;;  %v4061_v7 = vpack.c.b16 %v1577_v52, %v1573_v31  ;;  %v3289_v21 = vld [vmem:[#allocation10 + $0x110] sm:$0xf]  ;;  %v3538_v57 = vld [vmem:[#allocation10 + $0x194] sm:$0xf0] }
 0x117   :  { %v818_v14 = vadd.f32 %v817_v42, %v769_v54  ;;  %v3290_v59 = vor.u32 %v3522_v24, %v3289_v21  ;;  %v3353_v41 = vld [vmem:[#allocation10 + $0x190] sm:$0xf] }
 0x118   :  { %v1165_v9 = vmax.f32 %v914_v53, 0.0  ;;  %v3354_v43 = vor.u32 %v3538_v57, %v3353_v41  ;;  %v3520_v41 = vld [vmem:[#allocation10 + $0x104] sm:$0xf0]  ;;  %v3345_v57 = vld [vmem:[#allocation10 + $0x180] sm:$0xf] }
 0x119   :  { %v1168_v58 = vmax.f32 %v818_v14, 0.0  ;;  %2092 = vmatpush.bf16.msra.mxu2 %v3290_v59  ;;  %v3281_v59 = vld [vmem:[#allocation10 + $0x100] sm:$0xf] }
 0x11a   :  { %v1208_v13 = vpack.c.bf16 %v1165_v9, %v1164_v40  ;;  %v1293_v61 = vand.u32 2147483647, %v1165_v9  ;;  %v915_v26 = vpop.f32.mrf.mxu3  ;;  %v820_v56 = vpop.f32.mrf.mxu1  ;;  %v3218_v40 = vor.u32 %v3504_v33, %v3217_v30  ;;  %2141 = vmatpush.bf16.msra.mxu3 %v3354_v43  ;;  %v3282_v43 = vor.u32 %v3520_v41, %v3281_v59 }
 0x11b   :  { %v866_v25 = vpop.f32.mrf.mxu2  ;;  %v771_v55 = vpop.f32.mrf.mxu0  ;;  %v1296_v52 = vand.u32 2147483647, %v1168_v58 }
 0x11c   :  { %1240 = vst [vmem:[#allocation13 + $0xa0] sm:$0xff] %v1208_v13  ;;  %v4063_v37 = vadd.f32 %v1293_v61, %v1292_v8  ;;  %v867_v38 = vadd.f32 %v866_v25, %v3979_v39  ;;  %v772_v22 = vadd.f32 %v771_v55, %v3971_v20  ;;  %2044 = vmatpush.bf16.msra.mxu1 %v3218_v40  ;;  %v1580_v5 = vunpack.c.l.b16 %v1208_v13 }
 0x11d   :  { %1015 = vmatmul.bf16.gmra.mxu1 %v3954_v12  ;;  %v1581_v6 = vunpack.c.h.b16 %v1208_v13  ;;  %2093 = vmatpush.bf16.msra.mxu2 %v3282_v43 }
 0x11e   :  { %v916_v42 = vadd.f32 %v915_v26, %v867_v38  ;;  %v821_v44 = vadd.f32 %v820_v56, %v772_v22  ;;  %966 = vmatmul.bf16.gmra.mxu0 %v3952_v11 }
 0x11f   :  { %1113 = vmatmul.bf16.gmra.mxu3 %v3954_v12 }
 0x120   :  { %v1169_v31 = vmax.f32 %v916_v42, 0.0  ;;  %1064 = vmatmul.bf16.gmra.mxu2 %v3952_v11  ;;  %v1172_v0 = vmax.f32 %v821_v44, 0.0  ;;  %v3536_v44 = vld [vmem:[#allocation10 + $0x184] sm:$0xf0] }
 0x122   :  { %v1210_v53 = vpack.c.bf16 %v1169_v31, %v1168_v58  ;;  %v1297_v54 = vand.u32 2147483647, %v1169_v31  ;;  %v918_v2 = vpop.f32.mrf.mxu3  ;;  %v822_v61 = vpop.f32.mrf.mxu1  ;;  %v1300_v26 = vand.u32 2147483647, %v1172_v0 }
 0x123   :  { %v869_v1 = vpop.f32.mrf.mxu2  ;;  %v773_v10 = vpop.f32.mrf.mxu0 }
 0x124   :  { %1242 = vst [vmem:[#allocation13 + $0xb0] sm:$0xff] %v1210_v53  ;;  %v4071_v8 = vadd.f32 %v1297_v54, %v1296_v52  ;;  %v870_v9 = vadd.f32 %v869_v1, %v3979_v39  ;;  %v1584_v11 = vunpack.c.l.b16 %v1210_v53  ;;  %v1585_v14 = vunpack.c.h.b16 %v1210_v53 }
 0x125   :  { %v774_v15 = vadd.f32 %v773_v10, %v3971_v20  ;;  %v3346_v52 = vor.u32 %v3536_v44, %v3345_v57  ;;  %v3533_v44 = vld [vmem:[#allocation10 + $0x174] sm:$0xf] }
 0x126   :  { %v919_v12 = vadd.f32 %v918_v2, %v870_v9  ;;  %v4075_v16 = vpack.c.b16 %v1584_v11, %v1580_v5  ;;  %v4077_v25 = vpack.c.b16 %v1585_v14, %v1581_v6 }
 0x127   :  { %v823_v33 = vadd.f32 %v822_v61, %v774_v15  ;;  %2142 = vmatpush.bf16.msra.mxu3 %v3346_v52  ;;  %v3549_v52 = vld [vmem:[#allocation10 + $0x1f4] sm:$0xf] }
 0x128   :  { %v1173_v27 = vmax.f32 %v919_v12, 0.0 }
 0x129   :  { %v1176_v58 = vmax.f32 %v823_v33, 0.0 }
 0x12a   :  { %v1212_v30 = vpack.c.bf16 %v1173_v27, %v1172_v0  ;;  %v1301_v13 = vand.u32 2147483647, %v1173_v27  ;;  %v920_v55 = vpop.f32.mrf.mxu3  ;;  %v825_v40 = vpop.f32.mrf.mxu1 }
 0x12b   :  { %v871_v38 = vpop.f32.mrf.mxu2  ;;  %v776_v24 = vpop.f32.mrf.mxu0  ;;  %v1304_v54 = vand.u32 2147483647, %v1176_v58 }
 0x12c   :  { %1244 = vst [vmem:[#allocation13 + $0xc0] sm:$0xff] %v1212_v30  ;;  %v4079_v56 = vadd.f32 %v1301_v13, %v1300_v26  ;;  %v872_v21 = vadd.f32 %v871_v38, %v3979_v39  ;;  %v777_v22 = vadd.f32 %v776_v24, %v3971_v20  ;;  %v1588_v9 = vunpack.c.l.b16 %v1212_v30 }
 0x12d   :  { %1020 = vmatmul.bf16.gmra.mxu1 %v3962_v18  ;;  %v1589_v10 = vunpack.c.h.b16 %v1212_v30  ;;  %v4096_v30 = vperm.slane %v3968_v19, 2 }
 0x12e   :  { %v921_v42 = vadd.f32 %v920_v55, %v872_v21  ;;  %v826_v31 = vadd.f32 %v825_v40, %v777_v22  ;;  %971 = vmatmul.bf16.gmra.mxu0 %v3960_v17 }
 0x12f   :  { %1118 = vmatmul.bf16.gmra.mxu3 %v3962_v18 }
 0x130   :  { %v1177_v53 = vmax.f32 %v921_v42, 0.0  ;;  %1069 = vmatmul.bf16.gmra.mxu2 %v3960_v17  ;;  %v1180_v2 = vmax.f32 %v826_v31, 0.0  ;;  %v3339_v31 = vld [vmem:[#allocation10 + $0x178] sm:$0xf0] }
 0x132   :  { %v1214_v0 = vpack.c.bf16 %v1177_v53, %v1176_v58  ;;  %v1305_v1 = vand.u32 2147483647, %v1177_v53  ;;  %v923_v6 = vpop.f32.mrf.mxu3  ;;  %v827_v12 = vpop.f32.mrf.mxu1  ;;  %v1308_v33 = vand.u32 2147483647, %v1180_v2 }
 0x133   :  { %v874_v5 = vpop.f32.mrf.mxu2  ;;  %v778_v14 = vpop.f32.mrf.mxu0 }
 0x134   :  { %1246 = vst [vmem:[#allocation13 + $0xd0] sm:$0xff] %v1214_v0  ;;  %v4087_v61 = vadd.f32 %v1305_v1, %v1304_v54  ;;  %v875_v11 = vadd.f32 %v874_v5, %v3979_v39  ;;  %v1592_v17 = vunpack.c.l.b16 %v1214_v0  ;;  %v1593_v15 = vunpack.c.h.b16 %v1214_v0  ;;  %v3403_v0 = vld [vmem:[#allocation10 + $0x1f8] sm:$0xf0] }
 0x135   :  { %v779_v18 = vadd.f32 %v778_v14, %v3971_v20  ;;  %v3342_v54 = vor.u32 %v3533_v44, %v3339_v31  ;;  %v3275_v44 = vld [vmem:[#allocation10 + $0xf8] sm:$0xf0] }
 0x136   :  { %v924_v26 = vadd.f32 %v923_v6, %v875_v11  ;;  %v4091_v27 = vpack.c.b16 %v1592_v17, %v1588_v9  ;;  %v4093_v13 = vpack.c.b16 %v1593_v15, %v1589_v10 }
 0x137   :  { %v828_v55 = vadd.f32 %v827_v12, %v779_v18  ;;  %2282 = vmatpush.bf16.msrb.mxu2 %v3342_v54 }
 0x138   :  { %v1181_v38 = vmax.f32 %v924_v26, 0.0 }
 0x139   :  { %v1184_v58 = vmax.f32 %v828_v55, 0.0 }
 0x13a   :  { %v1216_v21 = vpack.c.bf16 %v1181_v38, %v1180_v2  ;;  %v1309_v24 = vand.u32 2147483647, %v1181_v38  ;;  %v925_v22 = vpop.f32.mrf.mxu3  ;;  %v986_v57 = vpop.f32.mrf.mxu1  ;;  %v4105_v2 = vperm.slane %v3968_v19, 3 }
 0x13b   :  { %v876_v40 = vpop.f32.mrf.mxu2  ;;  %v937_v41 = vpop.f32.mrf.mxu0  ;;  %v1312_v6 = vand.u32 2147483647, %v1184_v58 }
 0x13c   :  { %1248 = vst [vmem:[#allocation13 + $0xe0] sm:$0xff] %v1216_v21  ;;  %v4098_v59 = vadd.f32 %v1309_v24, %v1308_v33  ;;  %v877_v20 = vadd.f32 %v876_v40, %v3979_v39  ;;  %v938_v42 = vadd.f32 %v937_v41, %v4096_v30  ;;  %v3406_v39 = vor.u32 %v3549_v52, %v3403_v0  ;;  %v3211_v41 = vld [vmem:[#allocation10 + $0x78] sm:$0xf0] }
 0x13d   :  { %2045 = vmatmul.bf16.vlgmr.msra.gmra.mxu1 %v3997_v48  ;;  %v1596_v17 = vunpack.c.l.b16 %v1216_v21  ;;  %v1597_v15 = vunpack.c.h.b16 %v1216_v21 }
 0x13e   :  { %v926_v43 = vadd.f32 %v925_v22, %v877_v20  ;;  %v987_v53 = vadd.f32 %v986_v57, %v938_v42  ;;  %1996 = vmatmul.bf16.vlgmr.msra.gmra.mxu0 %v3995_v47  ;;  %2331 = vmatpush.bf16.msrb.mxu3 %v3406_v39  ;;  %v3501_v20 = vld [vmem:[#allocation10 + $0x74] sm:$0xf] }
 0x13f   :  { %v3517_v57 = vld [vmem:[#allocation10 + $0xf4] sm:$0xf] }
 0x140   :  { %v1185_v1 = vmax.f32 %v926_v43, 0.0  ;;  %v1126_v5 = vmax.f32 %v987_v53, 0.0  ;;  %v3214_v43 = vor.u32 %v3501_v20, %v3211_v41  ;;  %v3278_v52 = vor.u32 %v3517_v57, %v3275_v44 }
 0x142   :  { %v1218_v9 = vpack.c.bf16 %v1185_v1, %v1184_v58  ;;  %v1313_v10 = vand.u32 2147483647, %v1185_v1  ;;  %v1254_v11 = vand.u32 2147483647, %v1126_v5  ;;  %v1084_v12 = vpop.f32.mrf.mxu3  ;;  %v988_v19 = vpop.f32.mrf.mxu1  ;;  %2184 = vmatpush.bf16.msrb.mxu0 %v3214_v43  ;;  %2233 = vmatpush.bf16.msrb.mxu1 %v3278_v52 }
 0x143   :  { %v1035_v14 = vpop.f32.mrf.mxu2  ;;  %v939_v33 = vpop.f32.mrf.mxu0 }
 0x144   :  { %1250 = vst [vmem:[#allocation13 + $0xf0] sm:$0xff] %v1218_v9  ;;  %v4107_v18 = vadd.f32 %v1313_v10, %v1312_v6  ;;  %v1036_v26 = vadd.f32 %v1035_v14, %v4105_v2  ;;  %v1600_v38 = vunpack.c.l.b16 %v1218_v9  ;;  %v1601_v55 = vunpack.c.h.b16 %v1218_v9 }
 0x145   :  { %v1332_v24 = vadd.f32 %v3983_v63, %v1254_v11  ;;  %v940_v40 = vadd.f32 %v939_v33, %v4096_v30  ;;  %v3547_v33 = vld [vmem:[#allocation10 + $0x1e4] sm:$0xf] }
 0x146   :  { %v1085_v22 = vadd.f32 %v1084_v12, %v1036_v26  ;;  %v4112_v58 = vpack.c.b16 %v1600_v38, %v1596_v17  ;;  %v4114_v21 = vpack.c.b16 %v1601_v55, %v1597_v15  ;;  %v3531_v15 = vld [vmem:[#allocation10 + $0x164] sm:$0xf]  ;;  %v3331_v26 = vld [vmem:[#allocation10 + $0x168] sm:$0xf0] }
 0x147   :  { %v989_v42 = vadd.f32 %v988_v19, %v940_v40  ;;  %v3334_v19 = vor.u32 %v3531_v15, %v3331_v26  ;;  %v3395_v38 = vld [vmem:[#allocation10 + $0x1e8] sm:$0xf0]  ;;  %v3515_v15 = vld [vmem:[#allocation10 + $0xe4] sm:$0xf] }
 0x148   :  { %v1127_v31 = vmax.f32 %v1085_v22, 0.0 }
 0x149   :  { %v1130_v53 = vmax.f32 %v989_v42, 0.0  ;;  %2283 = vmatpush.bf16.msrb.mxu2 %v3334_v19 }
 0x14a   :  { %v1189_v54 = vpack.c.bf16 %v1127_v31, %v1126_v5  ;;  %v1255_v0 = vand.u32 2147483647, %v1127_v31  ;;  %v1086_v39 = vpop.f32.mrf.mxu3  ;;  %v991_v11 = vpop.f32.mrf.mxu1 }
 0x14b   :  { %v1258_v63 = vand.u32 2147483647, %v1130_v53  ;;  %v1037_v1 = vpop.f32.mrf.mxu2  ;;  %v942_v10 = vpop.f32.mrf.mxu0 }
 0x14c   :  { %1221 = vst [vmem:[#allocation13 + $0x8] sm:$0xff] %v1189_v54  ;;  %v1348_v6 = vadd.f32 %v1332_v24, %v1255_v0  ;;  %v1038_v9 = vadd.f32 %v1037_v1, %v4105_v2  ;;  %v943_v12 = vadd.f32 %v942_v10, %v4096_v30  ;;  %v3398_v24 = vor.u32 %v3547_v33, %v3395_v38  ;;  %v3267_v33 = vld [vmem:[#allocation10 + $0xe8] sm:$0xf0] }
 0x14d   :  { %v1333_v14 = vadd.f32 %v3991_v36, %v1258_v63  ;;  %2050 = vmatmul.bf16.gmra.mxu1 %v4013_v49  ;;  %v1542_v36 = vunpack.c.l.b16 %v1189_v54  ;;  %v1543_v41 = vunpack.c.h.b16 %v1189_v54 }
 0x14e   :  { %v1087_v17 = vadd.f32 %v1086_v39, %v1038_v9  ;;  %v992_v5 = vadd.f32 %v991_v11, %v943_v12  ;;  %2001 = vmatmul.bf16.gmra.mxu0 %v4011_v46  ;;  %2332 = vmatpush.bf16.msrb.mxu3 %v3398_v24  ;;  %v3499_v12 = vld [vmem:[#allocation10 + $0x64] sm:$0xf] }
 0x150   :  { %v1131_v55 = vmax.f32 %v1087_v17, 0.0  ;;  %v1134_v40 = vmax.f32 %v992_v5, 0.0  ;;  %v3203_v17 = vld [vmem:[#allocation10 + $0x68] sm:$0xf0] }
 0x151   :  { %v3206_v26 = vor.u32 %v3499_v12, %v3203_v17 }
 0x152   :  { %v1191_v22 = vpack.c.bf16 %v1131_v55, %v1130_v53  ;;  %v1259_v20 = vand.u32 2147483647, %v1131_v55  ;;  %v1262_v57 = vand.u32 2147483647, %v1134_v40  ;;  %v1089_v43 = vpop.f32.mrf.mxu3  ;;  %v993_v1 = vpop.f32.mrf.mxu1 }
 0x153   :  { %v1040_v42 = vpop.f32.mrf.mxu2  ;;  %v944_v63 = vpop.f32.mrf.mxu0  ;;  %2185 = vmatpush.bf16.msrb.mxu0 %v3206_v26 }
 0x154   :  { %1223 = vst [vmem:[#allocation13 + $0x18] sm:$0xff] %v1191_v22  ;;  %v1349_v44 = vadd.f32 %v1333_v14, %v1259_v20  ;;  %v1546_v31 = vunpack.c.l.b16 %v1191_v22  ;;  %v1547_v52 = vunpack.c.h.b16 %v1191_v22  ;;  %v1041_v0 = vadd.f32 %v1040_v42, %v4105_v2 }
 0x155   :  { %v1334_v39 = vadd.f32 %v3999_v29, %v1262_v57  ;;  %v945_v9 = vadd.f32 %v944_v63, %v4096_v30  ;;  %v3270_v29 = vor.u32 %v3515_v15, %v3267_v33 }
 0x156   :  { %v4124_v53 = vpack.c.b16 %v1546_v31, %v1542_v36  ;;  %v4126_v10 = vpack.c.b16 %v1547_v52, %v1543_v41  ;;  %v2735_v54 = vadd.f32 %v1349_v44, %v1348_v6  ;;  %v1090_v11 = vadd.f32 %v1089_v43, %v1041_v0  ;;  %v3529_v52 = vld [vmem:[#allocation10 + $0x154] sm:$0xf]  ;;  %v3323_v0 = vld [vmem:[#allocation10 + $0x158] sm:$0xf0] }
 0x157   :  { %v994_v14 = vadd.f32 %v993_v1, %v945_v9  ;;  %2234 = vmatpush.bf16.msrb.mxu1 %v3270_v29  ;;  %v3326_v1 = vor.u32 %v3529_v52, %v3323_v0  ;;  %v3513_v52 = vld [vmem:[#allocation10 + $0xd4] sm:$0xf] }
 0x158   :  { %v1135_v5 = vmax.f32 %v1090_v11, 0.0  ;;  %2094 = vmatmul.bf16.vlgmr.msra.gmra.mxu2 %v4124_v53  ;;  %2143 = vmatmul.bf16.vlgmr.msra.gmra.mxu3 %v4126_v10 }
 0x159   :  { %v1138_v19 = vmax.f32 %v994_v14, 0.0  ;;  %2284 = vmatpush.bf16.msrb.mxu2 %v3326_v1 }
 0x15a   :  { %v1193_v38 = vpack.c.bf16 %v1135_v5, %v1134_v40  ;;  %v1263_v55 = vand.u32 2147483647, %v1135_v5  ;;  %v1091_v22 = vpop.f32.mrf.mxu3  ;;  %v996_v57 = vpop.f32.mrf.mxu1  ;;  %v3545_v40 = vld [vmem:[#allocation10 + $0x1d4] sm:$0xf] }
 0x15b   :  { %v1266_v24 = vand.u32 2147483647, %v1138_v19  ;;  %v1042_v6 = vpop.f32.mrf.mxu2  ;;  %v947_v41 = vpop.f32.mrf.mxu0 }
 0x15c   :  { %1225 = vst [vmem:[#allocation13 + $0x28] sm:$0xff] %v1193_v38  ;;  %v1350_v20 = vadd.f32 %v1334_v39, %v1263_v55  ;;  %v1043_v36 = vadd.f32 %v1042_v6, %v4105_v2  ;;  %v948_v43 = vadd.f32 %v947_v41, %v4096_v30  ;;  %v3387_v39 = vld [vmem:[#allocation10 + $0x1d8] sm:$0xf0]  ;;  %v1550_v26 = vunpack.c.l.b16 %v1193_v38 }
 0x15d   :  { %v1335_v42 = vadd.f32 %v4007_v34, %v1266_v24  ;;  %2055 = vmatmul.bf16.gmra.mxu1 %v4029_v50  ;;  %v3390_v11 = vor.u32 %v3545_v40, %v3387_v39  ;;  %v1551_v33 = vunpack.c.h.b16 %v1193_v38  ;;  %v3195_v38 = vld [vmem:[#allocation10 + $0x58] sm:$0xf0] }
 0x15e   :  { %v2736_v44 = vadd.f32 %v2735_v54, %v1350_v20  ;;  %v1092_v31 = vadd.f32 %v1091_v22, %v1043_v36  ;;  %v997_v63 = vadd.f32 %v996_v57, %v948_v43  ;;  %2006 = vmatmul.bf16.gmra.mxu0 %v4027_v45  ;;  %v3259_v40 = vld [vmem:[#allocation10 + $0xd8] sm:$0xf0] }
 0x15f   :  { %2333 = vmatpush.bf16.msrb.mxu3 %v3390_v11 }
 0x160   :  { %v1139_v9 = vmax.f32 %v1092_v31, 0.0  ;;  %v1142_v12 = vmax.f32 %v997_v63, 0.0  ;;  %v3497_v31 = vld [vmem:[#allocation10 + $0x54] sm:$0xf] }
 0x161   :  { %v3198_v0 = vor.u32 %v3497_v31, %v3195_v38 }
 0x162   :  { %v1195_v17 = vpack.c.bf16 %v1139_v9, %v1138_v19  ;;  %v1267_v34 = vand.u32 2147483647, %v1139_v9  ;;  %v1270_v15 = vand.u32 2147483647, %v1142_v12  ;;  %v1094_v14 = vpop.f32.mrf.mxu3  ;;  %v998_v24 = vpop.f32.mrf.mxu1 }
 0x163   :  { %v1045_v54 = vpop.f32.mrf.mxu2  ;;  %v949_v55 = vpop.f32.mrf.mxu0  ;;  %2186 = vmatpush.bf16.msrb.mxu0 %v3198_v0 }
 0x164   :  { %1227 = vst [vmem:[#allocation13 + $0x38] sm:$0xff] %v1195_v17  ;;  %v1351_v5 = vadd.f32 %v1335_v42, %v1267_v34  ;;  %v1046_v29 = vadd.f32 %v1045_v54, %v4105_v2  ;;  %v1554_v6 = vunpack.c.l.b16 %v1195_v17  ;;  %v1555_v22 = vunpack.c.h.b16 %v1195_v17 }
 0x165   :  { %v1336_v20 = vadd.f32 %v4015_v28, %v1270_v15  ;;  %v950_v36 = vadd.f32 %v949_v55, %v4096_v30  ;;  %v3262_v28 = vor.u32 %v3513_v52, %v3259_v40  ;;  %v3527_v55 = vld [vmem:[#allocation10 + $0x144] sm:$0xf] }
 0x166   :  { %v2737_v19 = vadd.f32 %v2736_v44, %v1351_v5  ;;  %v1095_v41 = vadd.f32 %v1094_v14, %v1046_v29  ;;  %v4138_v57 = vpack.c.b16 %v1554_v6, %v1550_v26  ;;  %v4140_v43 = vpack.c.b16 %v1555_v22, %v1551_v33 }
 0x167   :  { %v999_v42 = vadd.f32 %v998_v24, %v950_v36  ;;  %2235 = vmatpush.bf16.msrb.mxu1 %v3262_v28  ;;  %v3315_v24 = vld [vmem:[#allocation10 + $0x148] sm:$0xf0] }
 0x168   :  { %v1143_v63 = vmax.f32 %v1095_v41, 0.0  ;;  %2099 = vmatmul.bf16.gmra.mxu2 %v4138_v57  ;;  %2148 = vmatmul.bf16.gmra.mxu3 %v4140_v43  ;;  %v3318_v22 = vor.u32 %v3527_v55, %v3315_v24  ;;  %v3511_v55 = vld [vmem:[#allocation10 + $0xc4] sm:$0xf] }
 0x169   :  { %v1146_v1 = vmax.f32 %v999_v42, 0.0 }
 0x16a   :  { %v1197_v44 = vpack.c.bf16 %v1143_v63, %v1142_v12  ;;  %v1271_v39 = vand.u32 2147483647, %v1143_v63  ;;  %v1096_v17 = vpop.f32.mrf.mxu3  ;;  %v1001_v14 = vpop.f32.mrf.mxu1  ;;  %v3543_v12 = vld [vmem:[#allocation10 + $0x1c4] sm:$0xf]  ;;  %2285 = vmatpush.bf16.msrb.mxu2 %v3318_v22 }
 0x16b   :  { %v1274_v9 = vand.u32 2147483647, %v1146_v1  ;;  %v1047_v11 = vpop.f32.mrf.mxu2  ;;  %v952_v54 = vpop.f32.mrf.mxu0 }
 0x16c   :  { %1229 = vst [vmem:[#allocation13 + $0x48] sm:$0xff] %v1197_v44  ;;  %v1352_v34 = vadd.f32 %v1336_v20, %v1271_v39  ;;  %v1048_v15 = vadd.f32 %v1047_v11, %v4105_v2  ;;  %v953_v33 = vadd.f32 %v952_v54, %v4096_v30  ;;  %v3379_v20 = vld [vmem:[#allocation10 + $0x1c8] sm:$0xf0]  ;;  %v1558_v0 = vunpack.c.l.b16 %v1197_v44 }
 0x16d   :  { %v1337_v26 = vadd.f32 %v4023_v35, %v1274_v9  ;;  %2060 = vmatmul.bf16.gmra.mxu1 %v4045_v51  ;;  %v3382_v41 = vor.u32 %v3543_v12, %v3379_v20  ;;  %v1559_v40 = vunpack.c.h.b16 %v1197_v44  ;;  %v3187_v44 = vld [vmem:[#allocation10 + $0x48] sm:$0xf0] }
 0x16e   :  { %v2738_v5 = vadd.f32 %v2737_v19, %v1352_v34  ;;  %v1097_v29 = vadd.f32 %v1096_v17, %v1048_v15  ;;  %v1002_v6 = vadd.f32 %v1001_v14, %v953_v33  ;;  %2011 = vmatmul.bf16.gmra.mxu0 %v4043_v32  ;;  %v3251_v12 = vld [vmem:[#allocation10 + $0xc8] sm:$0xf0] }
 0x16f   :  { %2334 = vmatpush.bf16.msrb.mxu3 %v3382_v41 }
 0x170   :  { %v1147_v36 = vmax.f32 %v1097_v29, 0.0  ;;  %v1150_v31 = vmax.f32 %v1002_v6, 0.0  ;;  %v3495_v29 = vld [vmem:[#allocation10 + $0x44] sm:$0xf] }
 0x171   :  { %v3190_v24 = vor.u32 %v3495_v29, %v3187_v44 }
 0x172   :  { %v1199_v38 = vpack.c.bf16 %v1147_v36, %v1146_v1  ;;  %v1275_v35 = vand.u32 2147483647, %v1147_v36  ;;  %v1278_v52 = vand.u32 2147483647, %v1150_v31  ;;  %v1099_v42 = vpop.f32.mrf.mxu3  ;;  %v1003_v9 = vpop.f32.mrf.mxu1 }
 0x173   :  { %v1050_v19 = vpop.f32.mrf.mxu2  ;;  %v954_v39 = vpop.f32.mrf.mxu0  ;;  %2187 = vmatpush.bf16.msrb.mxu0 %v3190_v24 }
 0x174   :  { %1231 = vst [vmem:[#allocation13 + $0x58] sm:$0xff] %v1199_v38  ;;  %v1353_v63 = vadd.f32 %v1337_v26, %v1275_v35  ;;  %v1051_v28 = vadd.f32 %v1050_v19, %v4105_v2  ;;  %v1562_v11 = vunpack.c.l.b16 %v1199_v38  ;;  %v1563_v17 = vunpack.c.h.b16 %v1199_v38 }
 0x175   :  { %v1338_v34 = vadd.f32 %v4031_v62, %v1278_v52  ;;  %v955_v15 = vadd.f32 %v954_v39, %v4096_v30  ;;  %v3254_v62 = vor.u32 %v3511_v55, %v3251_v12  ;;  %v3525_v39 = vld [vmem:[#allocation10 + $0x134] sm:$0xf] }
 0x176   :  { %v2739_v1 = vadd.f32 %v2738_v5, %v1353_v63  ;;  %v1100_v54 = vadd.f32 %v1099_v42, %v1051_v28  ;;  %v4152_v14 = vpack.c.b16 %v1562_v11, %v1558_v0  ;;  %v4154_v33 = vpack.c.b16 %v1563_v17, %v1559_v40 }
 0x177   :  { %v1004_v26 = vadd.f32 %v1003_v9, %v955_v15  ;;  %2236 = vmatpush.bf16.msrb.mxu1 %v3254_v62  ;;  %v3307_v9 = vld [vmem:[#allocation10 + $0x138] sm:$0xf0] }
 0x178   :  { %v1151_v6 = vmax.f32 %v1100_v54, 0.0  ;;  %2104 = vmatmul.bf16.gmra.mxu2 %v4152_v14  ;;  %2153 = vmatmul.bf16.gmra.mxu3 %v4154_v33  ;;  %v3310_v17 = vor.u32 %v3525_v39, %v3307_v9  ;;  %v3509_v39 = vld [vmem:[#allocation10 + $0xb4] sm:$0xf] }
 0x179   :  { %v1154_v22 = vmax.f32 %v1004_v26, 0.0 }
 0x17a   :  { %v1201_v5 = vpack.c.bf16 %v1151_v6, %v1150_v31  ;;  %v1279_v20 = vand.u32 2147483647, %v1151_v6  ;;  %v1101_v38 = vpop.f32.mrf.mxu3  ;;  %v1006_v42 = vpop.f32.mrf.mxu1  ;;  %v3541_v31 = vld [vmem:[#allocation10 + $0x1b4] sm:$0xf]  ;;  %2286 = vmatpush.bf16.msrb.mxu2 %v3310_v17 }
 0x17b   :  { %v1282_v36 = vand.u32 2147483647, %v1154_v22  ;;  %v1052_v41 = vpop.f32.mrf.mxu2  ;;  %v957_v19 = vpop.f32.mrf.mxu0 }
 0x17c   :  { %1233 = vst [vmem:[#allocation13 + $0x68] sm:$0xff] %v1201_v5  ;;  %v1354_v35 = vadd.f32 %v1338_v34, %v1279_v20  ;;  %v1053_v52 = vadd.f32 %v1052_v41, %v4105_v2  ;;  %v958_v40 = vadd.f32 %v957_v19, %v4096_v30  ;;  %v3371_v34 = vld [vmem:[#allocation10 + $0x1b8] sm:$0xf0]  ;;  %v1566_v24 = vunpack.c.l.b16 %v1201_v5 }
 0x17d   :  { %v1339_v0 = vadd.f32 %v4039_v23, %v1282_v36  ;;  %2065 = vmatmul.bf16.gmra.mxu1 %v4061_v7  ;;  %v3374_v54 = vor.u32 %v3541_v31, %v3371_v34  ;;  %v1567_v12 = vunpack.c.h.b16 %v1201_v5  ;;  %v3179_v5 = vld [vmem:[#allocation10 + $0x38] sm:$0xf0] }
 0x17e   :  { %v2740_v63 = vadd.f32 %v2739_v1, %v1354_v35  ;;  %v1102_v28 = vadd.f32 %v1101_v38, %v1053_v52  ;;  %v1007_v11 = vadd.f32 %v1006_v42, %v958_v40  ;;  %2016 = vmatmul.bf16.gmra.mxu0 %v4059_v4  ;;  %v3243_v31 = vld [vmem:[#allocation10 + $0xb8] sm:$0xf0] }
 0x17f   :  { %2335 = vmatpush.bf16.msrb.mxu3 %v3374_v54 }
 0x180   :  { %v1155_v15 = vmax.f32 %v1102_v28, 0.0  ;;  %v1158_v29 = vmax.f32 %v1007_v11, 0.0  ;;  %v3493_v28 = vld [vmem:[#allocation10 + $0x34] sm:$0xf] }
 0x181   :  { %v3182_v9 = vor.u32 %v3493_v28, %v3179_v5 }
 0x182   :  { %v1203_v44 = vpack.c.bf16 %v1155_v15, %v1154_v22  ;;  %v1283_v23 = vand.u32 2147483647, %v1155_v15  ;;  %v1286_v55 = vand.u32 2147483647, %v1158_v29  ;;  %v1104_v26 = vpop.f32.mrf.mxu3  ;;  %v1008_v36 = vpop.f32.mrf.mxu1 }
 0x183   :  { %v1055_v1 = vpop.f32.mrf.mxu2  ;;  %v959_v20 = vpop.f32.mrf.mxu0  ;;  %2188 = vmatpush.bf16.msrb.mxu0 %v3182_v9 }
 0x184   :  { %1235 = vst [vmem:[#allocation13 + $0x78] sm:$0xff] %v1203_v44  ;;  %v1355_v6 = vadd.f32 %v1339_v0, %v1283_v23  ;;  %v1056_v62 = vadd.f32 %v1055_v1, %v4105_v2  ;;  %v1570_v41 = vunpack.c.l.b16 %v1203_v44  ;;  %v1571_v38 = vunpack.c.h.b16 %v1203_v44 }
 0x185   :  { %v1340_v35 = vadd.f32 %v4047_v3, %v1286_v55  ;;  %v960_v52 = vadd.f32 %v959_v20, %v4096_v30  ;;  %v3246_v3 = vor.u32 %v3509_v39, %v3243_v31  ;;  %v3523_v20 = vld [vmem:[#allocation10 + $0x124] sm:$0xf] }
 0x186   :  { %v2741_v22 = vadd.f32 %v2740_v63, %v1355_v6  ;;  %v1105_v19 = vadd.f32 %v1104_v26, %v1056_v62  ;;  %v4166_v42 = vpack.c.b16 %v1570_v41, %v1566_v24  ;;  %v4168_v40 = vpack.c.b16 %v1571_v38, %v1567_v12 }
 0x187   :  { %v1009_v0 = vadd.f32 %v1008_v36, %v960_v52  ;;  %2237 = vmatpush.bf16.msrb.mxu1 %v3246_v3  ;;  %v3299_v36 = vld [vmem:[#allocation10 + $0x128] sm:$0xf0] }
 0x188   :  { %v1159_v11 = vmax.f32 %v1105_v19, 0.0  ;;  %2109 = vmatmul.bf16.gmra.mxu2 %v4166_v42  ;;  %2158 = vmatmul.bf16.gmra.mxu3 %v4168_v40  ;;  %v3302_v38 = vor.u32 %v3523_v20, %v3299_v36  ;;  %v3171_v3 = vld [vmem:[#allocation10 + $0x28] sm:$0xf0] }
 0x189   :  { %v1162_v17 = vmax.f32 %v1009_v0, 0.0 }
 0x18a   :  { %v1205_v63 = vpack.c.bf16 %v1159_v11, %v1158_v29  ;;  %v1287_v34 = vand.u32 2147483647, %v1159_v11  ;;  %v1106_v44 = vpop.f32.mrf.mxu3  ;;  %v1011_v26 = vpop.f32.mrf.mxu1  ;;  %v3539_v29 = vld [vmem:[#allocation10 + $0x1a4] sm:$0xf]  ;;  %2287 = vmatpush.bf16.msrb.mxu2 %v3302_v38  ;;  %v3489_v38 = vld [vmem:[#allocation10 + $0x14] sm:$0xf] }
 0x18b   :  { %v1290_v15 = vand.u32 2147483647, %v1162_v17  ;;  %v1057_v54 = vpop.f32.mrf.mxu2  ;;  %v962_v1 = vpop.f32.mrf.mxu0  ;;  %v3491_v11 = vld [vmem:[#allocation10 + $0x24] sm:$0xf] }
 0x18c   :  { %1237 = vst [vmem:[#allocation13 + $0x88] sm:$0xff] %v1205_v63  ;;  %v1356_v23 = vadd.f32 %v1340_v35, %v1287_v34  ;;  %v1058_v55 = vadd.f32 %v1057_v54, %v4105_v2  ;;  %v963_v12 = vadd.f32 %v962_v1, %v4096_v30  ;;  %v3363_v35 = vld [vmem:[#allocation10 + $0x1a8] sm:$0xf0]  ;;  %v1574_v9 = vunpack.c.l.b16 %v1205_v63  ;;  %v3507_v1 = vld [vmem:[#allocation10 + $0xa4] sm:$0xf] }
 0x18d   :  { %v1341_v24 = vadd.f32 %v4055_v60, %v1290_v15  ;;  %2070 = vmatmul.bf16.gmra.mxu1 %v4077_v25  ;;  %v3366_v19 = vor.u32 %v3539_v29, %v3363_v35  ;;  %v1575_v31 = vunpack.c.h.b16 %v1205_v63  ;;  %v3163_v35 = vld [vmem:[#allocation10 + $0x18] sm:$0xf0] }
 0x18e   :  { %v2742_v6 = vadd.f32 %v2741_v22, %v1356_v23  ;;  %v1107_v62 = vadd.f32 %v1106_v44, %v1058_v55  ;;  %v1012_v41 = vadd.f32 %v1011_v26, %v963_v12  ;;  %2021 = vmatmul.bf16.gmra.mxu0 %v4075_v16  ;;  %v3235_v26 = vld [vmem:[#allocation10 + $0xa8] sm:$0xf0] }
 0x18f   :  { %2336 = vmatpush.bf16.msrb.mxu3 %v3366_v19  ;;  %v3238_v20 = vor.u32 %v3507_v1, %v3235_v26 }
 0x190   :  { %v1163_v52 = vmax.f32 %v1107_v62, 0.0  ;;  %v1166_v28 = vmax.f32 %v1012_v41, 0.0  ;;  %v3174_v62 = vor.u32 %v3491_v11, %v3171_v3  ;;  %v3487_v11 = vld [vmem:[#allocation10 + $0x4] sm:$0xf]  ;;  %v3155_v3 = vld [vmem:[#allocation10 + $0x8] sm:$0xf0] }
 0x191   :  { %2238 = vmatpush.bf16.msrb.mxu1 %v3238_v20  ;;  %v3158_v20 = vor.u32 %v3487_v11, %v3155_v3 }
 0x192   :  { %v1207_v5 = vpack.c.bf16 %v1163_v52, %v1162_v17  ;;  %v1291_v60 = vand.u32 2147483647, %v1163_v52  ;;  %v1294_v39 = vand.u32 2147483647, %v1166_v28  ;;  %v1109_v0 = vpop.f32.mrf.mxu3  ;;  %v1013_v44 = vpop.f32.mrf.mxu1  ;;  %2189 = vmatpush.bf16.msrb.mxu0 %v3174_v62  ;;  %v3505_v52 = vld [vmem:[#allocation10 + $0x94] sm:$0xf] }
 0x193   :  { %v1060_v22 = vpop.f32.mrf.mxu2  ;;  %v964_v54 = vpop.f32.mrf.mxu0  ;;  %v3355_v62 = vld [vmem:[#allocation10 + $0x198] sm:$0xf0] }
 0x194   :  { %1239 = vst [vmem:[#allocation13 + $0x98] sm:$0xff] %v1207_v5  ;;  %v1357_v34 = vadd.f32 %v1341_v24, %v1291_v60  ;;  %v1061_v15 = vadd.f32 %v1060_v22, %v4105_v2  ;;  %v1578_v23 = vunpack.c.l.b16 %v1207_v5  ;;  %v1579_v55 = vunpack.c.h.b16 %v1207_v5  ;;  %v3227_v5 = vld [vmem:[#allocation10 + $0x98] sm:$0xf0] }
 0x195   :  { %v1342_v17 = vadd.f32 %v4063_v37, %v1294_v39  ;;  %v965_v12 = vadd.f32 %v964_v54, %v4096_v30  ;;  %v3166_v37 = vor.u32 %v3489_v38, %v3163_v35 }
 0x196   :  { %v2743_v36 = vadd.f32 %v2742_v6, %v1357_v34  ;;  %v1110_v63 = vadd.f32 %v1109_v0, %v1061_v15  ;;  %v4180_v29 = vpack.c.b16 %v1578_v23, %v1574_v9  ;;  %v4182_v41 = vpack.c.b16 %v1579_v55, %v1575_v31  ;;  %v3521_v23 = vld [vmem:[#allocation10 + $0x114] sm:$0xf]  ;;  %v3291_v55 = vld [vmem:[#allocation10 + $0x118] sm:$0xf0] }
 0x197   :  { %v1014_v24 = vadd.f32 %v1013_v44, %v965_v12  ;;  %v3230_v6 = vor.u32 %v3505_v52, %v3227_v5  ;;  %2190 = vmatpush.bf16.msrb.mxu0 %v3166_v37  ;;  %v3294_v26 = vor.u32 %v3521_v23, %v3291_v55  ;;  %v3537_v12 = vld [vmem:[#allocation10 + $0x194] sm:$0xf]  ;;  %v3219_v52 = vld [vmem:[#allocation10 + $0x88] sm:$0xf0] }
 0x198   :  { %v1167_v19 = vmax.f32 %v1110_v63, 0.0  ;;  %2114 = vmatmul.bf16.gmra.mxu2 %v4180_v29  ;;  %2163 = vmatmul.bf16.gmra.mxu3 %v4182_v41  ;;  %v3503_v63 = vld [vmem:[#allocation10 + $0x84] sm:$0xf]  ;;  %v3358_v35 = vor.u32 %v3537_v12, %v3355_v62 }
 0x199   :  { %v1170_v60 = vmax.f32 %v1014_v24, 0.0  ;;  %2239 = vmatpush.bf16.msrb.mxu1 %v3230_v6  ;;  %2288 = vmatpush.bf16.msrb.mxu2 %v3294_v26 }
 0x19a   :  { %v1209_v39 = vpack.c.bf16 %v1167_v19, %v1166_v28  ;;  %v1295_v22 = vand.u32 2147483647, %v1167_v19  ;;  %v1111_v31 = vpop.f32.mrf.mxu3  ;;  %v1016_v44 = vpop.f32.mrf.mxu1  ;;  %v3222_v19 = vor.u32 %v3503_v63, %v3219_v52  ;;  %2337 = vmatpush.bf16.msrb.mxu3 %v3358_v35  ;;  %v3535_v35 = vld [vmem:[#allocation10 + $0x184] sm:$0xf] }
 0x19b   :  { %v1298_v0 = vand.u32 2147483647, %v1170_v60  ;;  %v1062_v9 = vpop.f32.mrf.mxu2  ;;  %v967_v54 = vpop.f32.mrf.mxu0  ;;  %2191 = vmatpush.bf16.msrb.mxu0 %v3158_v20  ;;  %v3283_v20 = vld [vmem:[#allocation10 + $0x108] sm:$0xf0] }
 0x19c   :  { %1241 = vst [vmem:[#allocation13 + $0xa8] sm:$0xff] %v1209_v39  ;;  %v1358_v34 = vadd.f32 %v1342_v17, %v1295_v22  ;;  %v1063_v15 = vadd.f32 %v1062_v9, %v4105_v2  ;;  %v968_v28 = vadd.f32 %v967_v54, %v4096_v30  ;;  %v1582_v9 = vunpack.c.l.b16 %v1209_v39 }
 0x19d   :  { %v1343_v1 = vadd.f32 %v4071_v8, %v1298_v0  ;;  %2075 = vmatmul.bf16.gmra.mxu1 %v4093_v13 }
 0x19e   :  { %v2744_v24 = vadd.f32 %v2743_v36, %v1358_v34  ;;  %v1112_v38 = vadd.f32 %v1111_v31, %v1063_v15  ;;  %v1017_v17 = vadd.f32 %v1016_v44, %v968_v28  ;;  %2026 = vmatmul.bf16.gmra.mxu0 %v4091_v27  ;;  %2240 = vmatpush.bf16.msrb.mxu1 %v3222_v19  ;;  %v1583_v31 = vunpack.c.h.b16 %v1209_v39 }
 0x1a0   :  { %v1171_v37 = vmax.f32 %v1112_v38, 0.0  ;;  %v1174_v8 = vmax.f32 %v1017_v17, 0.0 }
 0x1a2   :  { %v1211_v5 = vpack.c.bf16 %v1171_v37, %v1170_v60  ;;  %v1299_v6 = vand.u32 2147483647, %v1171_v37  ;;  %v1302_v22 = vand.u32 2147483647, %v1174_v8  ;;  %v1114_v36 = vpop.f32.mrf.mxu3  ;;  %v1018_v15 = vpop.f32.mrf.mxu1 }
 0x1a3   :  { %v1065_v0 = vpop.f32.mrf.mxu2  ;;  %v969_v34 = vpop.f32.mrf.mxu0 }
 0x1a4   :  { %1243 = vst [vmem:[#allocation13 + $0xb8] sm:$0xff] %v1211_v5  ;;  %v1359_v11 = vadd.f32 %v1343_v1, %v1299_v6  ;;  %v1066_v3 = vadd.f32 %v1065_v0, %v4105_v2  ;;  %v1586_v54 = vunpack.c.l.b16 %v1211_v5  ;;  %v1587_v44 = vunpack.c.h.b16 %v1211_v5  ;;  %v3519_v1 = vld [vmem:[#allocation10 + $0x104] sm:$0xf] }
 0x1a5   :  { %v1344_v23 = vadd.f32 %v4079_v56, %v1302_v22  ;;  %v970_v55 = vadd.f32 %v969_v34, %v4096_v30  ;;  %v3286_v38 = vor.u32 %v3519_v1, %v3283_v20  ;;  %v3347_v56 = vld [vmem:[#allocation10 + $0x188] sm:$0xf0] }
 0x1a6   :  { %v2745_v28 = vadd.f32 %v2744_v24, %v1359_v11  ;;  %v1115_v60 = vadd.f32 %v1114_v36, %v1066_v3  ;;  %v4194_v26 = vpack.c.b16 %v1586_v54, %v1582_v9  ;;  %v4196_v12 = vpack.c.b16 %v1587_v44, %v1583_v31 }
 0x1a7   :  { %v1019_v62 = vadd.f32 %v1018_v15, %v970_v55  ;;  %v3350_v24 = vor.u32 %v3535_v35, %v3347_v56  ;;  %2289 = vmatpush.bf16.msrb.mxu2 %v3286_v38 }
 0x1a8   :  { %v1175_v39 = vmax.f32 %v1115_v60, 0.0  ;;  %2119 = vmatmul.bf16.gmra.mxu2 %v4194_v26  ;;  %2168 = vmatmul.bf16.gmra.mxu3 %v4196_v12 }
 0x1a9   :  { %v1178_v63 = vmax.f32 %v1019_v62, 0.0  ;;  %2338 = vmatpush.bf16.msrb.mxu3 %v3350_v24 }
 0x1aa   :  { %v1213_v52 = vpack.c.bf16 %v1175_v39, %v1174_v8  ;;  %v1303_v17 = vand.u32 2147483647, %v1175_v39  ;;  %v1116_v5 = vpop.f32.mrf.mxu3  ;;  %v1021_v36 = vpop.f32.mrf.mxu1 }
 0x1ab   :  { %v1306_v19 = vand.u32 2147483647, %v1178_v63  ;;  %v1067_v37 = vpop.f32.mrf.mxu2  ;;  %v972_v0 = vpop.f32.mrf.mxu0 }
 0x1ac   :  { %1245 = vst [vmem:[#allocation13 + $0xc8] sm:$0xff] %v1213_v52  ;;  %v1360_v6 = vadd.f32 %v1344_v23, %v1303_v17  ;;  %v1068_v22 = vadd.f32 %v1067_v37, %v4105_v2  ;;  %v973_v31 = vadd.f32 %v972_v0, %v4096_v30  ;;  %v1590_v62 = vunpack.c.l.b16 %v1213_v52 }
 0x1ad   :  { %v1345_v9 = vadd.f32 %v4087_v61, %v1306_v19  ;;  %2080 = vmatmul.bf16.gmra.mxu1 %v4114_v21  ;;  %v1591_v39 = vunpack.c.h.b16 %v1213_v52 }
 0x1ae   :  { %v2746_v11 = vadd.f32 %v2745_v28, %v1360_v6  ;;  %v1117_v3 = vadd.f32 %v1116_v5, %v1068_v22  ;;  %v1022_v8 = vadd.f32 %v1021_v36, %v973_v31  ;;  %2031 = vmatmul.bf16.gmra.mxu0 %v4112_v58 }
 0x1b0   :  { %v1179_v34 = vmax.f32 %v1117_v3, 0.0  ;;  %v1182_v15 = vmax.f32 %v1022_v8, 0.0 }
 0x1b2   :  { %v1215_v54 = vpack.c.bf16 %v1179_v34, %v1178_v63  ;;  %v1307_v44 = vand.u32 2147483647, %v1179_v34  ;;  %v1310_v23 = vand.u32 2147483647, %v1182_v15  ;;  %v1119_v60 = vpop.f32.mrf.mxu3  ;;  %v1023_v20 = vpop.f32.mrf.mxu1 }
 0x1b3   :  { %v1070_v55 = vpop.f32.mrf.mxu2  ;;  %v974_v28 = vpop.f32.mrf.mxu0 }
 0x1b4   :  { %1247 = vst [vmem:[#allocation13 + $0xd8] sm:$0xff] %v1215_v54  ;;  %v1361_v61 = vadd.f32 %v1345_v9, %v1307_v44  ;;  %v1071_v1 = vadd.f32 %v1070_v55, %v4105_v2  ;;  %v1594_v38 = vunpack.c.l.b16 %v1215_v54  ;;  %v1595_v35 = vunpack.c.h.b16 %v1215_v54 }
 0x1b5   :  { %v1346_v56 = vadd.f32 %v4098_v59, %v1310_v23  ;;  %v975_v17 = vadd.f32 %v974_v28, %v4096_v30 }
 0x1b6   :  { %v1120_v24 = vadd.f32 %v1119_v60, %v1071_v1  ;;  %v4208_v63 = vpack.c.b16 %v1594_v38, %v1590_v62  ;;  %v4210_v19 = vpack.c.b16 %v1595_v35, %v1591_v39  ;;  %v2747_v37 = vadd.f32 %v2746_v11, %v1361_v61 }
 0x1b7   :  { %v1024_v5 = vadd.f32 %v1023_v20, %v975_v17 }
 0x1b8   :  { %v1183_v52 = vmax.f32 %v1120_v24, 0.0  ;;  %2124 = vmatmul.bf16.gmra.mxu2 %v4208_v63  ;;  %2173 = vmatmul.bf16.gmra.mxu3 %v4210_v19 }
 0x1b9   :  { %v1186_v6 = vmax.f32 %v1024_v5, 0.0 }
 0x1ba   :  { %v1217_v22 = vpack.c.bf16 %v1183_v52, %v1182_v15  ;;  %v1311_v0 = vand.u32 2147483647, %v1183_v52  ;;  %v2046_v3 = vpop.f32.mrf.mxu1  ;;  %v1121_v8 = vpop.f32.mrf.mxu3 }
 0x1bb   :  { %v1314_v36 = vand.u32 2147483647, %v1186_v6  ;;  %v1072_v9 = vpop.f32.mrf.mxu2  ;;  %v1997_v31 = vpop.f32.mrf.mxu0 }
 0x1bc   :  { %1249 = vst [vmem:[#allocation13 + $0xe8] sm:$0xff] %v1217_v22  ;;  %v1362_v59 = vadd.f32 %v1346_v56, %v1311_v0  ;;  %v1073_v30 = vadd.f32 %v1072_v9, %v4105_v2  ;;  %v1598_v55 = vunpack.c.l.b16 %v1217_v22  ;;  %v1599_v2 = vunpack.c.h.b16 %v1217_v22 }
 0x1bd   :  { %v1347_v11 = vadd.f32 %v4107_v18, %v1314_v36  ;;  %2241 = vmatmul.bf16.vlgmr.msrb.gmra.mxu1 %v3997_v48  ;;  %v2047_v56 = vadd.f32 %v2046_v3, %v1997_v31 }
 0x1be   :  { %v1122_v34 = vadd.f32 %v1121_v8, %v1073_v30  ;;  %v2748_v54 = vadd.f32 %v2747_v37, %v1362_v59  ;;  %2192 = vmatmul.bf16.vlgmr.msrb.gmra.mxu0 %v3995_v47  ;;  %v4233_v37 = vld [vmem:[%s4418_s4] sm:$0x3]  ;;  %s3780_s4 = smov [#allocation13]  }
 0x1bf   :  { %s2778_s29 = sshll.u32 %s3780_s4, 4  ;;  %s2779_s29 = int_to_ptr.vmem [resolvable:$true] %s2778_s29 }
 0x1c0   :  { %v1187_v44 = vmax.f32 %v1122_v34, 0.0 }
 0x1c2   :  { %v1219_v15 = vpack.c.bf16 %v1187_v44, %v1186_v6  ;;  %v1315_v23 = vand.u32 2147483647, %v1187_v44  ;;  %v2048_v62 = vpop.f32.mrf.mxu1 }
 0x1c3   :  { %v1999_v60 = vpop.f32.mrf.mxu0 }
 0x1c4   :  { %1251 = vst [vmem:[#allocation13 + $0xf8] sm:$0xff] %v1219_v15  ;;  %v1602_v39 = vunpack.c.l.b16 %v1219_v15  ;;  %v1603_v61 = vunpack.c.h.b16 %v1219_v15  ;;  %v1363_v1 = vadd.f32 %v1347_v11, %v1315_v23 }
 0x1c5   :  { %2786 = dma.vmem_to_hbm [thread:$0]  %s2779_s29, 4096, %s2781_s10, [#allocation14], %s3773_s13, %s3773_s13, %s3774_s14  }
 0x1c6   :  { %v4218_v28 = vpack.c.b16 %v1602_v39, %v1598_v55  ;;  %v4220_v18 = vpack.c.b16 %v1603_v61, %v1599_v2  ;;  %v4222_v20 = vadd.f32 %v2748_v54, %v1363_v1 }
 0x1c8   :  { %2129 = vmatmul.bf16.gmra.mxu2 %v4218_v28  ;;  %2178 = vmatmul.bf16.gmra.mxu3 %v4220_v18 }
 0x1ca   :  { %v2051_v48 = vpop.f32.mrf.mxu1 }
 0x1cb   :  { %v2002_v47 = vpop.f32.mrf.mxu0 }
 0x1cc   :  { %v2052_v31 = vadd.f32 %v2051_v48, %v2002_v47 }
 0x1cd   :  { %2246 = vmatmul.bf16.gmra.mxu1 %v4013_v49  ;;  %v4236_v49 = vperm.slane %v4233_v37, 0 }
 0x1ce   :  { %2197 = vmatmul.bf16.gmra.mxu0 %v4011_v46 }
 0x1d2   :  { %v2053_v35 = vpop.f32.mrf.mxu1 }
 0x1d3   :  { %v2004_v38 = vpop.f32.mrf.mxu0 }
 0x1d4   :  { %v2054_v44 = vadd.f32 %v2053_v35, %v2004_v38 }
 0x1d8   :  { %2290 = vmatmul.bf16.vlgmr.msrb.gmra.mxu2 %v4124_v53  ;;  %2339 = vmatmul.bf16.vlgmr.msrb.gmra.mxu3 %v4126_v10  ;;  %v2049_v53 = vadd.f32 %v2048_v62, %v1999_v60 }
 0x1da   :  { %v2056_v6 = vpop.f32.mrf.mxu1 }
 0x1db   :  { %v2095_v17 = vpop.f32.mrf.mxu2  ;;  %v2144_v24 = vpop.f32.mrf.mxu3 }
 0x1dc   :  { %v2096_v5 = vadd.f32 %v2095_v17, %v2047_v56  ;;  %v2007_v52 = vpop.f32.mrf.mxu0 }
 0x1dd   :  { %2251 = vmatmul.bf16.gmra.mxu1 %v4029_v50  ;;  %v2057_v39 = vadd.f32 %v2056_v6, %v2007_v52 }
 0x1de   :  { %v2145_v46 = vadd.f32 %v2144_v24, %v2096_v5  ;;  %2202 = vmatmul.bf16.gmra.mxu0 %v4027_v45 }
 0x1e0   :  { %v4241_v10 = vadd.f32 %v4236_v49, %v2145_v46 }
 0x1e2   :  { %2581 = vst [vmem:[#allocation12] sm:$0xff] %v4241_v10  ;;  %v2058_v59 = vpop.f32.mrf.mxu1 }
 0x1e3   :  { %v2097_v22 = vpop.f32.mrf.mxu2  ;;  %v2146_v0 = vpop.f32.mrf.mxu3 }
 0x1e4   :  { %v2098_v36 = vadd.f32 %v2097_v22, %v2049_v53  ;;  %v2009_v9 = vpop.f32.mrf.mxu0 }
 0x1e5   :  { %v2059_v38 = vadd.f32 %v2058_v59, %v2009_v9 }
 0x1e6   :  { %v2147_v30 = vadd.f32 %v2146_v0, %v2098_v36 }
 0x1e8   :  { %2295 = vmatmul.bf16.gmra.mxu2 %v4138_v57  ;;  %2344 = vmatmul.bf16.gmra.mxu3 %v4140_v43  ;;  %v4247_v45 = vadd.f32 %v4236_v49, %v2147_v30 }
 0x1ea   :  { %2583 = vst [vmem:[#allocation12 + $0x10] sm:$0xff] %v4247_v45  ;;  %v2061_v34 = vpop.f32.mrf.mxu1 }
 0x1eb   :  { %v2100_v50 = vpop.f32.mrf.mxu2  ;;  %v2149_v3 = vpop.f32.mrf.mxu3 }
 0x1ec   :  { %v2101_v8 = vadd.f32 %v2100_v50, %v2052_v31  ;;  %v2012_v11 = vpop.f32.mrf.mxu0 }
 0x1ed   :  { %2256 = vmatmul.bf16.gmra.mxu1 %v4045_v51  ;;  %v2062_v52 = vadd.f32 %v2061_v34, %v2012_v11 }
 0x1ee   :  { %v2150_v54 = vadd.f32 %v2149_v3, %v2101_v8  ;;  %2207 = vmatmul.bf16.gmra.mxu0 %v4043_v32 }
 0x1f0   :  { %v4253_v57 = vadd.f32 %v4236_v49, %v2150_v54 }
 0x1f2   :  { %2585 = vst [vmem:[#allocation12 + $0x20] sm:$0xff] %v4253_v57  ;;  %v2063_v60 = vpop.f32.mrf.mxu1 }
 0x1f3   :  { %v2102_v43 = vpop.f32.mrf.mxu2  ;;  %v2151_v15 = vpop.f32.mrf.mxu3 }
 0x1f4   :  { %v2103_v23 = vadd.f32 %v2102_v43, %v2054_v44  ;;  %v2014_v55 = vpop.f32.mrf.mxu0 }
 0x1f5   :  { %v2064_v36 = vadd.f32 %v2063_v60, %v2014_v55 }
 0x1f6   :  { %v2152_v62 = vadd.f32 %v2151_v15, %v2103_v23 }
 0x1f8   :  { %2300 = vmatmul.bf16.gmra.mxu2 %v4152_v14  ;;  %2349 = vmatmul.bf16.gmra.mxu3 %v4154_v33  ;;  %v4259_v32 = vadd.f32 %v4236_v49, %v2152_v62 }
 0x1fa   :  { %2587 = vst [vmem:[#allocation12 + $0x30] sm:$0xff] %v4259_v32  ;;  %v2066_v47 = vpop.f32.mrf.mxu1 }
 0x1fb   :  { %v2105_v51 = vpop.f32.mrf.mxu2  ;;  %v2154_v2 = vpop.f32.mrf.mxu3 }
 0x1fc   :  { %v2106_v61 = vadd.f32 %v2105_v51, %v2057_v39  ;;  %v2017_v1 = vpop.f32.mrf.mxu0 }
 0x1fd   :  { %2261 = vmatmul.bf16.gmra.mxu1 %v4061_v7  ;;  %v2067_v3 = vadd.f32 %v2066_v47, %v2017_v1 }
 0x1fe   :  { %v2155_v48 = vadd.f32 %v2154_v2, %v2106_v61  ;;  %2212 = vmatmul.bf16.gmra.mxu0 %v4059_v4 }
 0x200   :  { %v4265_v14 = vadd.f32 %v4236_v49, %v2155_v48 }
 0x202   :  { %2589 = vst [vmem:[#allocation12 + $0x40] sm:$0xff] %v4265_v14  ;;  %v2068_v24 = vpop.f32.mrf.mxu1 }
 0x203   :  { %v2107_v33 = vpop.f32.mrf.mxu2  ;;  %v2156_v35 = vpop.f32.mrf.mxu3 }
 0x204   :  { %v2108_v56 = vadd.f32 %v2107_v33, %v2059_v38  ;;  %v2019_v17 = vpop.f32.mrf.mxu0 }
 0x205   :  { %v2069_v43 = vadd.f32 %v2068_v24, %v2019_v17 }
 0x206   :  { %v2157_v5 = vadd.f32 %v2156_v35, %v2108_v56 }
 0x208   :  { %2305 = vmatmul.bf16.gmra.mxu2 %v4166_v42  ;;  %2354 = vmatmul.bf16.gmra.mxu3 %v4168_v40  ;;  %v4271_v4 = vadd.f32 %v4236_v49, %v2157_v5 }
 0x20a   :  { %2591 = vst [vmem:[#allocation12 + $0x50] sm:$0xff] %v4271_v4  ;;  %v2071_v22 = vpop.f32.mrf.mxu1 }
 0x20b   :  { %v2110_v7 = vpop.f32.mrf.mxu2  ;;  %v2159_v6 = vpop.f32.mrf.mxu3 }
 0x20c   :  { %v2111_v46 = vadd.f32 %v2110_v7, %v2062_v52  ;;  %v2022_v53 = vpop.f32.mrf.mxu0 }
 0x20d   :  { %2266 = vmatmul.bf16.gmra.mxu1 %v4077_v25  ;;  %v2072_v39 = vadd.f32 %v2071_v22, %v2022_v53 }
 0x20e   :  { %v2160_v0 = vadd.f32 %v2159_v6, %v2111_v46  ;;  %2217 = vmatmul.bf16.gmra.mxu0 %v4075_v16 }
 0x210   :  { %v4277_v42 = vadd.f32 %v4236_v49, %v2160_v0 }
 0x212   :  { %2593 = vst [vmem:[#allocation12 + $0x60] sm:$0xff] %v4277_v42  ;;  %v2073_v31 = vpop.f32.mrf.mxu1 }
 0x213   :  { %v2112_v40 = vpop.f32.mrf.mxu2  ;;  %v2161_v9 = vpop.f32.mrf.mxu3 }
 0x214   :  { %v2113_v59 = vadd.f32 %v2112_v40, %v2064_v36  ;;  %v2024_v30 = vpop.f32.mrf.mxu0 }
 0x215   :  { %v2074_v48 = vadd.f32 %v2073_v31, %v2024_v30 }
 0x216   :  { %v2162_v50 = vadd.f32 %v2161_v9, %v2113_v59 }
 0x218   :  { %2310 = vmatmul.bf16.gmra.mxu2 %v4180_v29  ;;  %2359 = vmatmul.bf16.gmra.mxu3 %v4182_v41  ;;  %v4283_v16 = vadd.f32 %v4236_v49, %v2162_v50 }
 0x21a   :  { %2595 = vst [vmem:[#allocation12 + $0x70] sm:$0xff] %v4283_v16  ;;  %v2076_v54 = vpop.f32.mrf.mxu1 }
 0x21b   :  { %v2115_v25 = vpop.f32.mrf.mxu2  ;;  %v2164_v8 = vpop.f32.mrf.mxu3 }
 0x21c   :  { %v2116_v11 = vadd.f32 %v2115_v25, %v2067_v3  ;;  %v2027_v34 = vpop.f32.mrf.mxu0 }
 0x21d   :  { %2271 = vmatmul.bf16.gmra.mxu1 %v4093_v13  ;;  %v2077_v24 = vadd.f32 %v2076_v54, %v2027_v34 }
 0x21e   :  { %v2165_v44 = vadd.f32 %v2164_v8, %v2116_v11  ;;  %2222 = vmatmul.bf16.gmra.mxu0 %v4091_v27 }
 0x220   :  { %v4289_v29 = vadd.f32 %v4236_v49, %v2165_v44 }
 0x222   :  { %2597 = vst [vmem:[#allocation12 + $0x80] sm:$0xff] %v4289_v29  ;;  %v2078_v60 = vpop.f32.mrf.mxu1 }
 0x223   :  { %v2117_v41 = vpop.f32.mrf.mxu2  ;;  %v2166_v15 = vpop.f32.mrf.mxu3 }
 0x224   :  { %v2118_v23 = vadd.f32 %v2117_v41, %v2069_v43  ;;  %v2029_v55 = vpop.f32.mrf.mxu0 }
 0x225   :  { %v2079_v53 = vadd.f32 %v2078_v60, %v2029_v55  ;;  %v2447_v60 = vld [vmem:[#allocation4] sm:$0xff] }
 0x226   :  { %v2167_v62 = vadd.f32 %v2166_v15, %v2118_v23 }
 0x228   :  { %2315 = vmatmul.bf16.gmra.mxu2 %v4194_v26  ;;  %2364 = vmatmul.bf16.gmra.mxu3 %v4196_v12  ;;  %v4295_v27 = vadd.f32 %v4236_v49, %v2167_v62 }
 0x22a   :  { %2599 = vst [vmem:[#allocation12 + $0x90] sm:$0xff] %v4295_v27  ;;  %v2081_v1 = vpop.f32.mrf.mxu1 }
 0x22b   :  { %v2120_v13 = vpop.f32.mrf.mxu2  ;;  %v2169_v51 = vpop.f32.mrf.mxu3 }
 0x22c   :  { %v2121_v2 = vadd.f32 %v2120_v13, %v2072_v39  ;;  %v2032_v61 = vpop.f32.mrf.mxu0 }
 0x22d   :  { %2276 = vmatmul.bf16.gmra.mxu1 %v4114_v21  ;;  %v2082_v59 = vadd.f32 %v2081_v1, %v2032_v61  ;;  %v2448_v61 = vld [vmem:[#allocation4 + $0x8] sm:$0xff]  ;;  %v2485_v1 = vsub.f32 %v2447_v60, %v4236_v49 }
 0x22e   :  { %v2170_v47 = vadd.f32 %v2169_v51, %v2121_v2  ;;  %2227 = vmatmul.bf16.gmra.mxu0 %v4112_v58  ;;  %v4328_v51 = vperm.slane %v4233_v37, 1  ;;  %v2449_v2 = vld [vmem:[#allocation4 + $0x10] sm:$0xff] }
 0x230   :  { %v4301_v26 = vadd.f32 %v4236_v49, %v2170_v47 }
 0x232   :  { %2601 = vst [vmem:[#allocation12 + $0xa0] sm:$0xff] %v4301_v26  ;;  %v2083_v56 = vpop.f32.mrf.mxu1 }
 0x233   :  { %v2122_v12 = vpop.f32.mrf.mxu2  ;;  %v2171_v38 = vpop.f32.mrf.mxu3 }
 0x234   :  { %v2123_v33 = vadd.f32 %v2122_v12, %v2074_v48  ;;  %v2034_v35 = vpop.f32.mrf.mxu0  ;;  %v2487_v48 = vsub.f32 %v2449_v2, %v4236_v49  ;;  %v2486_v12 = vsub.f32 %v2448_v61, %v4328_v51 }
 0x235   :  { %v2084_v34 = vadd.f32 %v2083_v56, %v2034_v35  ;;  %v2613_v35 = vsub.f32 %v4241_v10, %v2485_v1 }
 0x236   :  { %v2172_v17 = vadd.f32 %v2171_v38, %v2123_v33 }
 0x238   :  { %2320 = vmatmul.bf16.gmra.mxu2 %v4208_v63  ;;  %2369 = vmatmul.bf16.gmra.mxu3 %v4210_v19  ;;  %v4307_v58 = vadd.f32 %v4236_v49, %v2172_v17 }
 0x23a   :  { %2603 = vst [vmem:[#allocation12 + $0xb0] sm:$0xff] %v4307_v58  ;;  %v2242_v6 = vpop.f32.mrf.mxu1 }
 0x23b   :  { %v2125_v21 = vpop.f32.mrf.mxu2  ;;  %v2174_v5 = vpop.f32.mrf.mxu3 }
 0x23c   :  { %v2126_v52 = vadd.f32 %v2125_v21, %v2077_v24  ;;  %v2193_v7 = vpop.f32.mrf.mxu0  ;;  %v2615_v21 = vsub.f32 %v4247_v45, %v2487_v48 }
 0x23d   :  { %v2243_v23 = vadd.f32 %v2242_v6, %v2193_v7  ;;  %v2450_v6 = vld [vmem:[#allocation4 + $0x18] sm:$0xff] }
 0x23e   :  { %v2175_v46 = vadd.f32 %v2174_v5, %v2126_v52  ;;  %v2451_v5 = vld [vmem:[#allocation4 + $0x20] sm:$0xff]  ;;  %v2488_v10 = vsub.f32 %v2450_v6, %v4328_v51 }
 0x240   :  { %v4311_v22 = vadd.f32 %v4236_v49, %v2175_v46  ;;  %v2645_v46 = vmul.f32 %v2613_v35, %v2613_v35 }
 0x242   :  { %2605 = vst [vmem:[#allocation12 + $0xc0] sm:$0xff] %v4311_v22  ;;  %v2244_v40 = vpop.f32.mrf.mxu1 }
 0x243   :  { %v2127_v0 = vpop.f32.mrf.mxu2  ;;  %v2176_v63 = vpop.f32.mrf.mxu3 }
 0x244   :  { %v2128_v19 = vadd.f32 %v2127_v0, %v2079_v53  ;;  %v2195_v36 = vpop.f32.mrf.mxu0 }
 0x245   :  { %v2245_v56 = vadd.f32 %v2244_v40, %v2195_v36 }
 0x246   :  { %v2177_v9 = vadd.f32 %v2176_v63, %v2128_v19  ;;  %v2489_v63 = vsub.f32 %v2451_v5, %v4236_v49  ;;  %v2647_v19 = vmul.f32 %v2615_v21, %v2615_v21 }
 0x248   :  { %2325 = vmatmul.bf16.gmra.mxu2 %v4218_v28  ;;  %2374 = vmatmul.bf16.gmra.mxu3 %v4220_v18  ;;  %v4317_v30 = vadd.f32 %v4236_v49, %v2177_v9 }
 0x24a   :  { %2607 = vst [vmem:[#allocation12 + $0xd0] sm:$0xff] %v4317_v30  ;;  %v2247_v8 = vpop.f32.mrf.mxu1 }
 0x24b   :  { %v2130_v31 = vpop.f32.mrf.mxu2  ;;  %v2179_v50 = vpop.f32.mrf.mxu3 }
 0x24c   :  { %v2131_v3 = vadd.f32 %v2130_v31, %v2082_v59  ;;  %v2198_v25 = vpop.f32.mrf.mxu0 }
 0x24d   :  { %v2248_v36 = vadd.f32 %v2247_v8, %v2198_v25 }
 0x24e   :  { %v2180_v11 = vadd.f32 %v2179_v50, %v2131_v3 }
 0x250   :  { %v4321_v54 = vadd.f32 %v4236_v49, %v2180_v11  ;;  %v2617_v11 = vsub.f32 %v4253_v57, %v2489_v63 }
 0x252   :  { %2609 = vst [vmem:[#allocation12 + $0xe0] sm:$0xff] %v4321_v54  ;;  %v2249_v15 = vpop.f32.mrf.mxu1 }
 0x253   :  { %v2132_v44 = vpop.f32.mrf.mxu2  ;;  %v2181_v28 = vpop.f32.mrf.mxu3 }
 0x254   :  { %v2133_v43 = vadd.f32 %v2132_v44, %v2084_v34  ;;  %v2200_v41 = vpop.f32.mrf.mxu0  ;;  %v2453_v34 = vld [vmem:[#allocation4 + $0x30] sm:$0xff] }
 0x255   :  { %v2491_v60 = vsub.f32 %v2453_v34, %v4236_v49 }
 0x256   :  { %v2182_v18 = vadd.f32 %v2181_v28, %v2133_v43  ;;  %v2452_v43 = vld [vmem:[#allocation4 + $0x28] sm:$0xff] }
 0x257   :  { %v2490_v8 = vsub.f32 %v2452_v43, %v4328_v51  ;;  %v2619_v57 = vsub.f32 %v4259_v32, %v2491_v60 }
 0x258   :  { %v4325_v55 = vadd.f32 %v4236_v49, %v2182_v18 }
 0x259   :  { %v2651_v5 = vmul.f32 %v2619_v57, %v2619_v57 }
 0x25a   :  { %2611 = vst [vmem:[#allocation12 + $0xf0] sm:$0xff] %v4325_v55  ;;  %v2252_v33 = vpop.f32.mrf.mxu1 }
 0x25b   :  { %v2291_v62 = vpop.f32.mrf.mxu2  ;;  %v2340_v39 = vpop.f32.mrf.mxu3 }
 0x25c   :  { %v2292_v13 = vadd.f32 %v2291_v62, %v2243_v23  ;;  %v2203_v38 = vpop.f32.mrf.mxu0  ;;  %v2649_v62 = vmul.f32 %v2617_v11, %v2617_v11 }
 0x25e   :  { %v2341_v47 = vadd.f32 %v2340_v39, %v2292_v13  ;;  %v2250_v39 = vadd.f32 %v2249_v15, %v2200_v41 }
 0x260   :  { %v2550_v17 = vadd.f32 %v4328_v51, %v2341_v47  ;;  %v2455_v47 = vld [vmem:[#allocation4 + $0x40] sm:$0xff] }
 0x261   :  { %v2493_v21 = vsub.f32 %v2455_v47, %v4236_v49 }
 0x262   :  { %2582 = vst [vmem:[#allocation12 + $0x8] sm:$0xff] %v2550_v17  ;;  %v2614_v52 = vsub.f32 %v2550_v17, %v2486_v12  ;;  %v2254_v45 = vpop.f32.mrf.mxu1  ;;  %v2454_v17 = vld [vmem:[#allocation4 + $0x38] sm:$0xff] }
 0x263   :  { %v2293_v37 = vpop.f32.mrf.mxu2  ;;  %v2342_v24 = vpop.f32.mrf.mxu3  ;;  %v2492_v15 = vsub.f32 %v2454_v17, %v4328_v51  ;;  %v2461_v17 = vld [vmem:[#allocation4 + $0x70] sm:$0xff] }
 0x264   :  { %v2294_v7 = vadd.f32 %v2293_v37, %v2245_v56  ;;  %v2646_v53 = vmul.f32 %v2614_v52, %v2614_v52  ;;  %v2205_v31 = vpop.f32.mrf.mxu0  ;;  %v2253_v52 = vadd.f32 %v2252_v33, %v2203_v38 }
 0x265   :  { %v2255_v11 = vadd.f32 %v2254_v45, %v2205_v31 }
 0x266   :  { %v2343_v0 = vadd.f32 %v2342_v24, %v2294_v7  ;;  %v2677_v9 = vadd.f32 %v2646_v53, %v2645_v46  ;;  %v2621_v53 = vsub.f32 %v4265_v14, %v2493_v21  ;;  %v2460_v21 = vld [vmem:[#allocation4 + $0x68] sm:$0xff] }
 0x268   :  { %v2552_v40 = vadd.f32 %v4328_v51, %v2343_v0  ;;  %v2678_v59 = vadd.f32 %v2677_v9, %v2647_v19  ;;  %v2457_v0 = vld [vmem:[#allocation4 + $0x50] sm:$0xff]  ;;  %v2456_v9 = vld [vmem:[#allocation4 + $0x48] sm:$0xff] }
 0x269   :  { %v2494_v33 = vsub.f32 %v2456_v9, %v4328_v51 }
 0x26a   :  { %2584 = vst [vmem:[#allocation12 + $0x18] sm:$0xff] %v2552_v40  ;;  %v2616_v44 = vsub.f32 %v2552_v40, %v2488_v10  ;;  %v2257_v35 = vpop.f32.mrf.mxu1 }
 0x26b   :  { %v2296_v50 = vpop.f32.mrf.mxu2  ;;  %v2345_v3 = vpop.f32.mrf.mxu3 }
 0x26c   :  { %v2297_v28 = vadd.f32 %v2296_v50, %v2248_v36  ;;  %v2648_v18 = vmul.f32 %v2616_v44, %v2616_v44  ;;  %v2208_v12 = vpop.f32.mrf.mxu0  ;;  %v2495_v50 = vsub.f32 %v2457_v0, %v4236_v49 }
 0x26e   :  { %v2346_v23 = vadd.f32 %v2345_v3, %v2297_v28  ;;  %v2679_v25 = vadd.f32 %v2678_v59, %v2648_v18  ;;  %v2653_v3 = vmul.f32 %v2621_v53, %v2621_v53  ;;  %v2623_v43 = vsub.f32 %v4271_v4, %v2495_v50  ;;  %v2459_v18 = vld [vmem:[#allocation4 + $0x60] sm:$0xff] }
 0x270   :  { %v2554_v13 = vadd.f32 %v4328_v51, %v2346_v23  ;;  %v2680_v2 = vadd.f32 %v2679_v25, %v2649_v62  ;;  %v2458_v62 = vld [vmem:[#allocation4 + $0x58] sm:$0xff] }
 0x271   :  { %v2496_v45 = vsub.f32 %v2458_v62, %v4328_v51 }
 0x272   :  { %2586 = vst [vmem:[#allocation12 + $0x28] sm:$0xff] %v2554_v13  ;;  %v2618_v48 = vsub.f32 %v2554_v13, %v2490_v8  ;;  %v2259_v40 = vpop.f32.mrf.mxu1  ;;  %v2655_v13 = vmul.f32 %v2623_v43, %v2623_v43  ;;  %v2465_v43 = vld [vmem:[#allocation4 + $0x90] sm:$0xff] }
 0x273   :  { %v2298_v61 = vpop.f32.mrf.mxu2  ;;  %v2347_v1 = vpop.f32.mrf.mxu3 }
 0x274   :  { %v2299_v56 = vadd.f32 %v2298_v61, %v2250_v39  ;;  %v2650_v37 = vmul.f32 %v2618_v48, %v2618_v48  ;;  %v2210_v36 = vpop.f32.mrf.mxu0  ;;  %v2497_v39 = vsub.f32 %v2459_v18, %v4236_v49 }
 0x276   :  { %v2348_v24 = vadd.f32 %v2347_v1, %v2299_v56  ;;  %v2681_v41 = vadd.f32 %v2680_v2, %v2650_v37  ;;  %v2258_v1 = vadd.f32 %v2257_v35, %v2208_v12  ;;  %v2625_v56 = vsub.f32 %v4277_v42, %v2497_v39 }
 0x277   :  { %v2498_v12 = vsub.f32 %v2460_v21, %v4328_v51  ;;  %v2260_v35 = vadd.f32 %v2259_v40, %v2210_v36 }
 0x278   :  { %v2556_v7 = vadd.f32 %v4328_v51, %v2348_v24  ;;  %v2682_v6 = vadd.f32 %v2681_v41, %v2651_v5 }
 0x27a   :  { %2588 = vst [vmem:[#allocation12 + $0x38] sm:$0xff] %v2556_v7  ;;  %v2620_v63 = vsub.f32 %v2556_v7, %v2492_v15  ;;  %v2262_v31 = vpop.f32.mrf.mxu1  ;;  %v2499_v15 = vsub.f32 %v2461_v17, %v4236_v49 }
 0x27b   :  { %v2301_v32 = vpop.f32.mrf.mxu2  ;;  %v2350_v46 = vpop.f32.mrf.mxu3 }
 0x27c   :  { %v2302_v19 = vadd.f32 %v2301_v32, %v2253_v52  ;;  %v2652_v10 = vmul.f32 %v2620_v63, %v2620_v63  ;;  %v2213_v61 = vpop.f32.mrf.mxu0  ;;  %v2657_v52 = vmul.f32 %v2625_v56, %v2625_v56  ;;  %v2627_v63 = vsub.f32 %v4283_v16, %v2499_v15 }
 0x27e   :  { %v2351_v59 = vadd.f32 %v2350_v46, %v2302_v19  ;;  %v2683_v38 = vadd.f32 %v2682_v6, %v2652_v10  ;;  %v2463_v19 = vld [vmem:[#allocation4 + $0x80] sm:$0xff] }
 0x280   :  { %v2558_v34 = vadd.f32 %v4328_v51, %v2351_v59  ;;  %v2684_v44 = vadd.f32 %v2683_v38, %v2653_v3  ;;  %v2462_v59 = vld [vmem:[#allocation4 + $0x78] sm:$0xff]  ;;  %v2501_v38 = vsub.f32 %v2463_v19, %v4236_v49  ;;  %v2468_v19 = vld [vmem:[#allocation4 + $0xa8] sm:$0xff] }
 0x281   :  { %v2500_v40 = vsub.f32 %v2462_v59, %v4328_v51 }
 0x282   :  { %2590 = vst [vmem:[#allocation12 + $0x48] sm:$0xff] %v2558_v34  ;;  %v2622_v23 = vsub.f32 %v2558_v34, %v2494_v33  ;;  %v2264_v32 = vpop.f32.mrf.mxu1  ;;  %v2659_v33 = vmul.f32 %v2627_v63, %v2627_v63  ;;  %v2629_v16 = vsub.f32 %v4289_v29, %v2501_v38 }
 0x283   :  { %v2303_v14 = vpop.f32.mrf.mxu2  ;;  %v2352_v28 = vpop.f32.mrf.mxu3 }
 0x284   :  { %v2304_v60 = vadd.f32 %v2303_v14, %v2255_v11  ;;  %v2654_v25 = vmul.f32 %v2622_v23, %v2622_v23  ;;  %v2215_v6 = vpop.f32.mrf.mxu0  ;;  %v2263_v11 = vadd.f32 %v2262_v31, %v2213_v61 }
 0x286   :  { %v2353_v8 = vadd.f32 %v2352_v28, %v2304_v60  ;;  %v2685_v2 = vadd.f32 %v2684_v44, %v2654_v25  ;;  %v2464_v25 = vld [vmem:[#allocation4 + $0x88] sm:$0xff] }
 0x287   :  { %v2502_v31 = vsub.f32 %v2464_v25, %v4328_v51 }
 0x288   :  { %v2560_v57 = vadd.f32 %v4328_v51, %v2353_v8  ;;  %v2686_v47 = vadd.f32 %v2685_v2, %v2655_v13  ;;  %v2503_v13 = vsub.f32 %v2465_v43, %v4236_v49  ;;  %v2661_v2 = vmul.f32 %v2629_v16, %v2629_v16  ;;  %v2471_v43 = vld [vmem:[#allocation4 + $0xc0] sm:$0xff] }
 0x28a   :  { %2592 = vst [vmem:[#allocation12 + $0x58] sm:$0xff] %v2560_v57  ;;  %v2624_v37 = vsub.f32 %v2560_v57, %v2496_v45  ;;  %v2267_v23 = vpop.f32.mrf.mxu1  ;;  %v2265_v45 = vadd.f32 %v2264_v32, %v2215_v6 }
 0x28b   :  { %v2306_v4 = vpop.f32.mrf.mxu2  ;;  %v2355_v48 = vpop.f32.mrf.mxu3 }
 0x28c   :  { %v2307_v24 = vadd.f32 %v2306_v4, %v2258_v1  ;;  %v2656_v5 = vmul.f32 %v2624_v37, %v2624_v37  ;;  %v2218_v18 = vpop.f32.mrf.mxu0  ;;  %v2631_v4 = vsub.f32 %v4295_v27, %v2503_v13  ;;  %v2466_v37 = vld [vmem:[#allocation4 + $0x98] sm:$0xff] }
 0x28e   :  { %v2356_v41 = vadd.f32 %v2355_v48, %v2307_v24  ;;  %v2687_v7 = vadd.f32 %v2686_v47, %v2656_v5  ;;  %v2467_v48 = vld [vmem:[#allocation4 + $0xa0] sm:$0xff] }
 0x28f   :  { %v2505_v15 = vsub.f32 %v2467_v48, %v4236_v49  ;;  %v2472_v48 = vld [vmem:[#allocation4 + $0xc8] sm:$0xff] }
 0x290   :  { %v2562_v46 = vadd.f32 %v4328_v51, %v2356_v41  ;;  %v2688_v53 = vadd.f32 %v2687_v7, %v2657_v52  ;;  %v2663_v52 = vmul.f32 %v2631_v4, %v2631_v4 }
 0x292   :  { %2594 = vst [vmem:[#allocation12 + $0x68] sm:$0xff] %v2562_v46  ;;  %v2626_v9 = vsub.f32 %v2562_v46, %v2498_v12  ;;  %v2269_v21 = vpop.f32.mrf.mxu1  ;;  %v2504_v12 = vsub.f32 %v2466_v37, %v4328_v51 }
 0x293   :  { %v2308_v42 = vpop.f32.mrf.mxu2  ;;  %v2357_v0 = vpop.f32.mrf.mxu3 }
 0x294   :  { %v2309_v10 = vadd.f32 %v2308_v42, %v2260_v35  ;;  %v2658_v50 = vmul.f32 %v2626_v9, %v2626_v9  ;;  %v2220_v24 = vpop.f32.mrf.mxu0  ;;  %v2268_v35 = vadd.f32 %v2267_v23, %v2218_v18  ;;  %v2469_v42 = vld [vmem:[#allocation4 + $0xb0] sm:$0xff]  ;;  %v2470_v18 = vld [vmem:[#allocation4 + $0xb8] sm:$0xff] }
 0x295   :  { %v2507_v59 = vsub.f32 %v2469_v42, %v4236_v49 }
 0x296   :  { %v2358_v3 = vadd.f32 %v2357_v0, %v2309_v10  ;;  %v2689_v36 = vadd.f32 %v2688_v53, %v2658_v50  ;;  %v2633_v53 = vsub.f32 %v4301_v26, %v2505_v15 }
 0x298   :  { %v2564_v34 = vadd.f32 %v4328_v51, %v2358_v3  ;;  %v2690_v44 = vadd.f32 %v2689_v36, %v2659_v33  ;;  %v2665_v50 = vmul.f32 %v2633_v53, %v2633_v53  ;;  %v2506_v36 = vsub.f32 %v2468_v19, %v4328_v51  ;;  %v2474_v53 = vld [vmem:[#allocation4 + $0xd8] sm:$0xff] }
 0x299   :  { %v2512_v19 = vsub.f32 %v2474_v53, %v4328_v51 }
 0x29a   :  { %2596 = vst [vmem:[#allocation12 + $0x78] sm:$0xff] %v2564_v34  ;;  %v2628_v60 = vsub.f32 %v2564_v34, %v2500_v40  ;;  %v2272_v38 = vpop.f32.mrf.mxu1  ;;  %v2270_v40 = vadd.f32 %v2269_v21, %v2220_v24  ;;  %v2510_v24 = vsub.f32 %v2472_v48, %v4328_v51 }
 0x29b   :  { %v2311_v14 = vpop.f32.mrf.mxu2  ;;  %v2360_v28 = vpop.f32.mrf.mxu3 }
 0x29c   :  { %v2312_v62 = vadd.f32 %v2311_v14, %v2263_v11  ;;  %v2660_v8 = vmul.f32 %v2628_v60, %v2628_v60  ;;  %v2223_v3 = vpop.f32.mrf.mxu0  ;;  %v2635_v14 = vsub.f32 %v4307_v58, %v2507_v59 }
 0x29d   :  { %v2273_v13 = vadd.f32 %v2272_v38, %v2223_v3 }
 0x29e   :  { %v2361_v39 = vadd.f32 %v2360_v28, %v2312_v62  ;;  %v2691_v61 = vadd.f32 %v2690_v44, %v2660_v8  ;;  %v2509_v62 = vsub.f32 %v2471_v43, %v4236_v49  ;;  %v2667_v25 = vmul.f32 %v2635_v14, %v2635_v14 }
 0x29f   :  { %v2508_v8 = vsub.f32 %v2470_v18, %v4328_v51 }
 0x2a0   :  { %v2566_v1 = vadd.f32 %v4328_v51, %v2361_v39  ;;  %v2692_v57 = vadd.f32 %v2691_v61, %v2661_v2  ;;  %v2637_v4 = vsub.f32 %v4311_v22, %v2509_v62 }
 0x2a2   :  { %2598 = vst [vmem:[#allocation12 + $0x88] sm:$0xff] %v2566_v1  ;;  %v2630_v56 = vsub.f32 %v2566_v1, %v2502_v31  ;;  %v2274_v61 = vpop.f32.mrf.mxu1  ;;  %v2669_v21 = vmul.f32 %v2637_v4, %v2637_v4 }
 0x2a3   :  { %v2313_v29 = vpop.f32.mrf.mxu2  ;;  %v2362_v47 = vpop.f32.mrf.mxu3 }
 0x2a4   :  { %v2314_v17 = vadd.f32 %v2313_v29, %v2265_v45  ;;  %v2662_v5 = vmul.f32 %v2630_v56, %v2630_v56  ;;  %v2225_v2 = vpop.f32.mrf.mxu0  ;;  %v2473_v29 = vld [vmem:[#allocation4 + $0xd0] sm:$0xff] }
 0x2a5   :  { %v2511_v37 = vsub.f32 %v2473_v29, %v4236_v49 }
 0x2a6   :  { %v2363_v41 = vadd.f32 %v2362_v47, %v2314_v17  ;;  %v2693_v7 = vadd.f32 %v2692_v57, %v2662_v5 }
 0x2a7   :  { %v2639_v22 = vsub.f32 %v4317_v30, %v2511_v37  ;;  %v2477_v30 = vld [vmem:[#allocation4 + $0xf0] sm:$0xff] }
 0x2a8   :  { %v2568_v6 = vadd.f32 %v4328_v51, %v2363_v41  ;;  %v2694_v32 = vadd.f32 %v2693_v7, %v2663_v52  ;;  %v2275_v41 = vadd.f32 %v2274_v61, %v2225_v2  ;;  %v2478_v61 = vld [vmem:[#allocation4 + $0xf8] sm:$0xff] }
 0x2aa   :  { %2600 = vst [vmem:[#allocation12 + $0x98] sm:$0xff] %v2568_v6  ;;  %v2632_v0 = vsub.f32 %v2568_v6, %v2504_v12  ;;  %v2475_v6 = vld [vmem:[#allocation4 + $0xe0] sm:$0xff] }
 0x2ab   :  { %v2316_v27 = vpop.f32.mrf.mxu2  ;;  %v2365_v46 = vpop.f32.mrf.mxu3 }
 0x2ac   :  { %v2317_v63 = vadd.f32 %v2316_v27, %v2268_v35  ;;  %v2664_v9 = vmul.f32 %v2632_v0, %v2632_v0  ;;  %v2228_v27 = vpop.f32.mrf.mxu0 }
 0x2ae   :  { %v2366_v10 = vadd.f32 %v2365_v46, %v2317_v63  ;;  %v2695_v33 = vadd.f32 %v2694_v32, %v2664_v9  ;;  %v2277_v46 = vpop.f32.mrf.mxu1  ;;  %v2513_v63 = vsub.f32 %v2475_v6, %v4236_v49  ;;  %v2671_v9 = vmul.f32 %v2639_v22, %v2639_v22 }
 0x2af   :  { %v2278_v59 = vadd.f32 %v2277_v46, %v2228_v27 }
 0x2b0   :  { %v2570_v11 = vadd.f32 %v4328_v51, %v2366_v10  ;;  %v2696_v34 = vadd.f32 %v2695_v33, %v2665_v50 }
 0x2b2   :  { %2602 = vst [vmem:[#allocation12 + $0xa8] sm:$0xff] %v2570_v11  ;;  %v2634_v28 = vsub.f32 %v2570_v11, %v2506_v36  ;;  %v2641_v11 = vsub.f32 %v4321_v54, %v2513_v63 }
 0x2b3   :  { %v2318_v26 = vpop.f32.mrf.mxu2  ;;  %v2367_v44 = vpop.f32.mrf.mxu3 }
 0x2b4   :  { %v2319_v16 = vadd.f32 %v2318_v26, %v2270_v40  ;;  %v2666_v23 = vmul.f32 %v2634_v28, %v2634_v28  ;;  %v2230_v14 = vpop.f32.mrf.mxu0  ;;  %v2673_v18 = vmul.f32 %v2641_v11, %v2641_v11 }
 0x2b6   :  { %v2368_v60 = vadd.f32 %v2367_v44, %v2319_v16  ;;  %v2697_v39 = vadd.f32 %v2696_v34, %v2666_v23  ;;  %v2476_v34 = vld [vmem:[#allocation4 + $0xe8] sm:$0xff]  ;;  %v2279_v28 = vpop.f32.mrf.mxu1  ;;  %v2515_v16 = vsub.f32 %v2477_v30, %v4236_v49  ;;  %v2516_v49 = vsub.f32 %v2478_v61, %v4328_v51 }
 0x2b7   :  { %v2514_v43 = vsub.f32 %v2476_v34, %v4328_v51 }
 0x2b8   :  { %v2572_v31 = vadd.f32 %v4328_v51, %v2368_v60  ;;  %v2698_v45 = vadd.f32 %v2697_v39, %v2667_v25  ;;  %v2280_v60 = vadd.f32 %v2279_v28, %v2230_v14  ;;  %v2643_v54 = vsub.f32 %v4325_v55, %v2515_v16 }
 0x2ba   :  { %2604 = vst [vmem:[#allocation12 + $0xb8] sm:$0xff] %v2572_v31  ;;  %v2636_v47 = vsub.f32 %v2572_v31, %v2508_v8 }
 0x2bb   :  { %v2321_v58 = vpop.f32.mrf.mxu2  ;;  %v2370_v1 = vpop.f32.mrf.mxu3 }
 0x2bc   :  { %v2322_v57 = vadd.f32 %v2321_v58, %v2273_v13  ;;  %v2668_v17 = vmul.f32 %v2636_v47, %v2636_v47  ;;  %v2675_v58 = vmul.f32 %v2643_v54, %v2643_v54 }
 0x2be   :  { %v2371_v56 = vadd.f32 %v2370_v1, %v2322_v57  ;;  %v2699_v5 = vadd.f32 %v2698_v45, %v2668_v17 }
 0x2c0   :  { %v2574_v15 = vadd.f32 %v4328_v51, %v2371_v56  ;;  %v2700_v52 = vadd.f32 %v2699_v5, %v2669_v21 }
 0x2c2   :  { %2606 = vst [vmem:[#allocation12 + $0xc8] sm:$0xff] %v2574_v15  ;;  %v2638_v32 = vsub.f32 %v2574_v15, %v2510_v24 }
 0x2c3   :  { %v2323_v7 = vpop.f32.mrf.mxu2  ;;  %v2372_v12 = vpop.f32.mrf.mxu3 }
 0x2c4   :  { %v2324_v35 = vadd.f32 %v2323_v7, %v2275_v41  ;;  %v2670_v0 = vmul.f32 %v2638_v32, %v2638_v32 }
 0x2c6   :  { %v2373_v42 = vadd.f32 %v2372_v12, %v2324_v35  ;;  %v2701_v10 = vadd.f32 %v2700_v52, %v2670_v0 }
 0x2c8   :  { %v2576_v50 = vadd.f32 %v4328_v51, %v2373_v42  ;;  %v2702_v3 = vadd.f32 %v2701_v10, %v2671_v9 }
 0x2ca   :  { %2608 = vst [vmem:[#allocation12 + $0xd8] sm:$0xff] %v2576_v50  ;;  %v2640_v40 = vsub.f32 %v2576_v50, %v2512_v19 }
 0x2cb   :  { %v2326_v38 = vpop.f32.mrf.mxu2  ;;  %v2375_v33 = vpop.f32.mrf.mxu3 }
 0x2cc   :  { %v2327_v36 = vadd.f32 %v2326_v38, %v2278_v59  ;;  %v2672_v44 = vmul.f32 %v2640_v40, %v2640_v40 }
 0x2ce   :  { %v2376_v26 = vadd.f32 %v2375_v33, %v2327_v36  ;;  %v2703_v23 = vadd.f32 %v2702_v3, %v2672_v44 }
 0x2d0   :  { %v2578_v62 = vadd.f32 %v4328_v51, %v2376_v26  ;;  %v2704_v25 = vadd.f32 %v2703_v23, %v2673_v18 }
 0x2d2   :  { %2610 = vst [vmem:[#allocation12 + $0xe8] sm:$0xff] %v2578_v62  ;;  %v2642_v13 = vsub.f32 %v2578_v62, %v2514_v43 }
 0x2d3   :  { %v2328_v8 = vpop.f32.mrf.mxu2  ;;  %v2377_v2 = vpop.f32.mrf.mxu3 }
 0x2d4   :  { %v2329_v39 = vadd.f32 %v2328_v8, %v2280_v60  ;;  %v2674_v45 = vmul.f32 %v2642_v13, %v2642_v13 }
 0x2d6   :  { %v2378_v31 = vadd.f32 %v2377_v2, %v2329_v39  ;;  %v2705_v1 = vadd.f32 %v2704_v25, %v2674_v45 }
 0x2d8   :  { %v2580_v57 = vadd.f32 %v4328_v51, %v2378_v31  ;;  %v2706_v29 = vadd.f32 %v2705_v1, %v2675_v58 }
 0x2da   :  { %2612 = vst [vmem:[#allocation12 + $0xf8] sm:$0xff] %v2580_v57  ;;  %v2644_v47 = vsub.f32 %v2580_v57, %v2516_v49 }
 0x2db   :  { %2773 = dma.vmem_to_hbm [thread:$0]  %s2766_s17, 4096, %s2768_s15, [#allocation6], %s3773_s13, %s3773_s13, %s3774_s14  }
 0x2dc   :  { %v2676_v4 = vmul.f32 %v2644_v47, %v2644_v47  ;;  %s2794_s14 = sshll.u32 %s4421_s7, 4  ;;  %s2795_s14 = int_to_ptr.hbm [resolvable:$true] %s2794_s14 }
 0x2de   :  { %v2707_v48 = vadd.f32 %v2706_v29, %v2676_v4 }
 0x2e0   :  { %2708 = vadd.xlane.f32.xlu0 %v2707_v48 }
 0x2e8   :  { %2750 = vadd.xlane.f32.xlu0 %v4222_v20 }
 0x353   :  { %v2709_v20 = vpop.xlane.xlu0 %2708 }
 0x354   :  { %v2710_v55 = vrot.slane %v2709_v20, 4 }
 0x356   :  { %v2711_v51 = vadd.f32 %v2710_v55, %v2709_v20 }
 0x358   :  { %v2712_v56 = vrot.slane %v2711_v51, 2 }
 0x35a   :  { %v2713_v17 = vadd.f32 %v2712_v56, %v2711_v51 }
 0x35b   :  { %v2751_v37 = vpop.xlane.xlu0 %2750 }
 0x35c   :  { %v2752_v24 = vrot.slane %v2751_v37, 4  ;;  %v2714_v21 = vrot.slane %v2713_v17, 1 }
 0x35e   :  { %v2753_v5 = vadd.f32 %v2752_v24, %v2751_v37  ;;  %v2715_v41 = vadd.f32 %v2714_v21, %v2713_v17 }
 0x360   :  { %v2754_v15 = vrot.slane %v2753_v5, 2  ;;  %3551 = vpush %v2715_v41 }
 0x362   :  { %v2755_v52 = vadd.f32 %v2754_v15, %v2753_v5 }
 0x364   :  { %v2756_v7 = vrot.slane %v2755_v52, 1 }
 0x366   :  { %v2757_v12 = vadd.f32 %v2756_v7, %v2755_v52 }
 0x368   :  { %3553 = vpush %v2757_v12 }
 0x391   :  { %s3552_s1 = spop %3551 }
 0x392   :  { %v2717_v35 = vstv %s3552_s1 }
 0x393   :  { %2718 = vst [vmem:[#allocation15] sm:$0xff] %v2717_v35 }
 0x394   :  { %2797 = dma.vmem_to_hbm [thread:$0]  %s2793_s6, 128, %s2795_s14, [#allocation14]  }
 0x399   :  { %s3554_s23 = spop %3553 }
 0x39a   :  { %v2759_v6 = vstv %s3554_s23 }
 0x39b   :  { %2760 = vst [vmem:[#allocation16] sm:$0xff] %v2759_v6 }
 0x39c   :  { %2808 = dma.vmem_to_hbm [thread:$0]  %s2804_s22, 128, %s2806_s20, [#allocation17]  }
 0x39d   :  { %3766 = dma.done.wait [#allocation6], 4096  }
 0x39e   :  { %3767 = vsyncadd [#allocation6], 4294963200 }
 0x39f   :  { %3768 = dma.done.wait [#allocation14], 4224  }
 0x3a0   :  { %3769 = vsyncadd [#allocation14], 4294963072 }
 0x3a1   :  { %3770 = dma.done.wait [#allocation17], 128  }
 0x3a2   :  { %3771 = vsyncadd [#allocation17], 4294967168 }
 0x3a3   :  { %2825 = vsyncpa [#allocation5], 1 }
 0x3a4   :  { %2826 = vsyncpa [#allocation8], 1 }
 0x3a5   :  { %2827 = vsyncpa [#allocation11], 1 }
 0x3a6   :  { %2828 = vsyncpa [#allocation6], 1 }
 0x3a7   :  { %2829 = vsyncpa [#allocation14], 1 }
 0x3a8   :  { %2830 = vsyncpa [#allocation17], 1 }

</bundles_post_ra>
